<compile_context>
chip_gen: v7x
topology: tpu7x:2x2x1
jax: 0.10.0
libtpu: 0.0.40
codegen_flags: <defaults>
</compile_context>

<pallas_src>
import functools

import jax
import jax.numpy as jnp
from jax.experimental import pallas as pl
from jax.experimental.pallas import tpu as pltpu


# ---------------------------------------------------------------------------
# In-kernel helpers
# ---------------------------------------------------------------------------
def _layernorm(x, gamma, beta, eps=1e-5):
    """PyTorch nn.LayerNorm semantics (biased variance, eps inside rsqrt)."""
    mu = jnp.mean(x, axis=-1, keepdims=True)
    var = jnp.mean((x - mu) ** 2, axis=-1, keepdims=True)
    return (x - mu) * jax.lax.rsqrt(var + eps) * gamma + beta


# ---------------------------------------------------------------------------
# Fused Pallas kernel: one grid point = (batch block, layer)
# ---------------------------------------------------------------------------
def transformer_pm2_kernel(x_ref, ln_g_ref, ln_b_ref, wqkv_ref, wo_ref,
                           ffw_ref, ffb_ref, k_ref, out_ref,
                           *, heads, dim_head, seq_len):
    inner = heads * dim_head
    M = out_ref.shape[0]                                # B_TILE * seq_len rows

    # Layer 0: load this batch block's tokens into the carried state
    # (the output block stays VMEM-resident across the 'arbitrary' depth axis).
    @pl.when(pl.program_id(1) == 0)
    def _():
        out_ref[...] = x_ref[...]

    x = out_ref[...]                                    # (M, dim) f32

    # Similarity-gate temperature (learnable scalar K, read from SMEM).
    k_val = k_ref[0, 0]
    inv_k2 = 1.0 / (k_val * k_val)

    # Block-diagonal additive mask: a token only attends to tokens of its own
    # batch element.  Built with f32 iota + floor (no vector integer division).
    inv_n = 1.0 / float(seq_len)
    ri = jax.lax.broadcasted_iota(jnp.int32, (M, M), 0).astype(jnp.float32)
    ci = jax.lax.broadcasted_iota(jnp.int32, (M, M), 1).astype(jnp.float32)
    same = jnp.floor(ri * inv_n) == jnp.floor(ci * inv_n)
    neg_mask = jnp.where(same, 0.0, -1e30)              # (M, M) f32

    # ---- pre-LN + fused QKV projection (scale folded into Wq columns) -----
    xn = _layernorm(x, ln_g_ref[...], ln_b_ref[...])
    qkv = jnp.dot(xn.astype(jnp.bfloat16), wqkv_ref[...],
                  preferred_element_type=jnp.float32)   # (M, 3*inner) f32

    # ---- per-head gated attention (full-width, block-diag masked) ----------
    head_outs = []
    for h in range(heads):
        cs, ce = h * dim_head, (h + 1) * dim_head

        # sg(x): gate = tanh( (ex ex^T / ||ex_row||) / K^2 ), ex from RAW x.
        ex = x[:, cs:ce]                                # (M, dh) f32
        sim = jnp.einsum('nd,md->nm', ex, ex,
                         preferred_element_type=jnp.float32)
        inv_nrm = jax.lax.rsqrt(jnp.sum(ex * ex, axis=-1, keepdims=True))
        gate = jnp.tanh(sim * inv_nrm * inv_k2)         # f32 (cross-batch
                                                        # entries killed below)

        q_h = qkv[:, cs:ce].astype(jnp.bfloat16)        # scale already in Wq
        k_h = qkv[:, inner + cs:inner + ce].astype(jnp.bfloat16)
        v_h = qkv[:, 2 * inner + cs:2 * inner + ce].astype(jnp.bfloat16)

        dots = jnp.einsum('nd,md->nm', q_h, k_h,
                          preferred_element_type=jnp.float32)
        dots = dots + neg_mask                          # kill cross-batch
        dots = dots - jnp.max(dots, axis=-1, keepdims=True)
        e = jnp.exp(dots)                               # masked entries -> 0
        attn = e * pl.reciprocal(jnp.sum(e, axis=-1, keepdims=True),
                                 approx=True)
        attn = gate * attn                              # d * softmax(...)
        head_outs.append(jnp.dot(attn.astype(jnp.bfloat16), v_h,
                                 preferred_element_type=jnp.float32))

    # In-register concat of head outputs (no masked partial scratch stores).
    attn_out = jnp.concatenate(head_outs, axis=-1)      # (M, inner) f32

    # ---- output projection + residual (tau folded into Wo) -----------------
    x = x + jnp.dot(attn_out.astype(jnp.bfloat16), wo_ref[...],
                    preferred_element_type=jnp.float32)

    # ---- ff = Linear(dim, dim) + residual (tau folded into Wff / bff) ------
    x = x + (jnp.dot(x.astype(jnp.bfloat16), ffw_ref[...],
                     preferred_element_type=jnp.float32) + ffb_ref[...])

    out_ref[...] = x


# ---------------------------------------------------------------------------
# Wrapper: one pallas_call for the whole layer stack, batch-blocked
# ---------------------------------------------------------------------------
def _pick_b_tile(B, N, target_rows=128):
    """Largest divisor of B with B_TILE*N >= ~target_rows rows (and mult of 8),
    while keeping >= 2 grid steps on the parallel axis when possible (v7x)."""
    want = max(1, target_rows // max(N, 1))
    bt = 1
    for d in range(1, B + 1):
        if B % d != 0 or d > want:
            continue
        if (d * N) % 8 != 0 and d * N != B * N:
            continue
        bt = d
    if bt == B and B > 1 and B % 2 == 0 and ((B // 2) * N) % 8 == 0:
        bt = B // 2
    if (bt * N) % 8 != 0:
        bt = B
    return bt


def transformer_pm2_forward(x, params, *, heads, dim_head):
    B, N, dim = x.shape
    inner = heads * dim_head
    assert inner == dim, "TransformerPM2.sg requires heads*dim_head == dim"
    depth = params['wqkv'].shape[0]

    b_tile = _pick_b_tile(B, N)
    assert B % b_tile == 0
    TM = b_tile * N                                     # rows per grid step

    x2 = x.reshape(B * N, dim)                          # free, contiguous

    kernel = functools.partial(transformer_pm2_kernel, heads=heads,
                               dim_head=dim_head, seq_len=N)

    grid_spec = pltpu.PrefetchScalarGridSpec(
        num_scalar_prefetch=0,
        grid=(B // b_tile, depth),
        in_specs=[
            pl.BlockSpec((TM, dim), lambda b, l: (b, 0)),                   # x
            pl.BlockSpec((None, 1, dim), lambda b, l: (l, 0, 0)),           # LN gamma
            pl.BlockSpec((None, 1, dim), lambda b, l: (l, 0, 0)),           # LN beta
            pl.BlockSpec((None, dim, 3 * inner), lambda b, l: (l, 0, 0)),   # Wqkv bf16
            pl.BlockSpec((None, inner, dim), lambda b, l: (l, 0, 0)),       # Wo   bf16
            pl.BlockSpec((None, dim, dim), lambda b, l: (l, 0, 0)),         # Wff  bf16
            pl.BlockSpec((None, 1, dim), lambda b, l: (l, 0, 0)),           # ff bias
            pl.BlockSpec((1, 1), lambda b, l: (0, 0),
                         memory_space=pltpu.MemorySpace.SMEM),              # K scalar
        ],
        out_specs=pl.BlockSpec((TM, dim), lambda b, l: (b, 0)),
    )

    out2 = pl.pallas_call(
        kernel,
        out_shape=jax.ShapeDtypeStruct((B * N, dim), jnp.float32),
        grid_spec=grid_spec,
        compiler_params=pltpu.CompilerParams(
            dimension_semantics=("parallel", "arbitrary"),
            # Per-step footprint (state slab + per-layer weights, double
            # buffered) is well under the v7x 64 MiB physical VMEM; 32 MiB is
            # a comfortable explicit budget on all of v5e/v6e/v7x.
            vmem_limit_bytes=32 * 1024 * 1024),
    )(x2, params['ln_g'], params['ln_b'], params['wqkv'], params['wo'],
      params['ffw'], params['ffb'], params['K'])

    return out2.reshape(B, N, dim)


# ---------------------------------------------------------------------------
# Parameters: raw f32 weights + packing (fold scale into Wq, tau into Wo/FF)
# ---------------------------------------------------------------------------
def init_params(key, *, dim, depth, heads, dim_head):
    inner = heads * dim_head
    keys = jax.random.split(key, 8)

    def nrm(k, shape, s=0.1):
        return s * jax.random.normal(k, shape, jnp.float32)

    return {
        'ln_g': 1.0 + 0.05 * jax.random.normal(keys[0], (depth, 1, dim), jnp.float32),
        'ln_b': 0.05 * jax.random.normal(keys[1], (depth, 1, dim), jnp.float32),
        'wq':  nrm(keys[2], (depth, dim, inner)),
        'wk':  nrm(keys[3], (depth, dim, inner)),
        'wv':  nrm(keys[4], (depth, dim, inner)),
        'wo':  nrm(keys[5], (depth, inner, dim)),
        'ffw': nrm(keys[6], (depth, dim, dim)),
        'ffb': nrm(keys[7], (depth, 1, dim)),
        'K':   jnp.full((1, 1), 0.5, jnp.float32),      # learnable scalar K
    }


def pack_params(raw, *, tau, dim_head):
    """Kernel-side weights: fused QKV with the attention scale folded into the
    Wq columns, tau folded into Wo/Wff/bff, matmul weights in bf16.  scale=0.25
    and tau=0.5 are powers of two, so folding commutes exactly with the bf16
    rounding (no extra error vs. applying them explicitly)."""
    scale = dim_head ** -0.5
    wqkv = jnp.concatenate([raw['wq'] * scale, raw['wk'], raw['wv']], axis=-1)
    return {
        'ln_g': raw['ln_g'],                            # (depth, 1, dim)   f32
        'ln_b': raw['ln_b'],                            # (depth, 1, dim)   f32
        'wqkv': wqkv.astype(jnp.bfloat16),              # (depth, dim, 3*inner)
        'wo':   (raw['wo'] * tau).astype(jnp.bfloat16), # (depth, inner, dim)
        'ffw':  (raw['ffw'] * tau).astype(jnp.bfloat16),# (depth, dim, dim)
        'ffb':  raw['ffb'] * tau,                       # (depth, 1, dim)   f32
        'K':    raw['K'],                               # (1, 1)            f32
    }


# ---------------------------------------------------------------------------
# Pure-JAX reference (mirrors the PyTorch module; weights rounded to bf16 and
# activations cast to bf16 before matmuls, matching the kernel's numerics)
# ---------------------------------------------------------------------------
def reference_forward(x, raw, *, heads, dim_head, tau):
    B, N, dim = x.shape
    inner = heads * dim_head
    depth = raw['wq'].shape[0]
    scale = dim_head ** -0.5
    K = raw['K'][0, 0]

    def r(w):
        return w.astype(jnp.bfloat16).astype(jnp.float32)

    def bdot(a, w):
        return jnp.dot(a.astype(jnp.bfloat16).astype(jnp.float32), r(w))

    def split_heads(t):
        return t.reshape(B, N, heads, dim_head).transpose(0, 2, 1, 3)

    for l in range(depth):
        # sg(x) on the raw residual stream
        ex = split_heads(x)
        sim = jnp.einsum('bhnd,bhmd->bhnm', ex, ex)
        nrm = jnp.sqrt(jnp.sum(ex * ex, axis=-1, keepdims=True))
        gate = jnp.tanh(sim / nrm / (K * K))
        # attention (pre-LN)
        mu = x.mean(-1, keepdims=True)
        var = ((x - mu) ** 2).mean(-1, keepdims=True)
        xn = (x - mu) * jax.lax.rsqrt(var + 1e-5) * raw['ln_g'][l] + raw['ln_b'][l]
        q = split_heads(bdot(xn, raw['wq'][l]))
        k = split_heads(bdot(xn, raw['wk'][l]))
        v = split_heads(bdot(xn, raw['wv'][l]))
        dots = jnp.einsum('bhnd,bhmd->bhnm', q, k) * scale
        attn = jax.nn.softmax(dots, axis=-1)
        attn = gate * attn
        out = jnp.einsum('bhnm,bhmd->bhnd', attn, v)
        out = out.transpose(0, 2, 1, 3).reshape(B, N, inner)
        x = x + tau * bdot(out, raw['wo'][l])
        x = x + tau * (bdot(x, raw['ffw'][l]) + raw['ffb'][l])
    return x


# ---------------------------------------------------------------------------
if __name__ == "__main__":
    # Config consistent with TransformerPM2(dim, depth, heads, dim_head,
    # tau=0.5, dropout=0, weight_norm -> effective weights, grid unused).
    # batch=32 so the batch-blocked grid has 2 parallel steps of 128 rows each.
    batch, seq, dim = 32, 8, 32
    depth, heads, dim_head = 2, 2, 16
    tau = 0.5

    key = jax.random.PRNGKey(0)
    k_x, k_p = jax.random.split(key)
    x = jax.random.normal(k_x, (batch, seq, dim), jnp.float32)
    raw = init_params(k_p, dim=dim, depth=depth, heads=heads, dim_head=dim_head)
    params = pack_params(raw, tau=tau, dim_head=dim_head)

    out = transformer_pm2_forward(x, params, heads=heads, dim_head=dim_head)
    out = jax.block_until_ready(out)

    ref = reference_forward(x, raw, heads=heads, dim_head=dim_head, tau=tau)

    assert out.shape == (batch, seq, dim)
    assert bool(jnp.all(jnp.isfinite(out)))
    assert bool(jnp.allclose(out, ref, rtol=2e-2, atol=2e-2)), \
        float(jnp.max(jnp.abs(out - ref)))
    print("KERNEL_OK")
</pallas_src>

<mosaic_0001>
module attributes {stable_mosaic.version = 11 : i64} {
  func.func @transformer_pm2_kernel(%arg0: i32, %arg1: i32, %arg2: memref<128x32xf32, #tpu.memory_space<vmem>>, %arg3: memref<1x1x32xf32, #tpu.memory_space<vmem>>, %arg4: memref<1x1x32xf32, #tpu.memory_space<vmem>>, %arg5: memref<1x32x96xbf16, #tpu.memory_space<vmem>>, %arg6: memref<1x32x32xbf16, #tpu.memory_space<vmem>>, %arg7: memref<1x32x32xbf16, #tpu.memory_space<vmem>>, %arg8: memref<1x1x32xf32, #tpu.memory_space<vmem>>, %arg9: memref<1x1xf32, #tpu.memory_space<smem>>, %arg10: memref<128x32xf32, #tpu.memory_space<vmem>>) attributes {dimension_semantics = [#tpu.dimension_semantics<parallel>, #tpu.dimension_semantics<arbitrary>], iteration_bounds = array<i64: 2, 2>, scalar_prefetch = 0 : i64, scratch_operands = 0 : i64, tpu.core_type = #tpu.core_type<tc>, window_params = [{transform_indices = @transform_0, window_bounds = array<i64: 128, 32>}, {transform_indices = @transform_1, window_bounds = array<i64: 1, 1, 32>}, {transform_indices = @transform_2, window_bounds = array<i64: 1, 1, 32>}, {transform_indices = @transform_3, window_bounds = array<i64: 1, 32, 96>}, {transform_indices = @transform_4, window_bounds = array<i64: 1, 32, 32>}, {transform_indices = @transform_5, window_bounds = array<i64: 1, 32, 32>}, {transform_indices = @transform_6, window_bounds = array<i64: 1, 1, 32>}, {transform_indices = @transform_7, window_bounds = array<i64: 1, 1>}, {transform_indices = @transform_8, window_bounds = array<i64: 128, 32>}]} {
    %c0_i32 = arith.constant 0 : i32
    %0 = arith.cmpi eq, %arg1, %c0_i32 : i32
    %1 = arith.extui %0 : i1 to i32
    %c0_i32_0 = arith.constant 0 : i32
    %2 = arith.cmpi ne, %1, %c0_i32_0 : i32
    scf.if %2 {
      %c0_48 = arith.constant 0 : index
      %c0_49 = arith.constant 0 : index
      %131 = vector.load %arg2[%c0_48, %c0_49] : memref<128x32xf32, #tpu.memory_space<vmem>>, vector<128x32xf32>
      %c0_50 = arith.constant 0 : index
      %c0_51 = arith.constant 0 : index
      %132 = vector.load %arg10[%c0_50, %c0_51] : memref<128x32xf32, #tpu.memory_space<vmem>>, vector<128x32xf32>
      tpu.vector_store %arg10[%c0_50, %c0_51], %131 {strides = array<i32>} : memref<128x32xf32, #tpu.memory_space<vmem>>, vector<128x32xf32>,
    } else {
    }
    %c0 = arith.constant 0 : index
    %c0_1 = arith.constant 0 : index
    %3 = vector.load %arg10[%c0, %c0_1] : memref<128x32xf32, #tpu.memory_space<vmem>>, vector<128x32xf32>
    %c0_2 = arith.constant 0 : index
    %c0_3 = arith.constant 0 : index
    %4 = memref.load %arg9[%c0_2, %c0_3] : memref<1x1xf32, #tpu.memory_space<smem>>
    %5 = arith.mulf %4, %4 : f32
    %cst = arith.constant 1.000000e+00 : f32
    %6 = arith.divf %cst, %5 : f32
    %7 = tpu.iota {dimensions = array<i32: 0>} : vector<128x128xi32>
    %8 = arith.sitofp %7 : vector<128x128xi32> to vector<128x128xf32>
    %9 = tpu.iota {dimensions = array<i32: 1>} : vector<128x128xi32>
    %10 = arith.sitofp %9 : vector<128x128xi32> to vector<128x128xf32>
    %cst_4 = arith.constant 1.250000e-01 : f32
    %11 = vector.broadcast %cst_4 : f32 to vector<128x128xf32>
    %12 = arith.mulf %8, %11 : vector<128x128xf32>
    %13 = math.floor %12 : vector<128x128xf32>
    %cst_5 = arith.constant 1.250000e-01 : f32
    %14 = vector.broadcast %cst_5 : f32 to vector<128x128xf32>
    %15 = arith.mulf %10, %14 : vector<128x128xf32>
    %16 = math.floor %15 : vector<128x128xf32>
    %17 = arith.cmpf oeq, %13, %16 : vector<128x128xf32>
    %cst_6 = arith.constant 0.000000e+00 : f32
    %cst_7 = arith.constant -1.000000e+30 : f32
    %18 = vector.broadcast %cst_6 : f32 to vector<128x128xf32>
    %19 = vector.broadcast %cst_7 : f32 to vector<128x128xf32>
    %20 = arith.select %17, %18, %19 : vector<128x128xi1>, vector<128x128xf32>
    %c0_8 = arith.constant 0 : index
    %c0_9 = arith.constant 0 : index
    %c0_10 = arith.constant 0 : index
    %21 = vector.load %arg3[%c0_8, %c0_9, %c0_10] : memref<1x1x32xf32, #tpu.memory_space<vmem>>, vector<1x1x32xf32>
    %22 = vector.shape_cast %21 : vector<1x1x32xf32> to vector<1x32xf32>
    %c0_11 = arith.constant 0 : index
    %c0_12 = arith.constant 0 : index
    %c0_13 = arith.constant 0 : index
    %23 = vector.load %arg4[%c0_11, %c0_12, %c0_13] : memref<1x1x32xf32, #tpu.memory_space<vmem>>, vector<1x1x32xf32>
    %24 = vector.shape_cast %23 : vector<1x1x32xf32> to vector<1x32xf32>
    %cst_14 = arith.constant dense<0.000000e+00> : vector<128xf32>
    %25 = vector.multi_reduction <add>, %3, %cst_14 [1] : vector<128x32xf32> to vector<128xf32>
    %26 = vector.shape_cast %25 : vector<128xf32> to vector<128x1xf32>
    %cst_15 = arith.constant 3.200000e+01 : f32
    %27 = vector.broadcast %cst_15 : f32 to vector<128x1xf32>
    %28 = arith.divf %26, %27 : vector<128x1xf32>
    %29 = vector.broadcast %28 : vector<128x1xf32> to vector<128x32xf32>
    %30 = arith.subf %3, %29 : vector<128x32xf32>
    %31 = arith.mulf %30, %30 : vector<128x32xf32>
    %cst_16 = arith.constant dense<0.000000e+00> : vector<128xf32>
    %32 = vector.multi_reduction <add>, %31, %cst_16 [1] : vector<128x32xf32> to vector<128xf32>
    %33 = vector.shape_cast %32 : vector<128xf32> to vector<128x1xf32>
    %cst_17 = arith.constant 3.200000e+01 : f32
    %34 = vector.broadcast %cst_17 : f32 to vector<128x1xf32>
    %35 = arith.divf %33, %34 : vector<128x1xf32>
    %36 = vector.broadcast %28 : vector<128x1xf32> to vector<128x32xf32>
    %37 = arith.subf %3, %36 : vector<128x32xf32>
    %cst_18 = arith.constant 9.99999974E-6 : f32
    %38 = vector.broadcast %cst_18 : f32 to vector<128x1xf32>
    %39 = arith.addf %35, %38 : vector<128x1xf32>
    %40 = math.rsqrt %39 : vector<128x1xf32>
    %41 = vector.broadcast %40 : vector<128x1xf32> to vector<128x32xf32>
    %42 = arith.mulf %37, %41 : vector<128x32xf32>
    %43 = vector.broadcast %22 : vector<1x32xf32> to vector<128x32xf32>
    %44 = arith.mulf %42, %43 : vector<128x32xf32>
    %45 = vector.broadcast %24 : vector<1x32xf32> to vector<128x32xf32>
    %46 = arith.addf %44, %45 : vector<128x32xf32>
    %47 = arith.truncf %46 : vector<128x32xf32> to vector<128x32xbf16>
    %c0_19 = arith.constant 0 : index
    %c0_20 = arith.constant 0 : index
    %c0_21 = arith.constant 0 : index
    %48 = vector.load %arg5[%c0_19, %c0_20, %c0_21] : memref<1x32x96xbf16, #tpu.memory_space<vmem>>, vector<1x32x96xbf16>
    %49 = vector.shape_cast %48 : vector<1x32x96xbf16> to vector<32x96xbf16>
    %cst_22 = arith.constant dense<0.000000e+00> : vector<128x96xf32>
    %50 = tpu.matmul %47, %49, %cst_22 {dimension_numbers = #tpu.dot_dimension_numbers<[1], [0], [0], [1], [0, 0, 1, 1], [], []>} : vector<128x32xbf16>, vector<32x96xbf16>, vector<128x96xf32> -> vector<128x96xf32>
    %51 = vector.extract_strided_slice %3 {offsets = [0, 0], sizes = [128, 16], strides = [1, 1]} : vector<128x32xf32> to vector<128x16xf32>
    "tpu.trace_start"() <{level = 10 : i32, message = "nd,md->nm"}> : () -> ()
    %cst_23 = arith.constant dense<0.000000e+00> : vector<128x128xf32>
    %52 = tpu.matmul %51, %51, %cst_23 {dimension_numbers = #tpu.dot_dimension_numbers<[1], [1], [0], [0], [0, 0, 1, 0], [], []>} : vector<128x16xf32>, vector<128x16xf32>, vector<128x128xf32> -> vector<128x128xf32>
    "tpu.trace_stop"() : () -> ()
    %53 = arith.mulf %51, %51 : vector<128x16xf32>
    %cst_24 = arith.constant dense<0.000000e+00> : vector<128xf32>
    %54 = vector.multi_reduction <add>, %53, %cst_24 [1] : vector<128x16xf32> to vector<128xf32>
    %55 = vector.shape_cast %54 : vector<128xf32> to vector<128x1xf32>
    %56 = math.rsqrt %55 : vector<128x1xf32>
    %57 = vector.broadcast %56 : vector<128x1xf32> to vector<128x128xf32>
    %58 = arith.mulf %52, %57 : vector<128x128xf32>
    %59 = vector.broadcast %6 : f32 to vector<128x128xf32>
    %60 = arith.mulf %58, %59 : vector<128x128xf32>
    %61 = math.tanh %60 : vector<128x128xf32>
    %62 = vector.extract_strided_slice %50 {offsets = [0, 0], sizes = [128, 16], strides = [1, 1]} : vector<128x96xf32> to vector<128x16xf32>
    %63 = arith.truncf %62 : vector<128x16xf32> to vector<128x16xbf16>
    %64 = vector.extract_strided_slice %50 {offsets = [0, 32], sizes = [128, 16], strides = [1, 1]} : vector<128x96xf32> to vector<128x16xf32>
    %65 = arith.truncf %64 : vector<128x16xf32> to vector<128x16xbf16>
    %66 = vector.extract_strided_slice %50 {offsets = [0, 64], sizes = [128, 16], strides = [1, 1]} : vector<128x96xf32> to vector<128x16xf32>
    %67 = arith.truncf %66 : vector<128x16xf32> to vector<128x16xbf16>
    "tpu.trace_start"() <{level = 10 : i32, message = "nd,md->nm"}> : () -> ()
    %cst_25 = arith.constant dense<0.000000e+00> : vector<128x128xf32>
    %68 = tpu.matmul %63, %65, %cst_25 {dimension_numbers = #tpu.dot_dimension_numbers<[1], [1], [0], [0], [0, 0, 1, 0], [], []>} : vector<128x16xbf16>, vector<128x16xbf16>, vector<128x128xf32> -> vector<128x128xf32>
    "tpu.trace_stop"() : () -> ()
    %69 = arith.addf %68, %20 : vector<128x128xf32>
    %cst_26 = arith.constant dense<0xFF800000> : vector<128xf32>
    %70 = vector.multi_reduction <maximumf>, %69, %cst_26 [1] : vector<128x128xf32> to vector<128xf32>
    %71 = vector.shape_cast %70 : vector<128xf32> to vector<128x1xf32>
    %72 = vector.broadcast %71 : vector<128x1xf32> to vector<128x128xf32>
    %73 = arith.subf %69, %72 : vector<128x128xf32>
    %74 = math.exp %73 : vector<128x128xf32>
    %cst_27 = arith.constant dense<0.000000e+00> : vector<128xf32>
    %75 = vector.multi_reduction <add>, %74, %cst_27 [1] : vector<128x128xf32> to vector<128xf32>
    %76 = vector.shape_cast %75 : vector<128xf32> to vector<128x1xf32>
    %77 = tpu.reciprocal %76 {approx = true} : vector<128x1xf32> -> vector<128x1xf32>
    %78 = vector.broadcast %77 : vector<128x1xf32> to vector<128x128xf32>
    %79 = arith.mulf %74, %78 : vector<128x128xf32>
    %80 = arith.mulf %61, %79 : vector<128x128xf32>
    %81 = arith.truncf %80 : vector<128x128xf32> to vector<128x128xbf16>
    %cst_28 = arith.constant dense<0.000000e+00> : vector<128x16xf32>
    %82 = tpu.matmul %81, %67, %cst_28 {dimension_numbers = #tpu.dot_dimension_numbers<[1], [0], [0], [1], [0, 0, 1, 1], [], []>} : vector<128x128xbf16>, vector<128x16xbf16>, vector<128x16xf32> -> vector<128x16xf32>
    %83 = vector.extract_strided_slice %3 {offsets = [0, 16], sizes = [128, 16], strides = [1, 1]} : vector<128x32xf32> to vector<128x16xf32>
    "tpu.trace_start"() <{level = 10 : i32, message = "nd,md->nm"}> : () -> ()
    %cst_29 = arith.constant dense<0.000000e+00> : vector<128x128xf32>
    %84 = tpu.matmul %83, %83, %cst_29 {dimension_numbers = #tpu.dot_dimension_numbers<[1], [1], [0], [0], [0, 0, 1, 0], [], []>} : vector<128x16xf32>, vector<128x16xf32>, vector<128x128xf32> -> vector<128x128xf32>
    "tpu.trace_stop"() : () -> ()
    %85 = arith.mulf %83, %83 : vector<128x16xf32>
    %cst_30 = arith.constant dense<0.000000e+00> : vector<128xf32>
    %86 = vector.multi_reduction <add>, %85, %cst_30 [1] : vector<128x16xf32> to vector<128xf32>
    %87 = vector.shape_cast %86 : vector<128xf32> to vector<128x1xf32>
    %88 = math.rsqrt %87 : vector<128x1xf32>
    %89 = vector.broadcast %88 : vector<128x1xf32> to vector<128x128xf32>
    %90 = arith.mulf %84, %89 : vector<128x128xf32>
    %91 = vector.broadcast %6 : f32 to vector<128x128xf32>
    %92 = arith.mulf %90, %91 : vector<128x128xf32>
    %93 = math.tanh %92 : vector<128x128xf32>
    %94 = vector.extract_strided_slice %50 {offsets = [0, 16], sizes = [128, 16], strides = [1, 1]} : vector<128x96xf32> to vector<128x16xf32>
    %95 = arith.truncf %94 : vector<128x16xf32> to vector<128x16xbf16>
    %96 = vector.extract_strided_slice %50 {offsets = [0, 48], sizes = [128, 16], strides = [1, 1]} : vector<128x96xf32> to vector<128x16xf32>
    %97 = arith.truncf %96 : vector<128x16xf32> to vector<128x16xbf16>
    %98 = vector.extract_strided_slice %50 {offsets = [0, 80], sizes = [128, 16], strides = [1, 1]} : vector<128x96xf32> to vector<128x16xf32>
    %99 = arith.truncf %98 : vector<128x16xf32> to vector<128x16xbf16>
    "tpu.trace_start"() <{level = 10 : i32, message = "nd,md->nm"}> : () -> ()
    %cst_31 = arith.constant dense<0.000000e+00> : vector<128x128xf32>
    %100 = tpu.matmul %95, %97, %cst_31 {dimension_numbers = #tpu.dot_dimension_numbers<[1], [1], [0], [0], [0, 0, 1, 0], [], []>} : vector<128x16xbf16>, vector<128x16xbf16>, vector<128x128xf32> -> vector<128x128xf32>
    "tpu.trace_stop"() : () -> ()
    %101 = arith.addf %100, %20 : vector<128x128xf32>
    %cst_32 = arith.constant dense<0xFF800000> : vector<128xf32>
    %102 = vector.multi_reduction <maximumf>, %101, %cst_32 [1] : vector<128x128xf32> to vector<128xf32>
    %103 = vector.shape_cast %102 : vector<128xf32> to vector<128x1xf32>
    %104 = vector.broadcast %103 : vector<128x1xf32> to vector<128x128xf32>
    %105 = arith.subf %101, %104 : vector<128x128xf32>
    %106 = math.exp %105 : vector<128x128xf32>
    %cst_33 = arith.constant dense<0.000000e+00> : vector<128xf32>
    %107 = vector.multi_reduction <add>, %106, %cst_33 [1] : vector<128x128xf32> to vector<128xf32>
    %108 = vector.shape_cast %107 : vector<128xf32> to vector<128x1xf32>
    %109 = tpu.reciprocal %108 {approx = true} : vector<128x1xf32> -> vector<128x1xf32>
    %110 = vector.broadcast %109 : vector<128x1xf32> to vector<128x128xf32>
    %111 = arith.mulf %106, %110 : vector<128x128xf32>
    %112 = arith.mulf %93, %111 : vector<128x128xf32>
    %113 = arith.truncf %112 : vector<128x128xf32> to vector<128x128xbf16>
    %cst_34 = arith.constant dense<0.000000e+00> : vector<128x16xf32>
    %114 = tpu.matmul %113, %99, %cst_34 {dimension_numbers = #tpu.dot_dimension_numbers<[1], [0], [0], [1], [0, 0, 1, 1], [], []>} : vector<128x128xbf16>, vector<128x16xbf16>, vector<128x16xf32> -> vector<128x16xf32>
    %115 = tpu.concatenate %82, %114 in 1 : vector<128x16xf32>, vector<128x16xf32> -> vector<128x32xf32>
    %116 = arith.truncf %115 : vector<128x32xf32> to vector<128x32xbf16>
    %c0_35 = arith.constant 0 : index
    %c0_36 = arith.constant 0 : index
    %c0_37 = arith.constant 0 : index
    %117 = vector.load %arg6[%c0_35, %c0_36, %c0_37] : memref<1x32x32xbf16, #tpu.memory_space<vmem>>, vector<1x32x32xbf16>
    %118 = vector.shape_cast %117 : vector<1x32x32xbf16> to vector<32x32xbf16>
    %cst_38 = arith.constant dense<0.000000e+00> : vector<128x32xf32>
    %119 = tpu.matmul %116, %118, %cst_38 {dimension_numbers = #tpu.dot_dimension_numbers<[1], [0], [0], [1], [0, 0, 1, 1], [], []>} : vector<128x32xbf16>, vector<32x32xbf16>, vector<128x32xf32> -> vector<128x32xf32>
    %120 = arith.addf %3, %119 : vector<128x32xf32>
    %121 = arith.truncf %120 : vector<128x32xf32> to vector<128x32xbf16>
    %c0_39 = arith.constant 0 : index
    %c0_40 = arith.constant 0 : index
    %c0_41 = arith.constant 0 : index
    %122 = vector.load %arg7[%c0_39, %c0_40, %c0_41] : memref<1x32x32xbf16, #tpu.memory_space<vmem>>, vector<1x32x32xbf16>
    %123 = vector.shape_cast %122 : vector<1x32x32xbf16> to vector<32x32xbf16>
    %cst_42 = arith.constant dense<0.000000e+00> : vector<128x32xf32>
    %124 = tpu.matmul %121, %123, %cst_42 {dimension_numbers = #tpu.dot_dimension_numbers<[1], [0], [0], [1], [0, 0, 1, 1], [], []>} : vector<128x32xbf16>, vector<32x32xbf16>, vector<128x32xf32> -> vector<128x32xf32>
    %c0_43 = arith.constant 0 : index
    %c0_44 = arith.constant 0 : index
    %c0_45 = arith.constant 0 : index
    %125 = vector.load %arg8[%c0_43, %c0_44, %c0_45] : memref<1x1x32xf32, #tpu.memory_space<vmem>>, vector<1x1x32xf32>
    %126 = vector.shape_cast %125 : vector<1x1x32xf32> to vector<1x32xf32>
    %127 = vector.broadcast %126 : vector<1x32xf32> to vector<128x32xf32>
    %128 = arith.addf %124, %127 : vector<128x32xf32>
    %129 = arith.addf %120, %128 : vector<128x32xf32>
    %c0_46 = arith.constant 0 : index
    %c0_47 = arith.constant 0 : index
    %130 = vector.load %arg10[%c0_46, %c0_47] : memref<128x32xf32, #tpu.memory_space<vmem>>, vector<128x32xf32>
    tpu.vector_store %arg10[%c0_46, %c0_47], %129 {strides = array<i32>} : memref<128x32xf32, #tpu.memory_space<vmem>>, vector<128x32xf32>,
    return
  }
  func.func @transform_0(%arg0: i32, %arg1: i32) -> (i32, i32) {
    %c0_i32 = arith.constant 0 : i32
    %c0_i32_0 = arith.constant 0 : i32
    return %arg0, %c0_i32 : i32, i32
  }
  func.func @transform_1(%arg0: i32, %arg1: i32) -> (i32, i32, i32) {
    %c0_i32 = arith.constant 0 : i32
    %c0_i32_0 = arith.constant 0 : i32
    %c0_i32_1 = arith.constant 0 : i32
    return %arg1, %c0_i32, %c0_i32_0 : i32, i32, i32
  }
  func.func @transform_2(%arg0: i32, %arg1: i32) -> (i32, i32, i32) {
    %c0_i32 = arith.constant 0 : i32
    %c0_i32_0 = arith.constant 0 : i32
    %c0_i32_1 = arith.constant 0 : i32
    return %arg1, %c0_i32, %c0_i32_0 : i32, i32, i32
  }
  func.func @transform_3(%arg0: i32, %arg1: i32) -> (i32, i32, i32) {
    %c0_i32 = arith.constant 0 : i32
    %c0_i32_0 = arith.constant 0 : i32
    %c0_i32_1 = arith.constant 0 : i32
    return %arg1, %c0_i32, %c0_i32_0 : i32, i32, i32
  }
  func.func @transform_4(%arg0: i32, %arg1: i32) -> (i32, i32, i32) {
    %c0_i32 = arith.constant 0 : i32
    %c0_i32_0 = arith.constant 0 : i32
    %c0_i32_1 = arith.constant 0 : i32
    return %arg1, %c0_i32, %c0_i32_0 : i32, i32, i32
  }
  func.func @transform_5(%arg0: i32, %arg1: i32) -> (i32, i32, i32) {
    %c0_i32 = arith.constant 0 : i32
    %c0_i32_0 = arith.constant 0 : i32
    %c0_i32_1 = arith.constant 0 : i32
    return %arg1, %c0_i32, %c0_i32_0 : i32, i32, i32
  }
  func.func @transform_6(%arg0: i32, %arg1: i32) -> (i32, i32, i32) {
    %c0_i32 = arith.constant 0 : i32
    %c0_i32_0 = arith.constant 0 : i32
    %c0_i32_1 = arith.constant 0 : i32
    return %arg1, %c0_i32, %c0_i32_0 : i32, i32, i32
  }
  func.func @transform_7(%arg0: i32, %arg1: i32) -> (i32, i32) {
    %c0_i32 = arith.constant 0 : i32
    %c0_i32_0 = arith.constant 0 : i32
    %c0_i32_1 = arith.constant 0 : i32
    return %c0_i32, %c0_i32_0 : i32, i32
  }
  func.func @transform_8(%arg0: i32, %arg1: i32) -> (i32, i32) {
    %c0_i32 = arith.constant 0 : i32
    %c0_i32_0 = arith.constant 0 : i32
    return %arg0, %c0_i32 : i32, i32
  }
}

</mosaic_0001>

<bundles_post_ra>
// kernel: tpu_custom_call.1
= control target key start
LH: loop header
LB: loop body
LE: loop exit
PB: predicated region body
PF: predicated region fallthrough
CT: control target
= control target key end

     0   :  { %s4398_s29 = smov 0   ;;  %s4400_s30 = smov 0   ;;  %s6111_s0 = inlined_call_operand.vmem [shape: f32[256,32], index: 0, kind: input, shape index: {}]   ;;  %s6112_s1 = inlined_call_operand.vmem [shape: f32[2,1,32], index: 1, kind: input, shape index: {}]   ;;  %s6113_s2 = inlined_call_operand.vmem [shape: f32[2,1,32], index: 2, kind: input, shape index: {}]   ;;  %s6114_s3 = inlined_call_operand.vmem [shape: bf16[2,32,96], index: 3, kind: input, shape index: {}]   ;;  %s6115_s4 = inlined_call_operand.vmem [shape: bf16[2,32,32], index: 4, kind: input, shape index: {}]   ;;  %s6116_s5 = inlined_call_operand.vmem [shape: bf16[2,32,32], index: 5, kind: input, shape index: {}]   ;;  %s6117_s6 = inlined_call_operand.vmem [shape: f32[2,1,32], index: 6, kind: input, shape index: {}]   ;;  %s6118_s7 = inlined_call_operand.<no memory space> [shape: f32[1,1], index: 7, kind: input, shape index: {}]   ;;  %s6119_s8 = inlined_call_operand.vmem [shape: f32[256,32], index: 8, kind: output, shape index: {}]  }
   0x1   :  { %13 = sst [smem:[#allocation2]] %s6118_s7  ;;  %s4402_s9 = smov 0  }
   0x2   :  { %s4404_s10 = smov 0   ;;  %s4406_s11 = smov 0  }
   0x3 LB: > { %s28_s7 = sadd.s32 1, %s4333_s9  ;;  %s31_s12 = sadd.s32 1, %s4337_s10  ;;  %s4341_s11 = sphi %s4406_s11, %s19_s11   ;;  %s4337_s10 = sphi %s4404_s10, %s6249_s10   ;;  %s4333_s9 = sphi %s4402_s9, %s6248_s9   ;;  %s4329_s30 = sphi %s4400_s30, %s6247_s30   ;;  %s4325_s29 = sphi %s4398_s29, %s6246_s29  }
   0x4   : > { %p29_p0 = scmp.ge.s32.totalorder %s28_s7, 2  ;;  %p3186_p1 = scmp.ge.s32.totalorder %s4341_s11, 1 }
   0x5   : > { %p330_p2 = scmp.lt.s32.totalorder %s4341_s11, 5 }
   0x6   : > { %s6251_s7 = smov (%p29_p0, %s28_s7), 0  ;;  %s6253_s12 = smov (!%p29_p0, %s31_s12), %s4337_s10 }
   0x7   : > { %p331_p3 = pnand %p3186_p1, %p330_p2  ;;  %p33_p4 = scmp.ge.s32.totalorder %s6253_s12, 2 }
   0x9   : > { %s6255_s12 = smov (%p33_p4, %s6253_s12), 0  ;;  %334 = sbr.rel (%p331_p3) target bundleno = 2821 (0xb05), region = 52 }
   0xa   : > { %6153 = sst [smem:[#allocation3_spill]] %s6255_s12 }
  0x10   : > { %s3187_s13 = sshll.u32 %s4329_s30, 4  ;;  %p394_p5 = scmp.lt.s32.totalorder %s4325_s29, 1 }
  0x11   : > { %p389_p6 = scmp.lt.s32.totalorder %s3187_s13, 31  ;;  %p3197_p7 = scmp.ne.s32.totalorder %s4325_s29, 0 }
  0x12   : > { %s4432_s14 = scalar_select %p394_p5, %s4325_s29, 1 }
  0x13   : > { %s6257_s13 = smov (!%p389_p6, %s3187_s13), 31  ;;  %428 = sbr.rel (%p3197_p7) target bundleno = 32 (0x20), region = 56 }
  0x14   : > { %s3188_s21 = sshll.u32 %s6257_s13, 3  ;;  %s3313_s22 = sshll.u32 %s4432_s14, 4  ;;  %vm445_vm0 = vcmask (!%p3197_p7), 261120  }
  0x15   : > { %s4446_s25 = scalar_lea.vmem %s6111_s0, %s3188_s21  ;;  %s4451_s28 = scalar_lea.vmem %s6114_s3, %s3313_s22 }
  0x16   : > { %s4456_s15 = scalar_lea.vmem %s6115_s4, %s3313_s22  ;;  %s4461_s13 = scalar_lea.vmem %s6116_s5, %s3313_s22  ;;  %v429_v0 = vld [vmem:[%s4446_s25] sm:$0xff] (!%p3197_p7)  ;;  %v430_v1 = vld [vmem:[%s4446_s25 + $0x8] sm:$0xff] (!%p3197_p7)  ;;  %v431_v2 = vld [vmem:[%s4446_s25 + $0x10] sm:$0xff] (!%p3197_p7) }
  0x17   : > { %s417_s23 = scalar_lea.vmem %s6117_s6, %s4432_s14  ;;  %s4470_s26 = scalar_lea.vmem %s6119_s8, %s3188_s21  ;;  %v432_v3 = vld [vmem:[%s4446_s25 + $0x18] sm:$0xff] (!%p3197_p7)  ;;  %v433_v4 = vld [vmem:[%s4446_s25 + $0x20] sm:$0xff] (!%p3197_p7)  ;;  %v434_v5 = vld [vmem:[%s4446_s25 + $0x28] sm:$0xff] (!%p3197_p7) }
  0x18   : > { %446 = vst.msk [vmem:[%s4470_s26] sm:$0xff] (!%p3197_p7), %vm445_vm0, %v429_v0  ;;  %447 = vst.msk [vmem:[%s4470_s26 + $0x8] sm:$0xff] (!%p3197_p7), %vm445_vm0, %v430_v1  ;;  %v435_v6 = vld [vmem:[%s4446_s25 + $0x30] sm:$0xff] (!%p3197_p7)  ;;  %v436_v7 = vld [vmem:[%s4446_s25 + $0x38] sm:$0xff] (!%p3197_p7) }
  0x19   : > { %448 = vst.msk [vmem:[%s4470_s26 + $0x10] sm:$0xff] (!%p3197_p7), %vm445_vm0, %v431_v2  ;;  %449 = vst.msk [vmem:[%s4470_s26 + $0x18] sm:$0xff] (!%p3197_p7), %vm445_vm0, %v432_v3  ;;  %v437_v8 = vld [vmem:[%s4446_s25 + $0x40] sm:$0xff] (!%p3197_p7)  ;;  %v438_v9 = vld [vmem:[%s4446_s25 + $0x48] sm:$0xff] (!%p3197_p7) }
  0x1a   : > { %450 = vst.msk [vmem:[%s4470_s26 + $0x20] sm:$0xff] %vm445_vm0, %v433_v4  ;;  %451 = vst.msk [vmem:[%s4470_s26 + $0x28] sm:$0xff] %vm445_vm0, %v434_v5  ;;  %v439_v10 = vld [vmem:[%s4446_s25 + $0x50] sm:$0xff]  ;;  %v440_v11 = vld [vmem:[%s4446_s25 + $0x58] sm:$0xff] }
  0x1b   : > { %452 = vst.msk [vmem:[%s4470_s26 + $0x30] sm:$0xff] %vm445_vm0, %v435_v6  ;;  %453 = vst.msk [vmem:[%s4470_s26 + $0x38] sm:$0xff] %vm445_vm0, %v436_v7  ;;  %v441_v12 = vld [vmem:[%s4446_s25 + $0x60] sm:$0xff]  ;;  %v442_v13 = vld [vmem:[%s4446_s25 + $0x68] sm:$0xff] }
  0x1c   : > { %454 = vst.msk [vmem:[%s4470_s26 + $0x40] sm:$0xff] %vm445_vm0, %v437_v8  ;;  %455 = vst.msk [vmem:[%s4470_s26 + $0x48] sm:$0xff] %vm445_vm0, %v438_v9  ;;  %v443_v14 = vld [vmem:[%s4446_s25 + $0x70] sm:$0xff]  ;;  %v444_v15 = vld [vmem:[%s4446_s25 + $0x78] sm:$0xff] }
  0x1d   : > { %456 = vst.msk [vmem:[%s4470_s26 + $0x50] sm:$0xff] %vm445_vm0, %v439_v10  ;;  %457 = vst.msk [vmem:[%s4470_s26 + $0x58] sm:$0xff] %vm445_vm0, %v440_v11 }
  0x1e   : > { %458 = vst.msk [vmem:[%s4470_s26 + $0x60] sm:$0xff] %vm445_vm0, %v441_v12  ;;  %459 = vst.msk [vmem:[%s4470_s26 + $0x68] sm:$0xff] %vm445_vm0, %v442_v13 }
  0x1f   : > { %460 = vst.msk [vmem:[%s4470_s26 + $0x70] sm:$0xff] %vm445_vm0, %v443_v14  ;;  %461 = vst.msk [vmem:[%s4470_s26 + $0x78] sm:$0xff] %vm445_vm0, %v444_v15 }
  0x20 PF: > { %vm587_vm1 = vcmask 261120   ;;  %s6154_s17 = scalar_lea.vmem %s6112_s1, %s4432_s14  ;;  %s6155_s22 = scalar_lea.vmem %s6113_s2, %s4432_s14  ;;  %vm986_vm2 = vcmask 130048  }
  0x21   : > { %s4343_s25 = smov 96   ;;  %vm4793_vm3 = vmpackc.low %vm986_vm2, %vm986_vm2  ;;  %s4344_s27 = smov 64  }
  0x22   : > { %v4552_v28 = vld [vmem:[%s4470_s26 + $0x30] sm:$0xff]  ;;  %v4555_v29 = vld [vmem:[%s4470_s26 + $0x38] sm:$0xff]  ;;  %s478_s30 = sld [smem:[#allocation2]]  ;;  %s4347_s19 = smov 112  }
  0x23   : > { %v606_v30 = vsel %vm587_vm1, %v4552_v28, 0.0  ;;  %v609_v31 = vsel %vm587_vm1, %v4555_v29, 0.0  ;;  %v4562_v32 = vld [vmem:[%s4470_s26 + $0x40] sm:$0xff]  ;;  %v4565_v33 = vld [vmem:[%s4470_s26 + $0x48] sm:$0xff]  ;;  %s4348_s24 = smov 48   ;;  %s4349_s29 = smov 16  }
  0x24   : > { %v612_v34 = vsel %vm587_vm1, %v4562_v32, 0.0  ;;  %v615_v35 = vsel %vm587_vm1, %v4565_v33, 0.0  ;;  %v4572_v36 = vld [vmem:[%s4470_s26 + $0x50] sm:$0xff]  ;;  %v4575_v37 = vld [vmem:[%s4470_s26 + $0x58] sm:$0xff] }
  0x25   : > { %v4522_v16 = vld [vmem:[%s4470_s26] sm:$0xff]  ;;  %v4528_v18 = vld [vmem:[%s4470_s26 + $0x8] sm:$0xff]  ;;  %v618_v38 = vsel %vm587_vm1, %v4572_v36, 0.0  ;;  %v621_v39 = vsel %vm587_vm1, %v4575_v37, 0.0 }
  0x26   : > { %v4525_v17 = vld [vmem:[%s4470_s26 + $0x10] sm:$0xff]  ;;  %v588_v19 = vsel %vm587_vm1, %v4522_v16, 0.0  ;;  %v4535_v21 = vld [vmem:[%s4470_s26 + $0x18] sm:$0xff]  ;;  %v591_v23 = vsel %vm587_vm1, %v4528_v18, 0.0  ;;  %v4582_v40 = vld [vmem:[%s4470_s26 + $0x60] sm:$0xff]  ;;  %3526 = vmatprep.mubr.msk.f32.mxu1 %vm986_vm2, %v4522_v16 }
  0x27   : > { %v594_v20 = vsel %vm587_vm1, %v4525_v17, 0.0  ;;  %589 = vadd.xlane.f32.xlu0 %v588_v19  ;;  %v4538_v22 = vld [vmem:[%s4470_s26 + $0x20] sm:$0xff]  ;;  %v597_v24 = vsel %vm587_vm1, %v4535_v21, 0.0  ;;  %v4545_v25 = vld [vmem:[%s4470_s26 + $0x28] sm:$0xff]  ;;  %v624_v42 = vsel %vm587_vm1, %v4582_v40, 0.0  ;;  %v4592_v44 = vld [vmem:[%s4470_s26 + $0x70] sm:$0xff] }
  0x28   : > { %595 = vadd.xlane.f32.xlu1 %v594_v20  ;;  %v600_v26 = vsel %vm587_vm1, %v4538_v22, 0.0  ;;  %v603_v27 = vsel %vm587_vm1, %v4545_v25, 0.0  ;;  %v4585_v41 = vld [vmem:[%s4470_s26 + $0x68] sm:$0xff]  ;;  %v4595_v45 = vld [vmem:[%s4470_s26 + $0x78] sm:$0xff]  ;;  %v630_v46 = vsel %vm587_vm1, %v4592_v44, 0.0  ;;  %s479_s16 = smul.f32 %s478_s30, %s478_s30 }
  0x29   : > { %v627_v43 = vsel %vm587_vm1, %v4585_v41, 0.0  ;;  %v633_v47 = vsel %vm587_vm1, %v4595_v45, 0.0 }
  0x2b   : > { %592 = vadd.xlane.f32.xlu0 %v591_v23 }
  0x2c   : > { %598 = vadd.xlane.f32.xlu1 %v597_v24 }
  0x2f   : > { %601 = vadd.xlane.f32.xlu0 %v600_v26 }
  0x30   : > { %604 = vadd.xlane.f32.xlu1 %v603_v27 }
  0x33   : > { %607 = vadd.xlane.f32.xlu0 %v606_v30 }
  0x34   : > { %610 = vadd.xlane.f32.xlu1 %v609_v31 }
  0x37   : > { %613 = vadd.xlane.f32.xlu0 %v612_v34 }
  0x38   : > { %616 = vadd.xlane.f32.xlu1 %v615_v35 }
  0x3b   : > { %619 = vadd.xlane.f32.xlu0 %v618_v38 }
  0x3c   : > { %622 = vadd.xlane.f32.xlu1 %v621_v39 }
  0x3f   : > { %625 = vadd.xlane.f32.xlu0 %v624_v42 }
  0x40   : > { %628 = vadd.xlane.f32.xlu1 %v627_v43 }
  0x43   : > { %631 = vadd.xlane.f32.xlu0 %v630_v46 }
  0x44   : > { %634 = vadd.xlane.f32.xlu1 %v633_v47 }
  0xb4   : > { %v590_v48 = vpop.xlane.xlu0 %589 }
  0xb5   : > { %v596_v49 = vpop.xlane.xlu1 %595  ;;  %v637_v50 = vmul.f32 0.03125, %v590_v48 }
  0xb6   : > { %v639_v51 = vmul.f32 0.03125, %v596_v49 }
  0xb7   : > { %v4602_v52 = vsub.f32 %v4522_v16, %v637_v50 }
  0xb8   : > { %v4605_v53 = vsub.f32 %v4525_v17, %v639_v51  ;;  %v593_v54 = vpop.xlane.xlu0 %592 }
  0xb9   : > { %v599_v55 = vpop.xlane.xlu1 %598  ;;  %v638_v56 = vmul.f32 0.03125, %v593_v54  ;;  %v669_v58 = vmul.f32 %v4602_v52, %v4602_v52 }
  0xba   : > { %v640_v57 = vmul.f32 0.03125, %v599_v55  ;;  %v671_v59 = vmul.f32 %v4605_v53, %v4605_v53 }
  0xbb   : > { %v4612_v60 = vsub.f32 %v4528_v18, %v638_v56  ;;  %v685_v62 = vsel %vm587_vm1, %v669_v58, 0.0 }
  0xbc   : > { %v4615_v61 = vsub.f32 %v4535_v21, %v640_v57  ;;  %686 = vadd.xlane.f32.xlu0 %v685_v62  ;;  %v602_v63 = vpop.xlane.xlu0 %601  ;;  %v691_v1 = vsel %vm587_vm1, %v671_v59, 0.0 }
  0xbd   : > { %v605_v0 = vpop.xlane.xlu1 %604  ;;  %v641_v2 = vmul.f32 0.03125, %v602_v63  ;;  %v670_v4 = vmul.f32 %v4612_v60, %v4612_v60 }
  0xbe   : > { %v642_v3 = vmul.f32 0.03125, %v605_v0  ;;  %v672_v5 = vmul.f32 %v4615_v61, %v4615_v61 }
  0xbf   : > { %v4624_v6 = vsub.f32 %v4538_v22, %v641_v2  ;;  %v688_v8 = vsel %vm587_vm1, %v670_v4, 0.0 }
  0xc0   : > { %v4627_v7 = vsub.f32 %v4545_v25, %v642_v3  ;;  %692 = vadd.xlane.f32.xlu0 %v691_v1  ;;  %689 = vadd.xlane.f32.xlu1 %v688_v8  ;;  %v608_v9 = vpop.xlane.xlu0 %607  ;;  %v694_v11 = vsel %vm587_vm1, %v672_v5, 0.0 }
  0xc1   : > { %v611_v10 = vpop.xlane.xlu1 %610  ;;  %v643_v12 = vmul.f32 0.03125, %v608_v9  ;;  %v673_v14 = vmul.f32 %v4624_v6, %v4624_v6 }
  0xc2   : > { %v644_v13 = vmul.f32 0.03125, %v611_v10  ;;  %v674_v15 = vmul.f32 %v4627_v7, %v4627_v7 }
  0xc3   : > { %v4636_v19 = vsub.f32 %v4552_v28, %v643_v12  ;;  %v697_v23 = vsel %vm587_vm1, %v673_v14, 0.0 }
  0xc4   : > { %v4639_v20 = vsub.f32 %v4555_v29, %v644_v13  ;;  %695 = vadd.xlane.f32.xlu1 %v694_v11  ;;  %698 = vadd.xlane.f32.xlu0 %v697_v23  ;;  %v614_v24 = vpop.xlane.xlu0 %613  ;;  %v700_v27 = vsel %vm587_vm1, %v674_v15, 0.0 }
  0xc5   : > { %v617_v26 = vpop.xlane.xlu1 %616  ;;  %v645_v30 = vmul.f32 0.03125, %v614_v24  ;;  %v675_v34 = vmul.f32 %v4636_v19, %v4636_v19 }
  0xc6   : > { %v646_v31 = vmul.f32 0.03125, %v617_v26  ;;  %v676_v35 = vmul.f32 %v4639_v20, %v4639_v20 }
  0xc7   : > { %v4648_v38 = vsub.f32 %v4562_v32, %v645_v30  ;;  %v703_v42 = vsel %vm587_vm1, %v675_v34, 0.0  ;;  %v3975_v34 = vld [vmem:[%s4451_s28] sm:$0xff]  }
  0xc8   : > { %v4651_v39 = vsub.f32 %v4565_v33, %v646_v31  ;;  %701 = vadd.xlane.f32.xlu1 %v700_v27  ;;  %704 = vadd.xlane.f32.xlu0 %v703_v42  ;;  %v620_v43 = vpop.xlane.xlu0 %619  ;;  %v706_v47 = vsel %vm587_vm1, %v676_v35, 0.0  ;;  %v3976_v35 = vld [vmem:[%s4451_s28 + $0x8] sm:$0xff]   ;;  %s4345_s28 = smov 80  }
  0xc9   : > { %v623_v46 = vpop.xlane.xlu1 %622  ;;  %v647_v48 = vmul.f32 0.03125, %v620_v43  ;;  %v677_v50 = vmul.f32 %v4648_v38, %v4648_v38  ;;  %3474 = vmatprep.subr.bf16.mxu0 %v3975_v34 }
  0xca   : > { %v648_v49 = vmul.f32 0.03125, %v623_v46  ;;  %v678_v51 = vmul.f32 %v4651_v39, %v4651_v39  ;;  %3475 = vmatpush3.bf16.msra.mxu0 %v3975_v34 }
  0xcb   : > { %v4660_v54 = vsub.f32 %v4572_v36, %v647_v48  ;;  %v709_v56 = vsel %vm587_vm1, %v677_v50, 0.0  ;;  %3476 = vmatprep.subr.bf16.mxu0 %v3976_v35 }
  0xcc   : > { %v4663_v55 = vsub.f32 %v4575_v37, %v648_v49  ;;  %707 = vadd.xlane.f32.xlu1 %v706_v47  ;;  %710 = vadd.xlane.f32.xlu0 %v709_v56  ;;  %v626_v57 = vpop.xlane.xlu0 %625  ;;  %v712_v59 = vsel %vm587_vm1, %v678_v51, 0.0 }
  0xcd   : > { %v629_v58 = vpop.xlane.xlu1 %628  ;;  %v649_v62 = vmul.f32 0.03125, %v626_v57  ;;  %v679_v0 = vmul.f32 %v4660_v54, %v4660_v54 }
  0xce   : > { %v650_v63 = vmul.f32 0.03125, %v629_v58  ;;  %v680_v1 = vmul.f32 %v4663_v55, %v4663_v55  ;;  %3477 = vmatpush3.bf16.msra.mxu0 %v3976_v35 }
  0xcf   : > { %v4672_v2 = vsub.f32 %v4582_v40, %v649_v62  ;;  %v715_v4 = vsel %vm587_vm1, %v679_v0, 0.0 }
  0xd0   : > { %v4675_v3 = vsub.f32 %v4585_v41, %v650_v63  ;;  %713 = vadd.xlane.f32.xlu1 %v712_v59  ;;  %716 = vadd.xlane.f32.xlu0 %v715_v4  ;;  %v632_v5 = vpop.xlane.xlu0 %631  ;;  %v718_v9 = vsel %vm587_vm1, %v680_v1, 0.0 }
  0xd1   : > { %v635_v8 = vpop.xlane.xlu1 %634  ;;  %v651_v10 = vmul.f32 0.03125, %v632_v5  ;;  %v681_v12 = vmul.f32 %v4672_v2, %v4672_v2 }
  0xd2   : > { %v652_v11 = vmul.f32 0.03125, %v635_v8  ;;  %v682_v13 = vmul.f32 %v4675_v3, %v4675_v3 }
  0xd3   : > { %v4684_v14 = vsub.f32 %v4592_v44, %v651_v10  ;;  %v721_v23 = vsel %vm587_vm1, %v681_v12, 0.0 }
  0xd4   : > { %v4687_v15 = vsub.f32 %v4595_v45, %v652_v11  ;;  %719 = vadd.xlane.f32.xlu1 %v718_v9  ;;  %722 = vadd.xlane.f32.xlu0 %v721_v23  ;;  %v724_v24 = vsel %vm587_vm1, %v682_v13, 0.0 }
  0xd5   : > { %v683_v26 = vmul.f32 %v4684_v14, %v4684_v14 }
  0xd6   : > { %v684_v27 = vmul.f32 %v4687_v15, %v4687_v15 }
  0xd7   : > { %v727_v30 = vsel %vm587_vm1, %v683_v26, 0.0 }
  0xd8   : > { %725 = vadd.xlane.f32.xlu1 %v724_v24  ;;  %728 = vadd.xlane.f32.xlu0 %v727_v30  ;;  %v730_v31 = vsel %vm587_vm1, %v684_v27, 0.0  ;;  %v4705_v27 = vld [vmem:[%s6154_s17] ss:$0 sm:$0xff] }
  0xdc   : > { %731 = vadd.xlane.f32.xlu1 %v730_v31 }
 0x149   : > { %v687_v42 = vpop.xlane.xlu0 %686 }
 0x14a   : > { %v733_v43 = vmul.f32 0.03125, %v687_v42 }
 0x14c   : > { %v749_v46 = vadd.f32 1e-05, %v733_v43 }
 0x14d   : > { %v690_v47 = vpop.xlane.xlu1 %689  ;;  %v693_v48 = vpop.xlane.xlu0 %692 }
 0x14e   : > { %3981 = vrsqrt.f32 %v749_v46  ;;  %v734_v49 = vmul.f32 0.03125, %v690_v47  ;;  %v735_v50 = vmul.f32 0.03125, %v693_v48 }
 0x150   : > { %v750_v51 = vadd.f32 1e-05, %v734_v49  ;;  %v751_v56 = vadd.f32 1e-05, %v735_v50  ;;  %v4714_v49 = vld [vmem:[%s6155_s22] ss:$0 sm:$0xff] }
 0x151   : > { %v696_v57 = vpop.xlane.xlu1 %695  ;;  %v699_v58 = vpop.xlane.xlu0 %698 }
 0x152   : > { %3983 = vrsqrt.f32 %v750_v51  ;;  %v736_v59 = vmul.f32 0.03125, %v696_v57  ;;  %v737_v62 = vmul.f32 0.03125, %v699_v58 }
 0x153   : > { %3985 = vrsqrt.f32 %v751_v56 }
 0x154   : > { %v752_v63 = vadd.f32 1e-05, %v736_v59  ;;  %v753_v0 = vadd.f32 1e-05, %v737_v62 }
 0x155   : > { %v702_v1 = vpop.xlane.xlu1 %701  ;;  %v705_v4 = vpop.xlane.xlu0 %704 }
 0x156   : > { %3987 = vrsqrt.f32 %v752_v63  ;;  %v738_v5 = vmul.f32 0.03125, %v702_v1  ;;  %v739_v8 = vmul.f32 0.03125, %v705_v4 }
 0x157   : > { %3989 = vrsqrt.f32 %v753_v0 }
 0x158   : > { %v3982_v9 = vpop.eup %3981  ;;  %v754_v10 = vadd.f32 1e-05, %v738_v5  ;;  %v755_v11 = vadd.f32 1e-05, %v739_v8 }
 0x159   : > { %v708_v12 = vpop.xlane.xlu1 %707  ;;  %v711_v13 = vpop.xlane.xlu0 %710  ;;  %v781_v23 = vmul.f32 %v3982_v9, %v4602_v52 }
 0x15a   : > { %3991 = vrsqrt.f32 %v754_v10  ;;  %v740_v24 = vmul.f32 0.03125, %v708_v12  ;;  %v741_v26 = vmul.f32 0.03125, %v711_v13 }
 0x15b   : > { %3993 = vrsqrt.f32 %v755_v11  ;;  %v803_v52 = vmul.f32 %v4705_v27, %v781_v23 }
 0x15c   : > { %v3984_v30 = vpop.eup %3983  ;;  %v756_v31 = vadd.f32 1e-05, %v740_v24  ;;  %v757_v34 = vadd.f32 1e-05, %v741_v26 }
 0x15d   : > { %v3986_v35 = vpop.eup %3985  ;;  %v714_v42 = vpop.xlane.xlu1 %713  ;;  %v782_v46 = vmul.f32 %v3984_v30, %v4612_v60  ;;  %v825_v63 = vadd.f32 %v4714_v49, %v803_v52 }
 0x15e   : > { %v717_v43 = vpop.xlane.xlu0 %716  ;;  %3995 = vrsqrt.f32 %v756_v31  ;;  %v742_v47 = vmul.f32 0.03125, %v714_v42  ;;  %v783_v50 = vmul.f32 %v3986_v35, %v4605_v53 }
 0x15f   : > { %v743_v48 = vmul.f32 0.03125, %v717_v43  ;;  %3997 = vrsqrt.f32 %v757_v34  ;;  %v804_v51 = vmul.f32 %v4705_v27, %v782_v46 }
 0x160   : > { %v3988_v56 = vpop.eup %3987  ;;  %v758_v57 = vadd.f32 1e-05, %v742_v47  ;;  %v805_v4 = vmul.f32 %v4705_v27, %v783_v50 }
 0x161   : > { %v759_v58 = vadd.f32 1e-05, %v743_v48  ;;  %v3990_v60 = vpop.eup %3989  ;;  %v720_v59 = vpop.xlane.xlu1 %719  ;;  %v826_v0 = vadd.f32 %v4714_v49, %v804_v51  ;;  %v784_v1 = vmul.f32 %v3988_v56, %v4615_v61 }
 0x162   : > { %v723_v62 = vpop.xlane.xlu0 %722  ;;  %3999 = vrsqrt.f32 %v758_v57  ;;  %v744_v5 = vmul.f32 0.03125, %v720_v59  ;;  %v785_v10 = vmul.f32 %v3990_v60, %v4624_v6  ;;  %v827_v61 = vadd.f32 %v4714_v49, %v805_v4 }
 0x163   : > { %v745_v53 = vmul.f32 0.03125, %v723_v62  ;;  %4001 = vrsqrt.f32 %v759_v58  ;;  %v841_v8 = vpack.c.bf16 %v826_v0, %v825_v63  ;;  %v806_v9 = vmul.f32 %v4705_v27, %v784_v1 }
 0x164   : > { %v3992_v11 = vpop.eup %3991  ;;  %v760_v12 = vadd.f32 1e-05, %v744_v5  ;;  %v807_v34 = vmul.f32 %v4705_v27, %v785_v10 }
 0x165   : > { %v761_v13 = vadd.f32 1e-05, %v745_v53  ;;  %v3994_v23 = vpop.eup %3993  ;;  %v726_v24 = vpop.xlane.xlu1 %725  ;;  %3478 = vmatprep.mubr.msk.bf16.mxu0 %vm587_vm1, %v841_v8  ;;  %v828_v30 = vadd.f32 %v4714_v49, %v806_v9  ;;  %v786_v31 = vmul.f32 %v3992_v11, %v4627_v7 }
 0x166   : > { %v729_v26 = vpop.xlane.xlu0 %728  ;;  %4003 = vrsqrt.f32 %v760_v12  ;;  %v746_v35 = vmul.f32 0.03125, %v726_v24  ;;  %v787_v6 = vmul.f32 %v3994_v23, %v4636_v19  ;;  %v829_v7 = vadd.f32 %v4714_v49, %v807_v34 }
 0x167   : > { %v747_v42 = vmul.f32 0.03125, %v729_v26  ;;  %4005 = vrsqrt.f32 %v761_v13  ;;  %v842_v43 = vpack.c.bf16 %v828_v30, %v827_v61  ;;  %v808_v46 = vmul.f32 %v4705_v27, %v786_v31 }
 0x168   : > { %v3996_v52 = vpop.eup %3995  ;;  %v762_v47 = vadd.f32 1e-05, %v746_v35  ;;  %v809_v58 = vmul.f32 %v4705_v27, %v787_v6 }
 0x169   : > { %v763_v48 = vadd.f32 1e-05, %v747_v42  ;;  %v3998_v50 = vpop.eup %3997  ;;  %v732_v51 = vpop.xlane.xlu1 %731  ;;  %3479 = vmatmul.mubr.msk.bf16.vlgmr.msra.gmra.mrb[0].mxu0 %vm587_vm1, %v842_v43  ;;  %v830_v56 = vadd.f32 %v4714_v49, %v808_v46  ;;  %v788_v57 = vmul.f32 %v3996_v52, %v4639_v20 }
 0x16a   : > { %4007 = vrsqrt.f32 %v762_v47  ;;  %v748_v19 = vmul.f32 0.03125, %v732_v51  ;;  %v789_v60 = vmul.f32 %v3998_v50, %v4648_v38  ;;  %v831_v4 = vadd.f32 %v4714_v49, %v809_v58 }
 0x16b   : > { %4009 = vrsqrt.f32 %v763_v48  ;;  %v843_v59 = vpack.c.bf16 %v830_v56, %v829_v7  ;;  %v810_v62 = vmul.f32 %v4705_v27, %v788_v57 }
 0x16c   : > { %v4000_v63 = vpop.eup %3999  ;;  %v764_v0 = vadd.f32 1e-05, %v748_v19  ;;  %v811_v53 = vmul.f32 %v4705_v27, %v789_v60 }
 0x16d   : > { %v4002_v1 = vpop.eup %4001  ;;  %3482 = vmatprep.mubr.msk.bf16.mxu0 %vm587_vm1, %v843_v59  ;;  %v832_v5 = vadd.f32 %v4714_v49, %v810_v62  ;;  %v790_v20 = vmul.f32 %v4000_v63, %v4651_v39 }
 0x16e   : > { %4011 = vrsqrt.f32 %v764_v0  ;;  %v791_v38 = vmul.f32 %v4002_v1, %v4660_v54  ;;  %v833_v12 = vadd.f32 %v4714_v49, %v811_v53  ;;  %v6156_v53 = vmov 0 }
 0x16f   : > { %v844_v8 = vpack.c.bf16 %v832_v5, %v831_v4  ;;  %v812_v9 = vmul.f32 %v4705_v27, %v790_v20  ;;  %v3774_v20 = vpack.c.bf16 %v4528_v18, %v4522_v16  ;;  %v6157_v53 = vsel %vm4793_vm3, 4294967295, %v6156_v53 }
 0x170   : > { %v4004_v10 = vpop.eup %4003  ;;  %v813_v39 = vmul.f32 %v4705_v27, %v791_v38  ;;  %6158 = vst [vmem:[#allocation4_spill] sm:$0xff] %v6157_v53 }
 0x171   : > { %v4006_v11 = vpop.eup %4005  ;;  %3483 = vmatmul.mubr.msk.bf16.gmra.mrb[4].mxu0 %vm587_vm1, %v844_v8  ;;  %v834_v13 = vadd.f32 %v4714_v49, %v812_v9  ;;  %v792_v23 = vmul.f32 %v4004_v10, %v4663_v55  ;;  %3776 = vmatprep.subr.msk.bf16.mxu1 %vm4793_vm3, %v3774_v20 }
 0x172   : > { %v793_v24 = vmul.f32 %v4006_v11, %v4672_v2  ;;  %v835_v31 = vadd.f32 %v4714_v49, %v813_v39  ;;  %3779 = vmatpush3.bf16.xpose.msk.msra.mxu1 %vm4793_vm3, %v3774_v20 }
 0x173   : > { %v845_v26 = vpack.c.bf16 %v834_v13, %v833_v12  ;;  %v814_v54 = vmul.f32 %v4705_v27, %v792_v23  ;;  %v3780_v13 = vpack.c.bf16 %v4535_v21, %v4525_v17 }
 0x174   : > { %v4008_v61 = vpop.eup %4007  ;;  %v815_v42 = vmul.f32 %v4705_v27, %v793_v24 }
 0x175   : > { %v4010_v30 = vpop.eup %4009  ;;  %3486 = vmatprep.mubr.msk.bf16.mxu0 %vm587_vm1, %v845_v26  ;;  %v836_v34 = vadd.f32 %v4714_v49, %v814_v54  ;;  %v794_v35 = vmul.f32 %v4008_v61, %v4675_v3  ;;  %3782 = vmatprep.subr.msk.bf16.mxu1 %vm4793_vm3, %v3780_v13  ;;  %v3786_v26 = vpack.c.bf16 %v4545_v25, %v4538_v22 }
 0x176   : > { %v795_v55 = vmul.f32 %v4010_v30, %v4684_v14  ;;  %v837_v46 = vadd.f32 %v4714_v49, %v815_v42  ;;  %v3792_v54 = vpack.c.bf16 %v4555_v29, %v4552_v28  ;;  %v3798_v61 = vpack.c.bf16 %v4565_v33, %v4562_v32 }
 0x177   : > { %v846_v6 = vpack.c.bf16 %v836_v34, %v835_v31  ;;  %v816_v2 = vmul.f32 %v4705_v27, %v794_v35  ;;  %v4843_v30 = vmul.f32 %v4522_v16, %v4522_v16  ;;  %v4849_v34 = vmul.f32 %v4528_v18, %v4528_v18 }
 0x178   : > { %v4012_v43 = vpop.eup %4011  ;;  %v817_v48 = vmul.f32 %v4705_v27, %v795_v55  ;;  %v4853_v35 = vmul.f32 %v4525_v17, %v4525_v17  ;;  %v3804_v42 = vpack.c.bf16 %v4575_v37, %v4572_v36 }
 0x179   : > { %3487 = vmatmul.mubr.msk.bf16.gmra.mrb[8].mxu0 %vm587_vm1, %v846_v6  ;;  %v838_v52 = vadd.f32 %v4714_v49, %v816_v2  ;;  %v796_v47 = vmul.f32 %v4012_v43, %v4687_v15  ;;  %6159 = vst [vmem:[#allocation5_spill] sm:$0xff] %v4843_v30  ;;  %v1196_v31 = vsel %vm986_vm2, %v4843_v30, 0.0  ;;  %v1199_v16 = vsel %vm986_vm2, %v4849_v34, 0.0 }
 0x17a   : > { %v839_v14 = vadd.f32 %v4714_v49, %v817_v48  ;;  %3785 = vmatpush3.bf16.xpose.msk.msra.mxu1 %vm4793_vm3, %v3780_v13  ;;  %v1202_v55 = vsel %vm986_vm2, %v4853_v35, 0.0  ;;  %v4867_v6 = vmul.f32 %v4535_v21, %v4535_v21  ;;  %v3810_v43 = vpack.c.bf16 %v4585_v41, %v4582_v40 }
 0x17b   : > { %v847_v50 = vpack.c.bf16 %v838_v52, %v837_v46  ;;  %v818_v3 = vmul.f32 %v4705_v27, %v796_v47  ;;  %3788 = vmatprep.subr.msk.bf16.mxu1 %vm4793_vm3, %v3786_v26  ;;  %v3816_v46 = vpack.c.bf16 %v4595_v45, %v4592_v44 }
 0x17c   : > { %v1205_v2 = vsel %vm986_vm2, %v4867_v6, 0.0 }
 0x17d   : > { %3490 = vmatprep.mubr.msk.bf16.mxu0 %vm587_vm1, %v847_v50  ;;  %v840_v51 = vadd.f32 %v4714_v49, %v818_v3  ;;  %v4944_v50 = vmul.f32 %v4555_v29, %v4555_v29 }
 0x17f   : > { %v848_v7 = vpack.c.bf16 %v840_v51, %v839_v14  ;;  %6162 = vst [vmem:[#allocation8_spill] sm:$0xff] %v4944_v50 }
 0x181   : > { %3491 = vmatmul.mubr.msk.bf16.gmra.mrb[12].mxu0 %vm587_vm1, %v848_v7 }
 0x182   : > { %3791 = vmatpush3.bf16.xpose.msk.msra.mxu1 %vm4793_vm3, %v3786_v26 }
 0x183   : > { %3794 = vmatprep.subr.msk.bf16.mxu1 %vm4793_vm3, %v3792_v54 }
 0x18a   : > { %3797 = vmatpush3.bf16.xpose.msk.msra.mxu1 %vm4793_vm3, %v3792_v54 }
 0x18b   : > { %3800 = vmatprep.subr.msk.bf16.mxu1 %vm4793_vm3, %v3798_v61 }
 0x192   : > { %3803 = vmatpush3.bf16.xpose.msk.msra.mxu1 %vm4793_vm3, %v3798_v61 }
 0x193   : > { %3806 = vmatprep.subr.msk.bf16.mxu1 %vm4793_vm3, %v3804_v42 }
 0x19a   : > { %3809 = vmatpush3.bf16.xpose.msk.msra.mxu1 %vm4793_vm3, %v3804_v42 }
 0x19b   : > { %3812 = vmatprep.subr.msk.bf16.mxu1 %vm4793_vm3, %v3810_v43 }
 0x1a2   : > { %3815 = vmatpush3.bf16.xpose.msk.msra.mxu1 %vm4793_vm3, %v3810_v43 }
 0x1a3   : > { %3818 = vmatprep.subr.msk.bf16.mxu1 %vm4793_vm3, %v3816_v46 }
 0x1aa   : > { %3821 = vmatpush3.bf16.xpose.msk.msra.mxu1 %vm4793_vm3, %v3816_v46 }
 0x1b1   : > { %3527 = vmatmul.mubr.msk.f32.vlgmr.msra.gmra.mrb[0].mxu1 %vm986_vm2, %v4528_v18 }
 0x1b2   : > { %3529 = vmatprep.mubr.msk.f32.mxu1 %vm986_vm2, %v4525_v17  ;;  %v4929_v17 = vmul.f32 %v4538_v22, %v4538_v22 }
 0x1b4   : > { %6160 = vst [vmem:[#allocation6_spill] sm:$0xff] %v4929_v17  ;;  %v1208_v18 = vsel %vm986_vm2, %v4929_v17, 0.0 }
 0x1b5   : > { %3530 = vmatmul.mubr.msk.f32.gmra.mrb[2].mxu1 %vm986_vm2, %v4535_v21  ;;  %v4935_v21 = vmul.f32 %v4552_v28, %v4552_v28 }
 0x1b6   : > { %3532 = vmatprep.mubr.msk.f32.mxu1 %vm986_vm2, %v4538_v22 }
 0x1b7   : > { %6161 = vst [vmem:[#allocation7_spill] sm:$0xff] %v4935_v21  ;;  %v1214_v22 = vsel %vm986_vm2, %v4935_v21, 0.0 }
 0x1b9   : > { %3533 = vmatmul.mubr.msk.f32.gmra.mrb[4].mxu1 %vm986_vm2, %v4545_v25 }
 0x1ba   : > { %3535 = vmatprep.mubr.msk.f32.mxu1 %vm986_vm2, %v4552_v28  ;;  %v1217_v28 = vsel %vm986_vm2, %v4944_v50, 0.0 }
 0x1bd   : > { %3536 = vmatmul.mubr.msk.f32.gmra.mrb[6].mxu1 %vm986_vm2, %v4555_v29 }
 0x1be   : > { %3538 = vmatprep.mubr.msk.f32.mxu1 %vm986_vm2, %v4562_v32 }
 0x1c1   : > { %3539 = vmatmul.mubr.msk.f32.gmra.mrb[8].mxu1 %vm986_vm2, %v4565_v33 }
 0x1c2   : > { %3541 = vmatprep.mubr.msk.f32.mxu1 %vm986_vm2, %v4572_v36 }
 0x1c5   : > { %3542 = vmatmul.mubr.msk.f32.gmra.mrb[10].mxu1 %vm986_vm2, %v4575_v37 }
 0x1c6   : > { %3544 = vmatprep.mubr.msk.f32.mxu1 %vm986_vm2, %v4582_v40 }
 0x1c9   : > { %3545 = vmatmul.mubr.msk.f32.gmra.mrb[12].mxu1 %vm986_vm2, %v4585_v41 }
 0x1ca   : > { %3547 = vmatprep.mubr.msk.f32.mxu1 %vm986_vm2, %v4592_v44 }
 0x1cd   : > { %3548 = vmatmul.mubr.msk.f32.gmra.mrb[14].mxu1 %vm986_vm2, %v4595_v45 }
 0x23c   : > { %v3480_v56 = vpop.f32.mrb[0].mxu0 }
 0x23d   : > { %v923_v15 = vpop.f32.mrb[1].mxu0 }
 0x23e   : > { %v3481_v57 = vpop.f32.mrb[2].mxu0 }
 0x23f   : > { %v4771_v58 = vpack.c.bf16 %v3481_v57, %v3480_v56  ;;  %v926_v19 = vpop.f32.mrb[3].mxu0 }
 0x240   : > { %v4773_v27 = vpack.c.bf16 %v926_v19, %v923_v15  ;;  %v4962_v19 = vmul.f32 %v4545_v25, %v4545_v25  ;;  %v4975_v25 = vmul.f32 %v4565_v33, %v4565_v33 }
 0x241   : > { %1327 = vrot.lane.b32.xlu1 %v4771_v58, %s4343_s25 }
 0x242   : > { %1325 = vrot.lane.b32.xlu0 %v4773_v27, %s4343_s25  ;;  %3566 = vmatprep.mubr.msk.bf16.mxu0 %vm986_vm2, %v4773_v27  ;;  %6164 = vst [vmem:[#allocation10_spill] sm:$0xff] %v4975_v25 }
 0x244   : > { %v3484_v49 = vpop.f32.mrb[4].mxu0 }
 0x245   : > { %v939_v60 = vpop.f32.mrb[5].mxu0 }
 0x246   : > { %v3485_v59 = vpop.f32.mrb[6].mxu0 }
 0x247   : > { %v4781_v62 = vpack.c.bf16 %v3485_v59, %v3484_v49  ;;  %v942_v63 = vpop.f32.mrb[7].mxu0  ;;  %v4966_v49 = vmul.f32 %v4562_v32, %v4562_v32  ;;  %v1223_v32 = vsel %vm986_vm2, %v4975_v25, 0.0 }
 0x248   : > { %v4783_v0 = vpack.c.bf16 %v942_v63, %v939_v60  ;;  %v1211_v60 = vsel %vm986_vm2, %v4962_v19, 0.0 }
 0x249   : > { %6163 = vst [vmem:[#allocation9_spill] sm:$0xff] %v4966_v49 }
 0x24a   : > { %1329 = vrot.lane.b32.xlu1 %v4783_v0, %s4343_s25 }
 0x24c   : > { %v3488_v1 = vpop.f32.mrb[8].mxu0 }
 0x24d   : > { %v955_v4 = vpop.f32.mrb[9].mxu0 }
 0x24e   : > { %1331 = vrot.lane.b32.xlu1 %v4781_v62, %s4343_s25  ;;  %v3489_v5 = vpop.f32.mrb[10].mxu0 }
 0x24f   : > { %v4797_v38 = vpack.c.bf16 %v3489_v5, %v3488_v1  ;;  %v958_v8 = vpop.f32.mrb[11].mxu0  ;;  %v1220_v1 = vsel %vm986_vm2, %v4966_v49, 0.0  ;;  %v4982_v5 = vmul.f32 %v4572_v36, %v4572_v36 }
 0x250   : > { %v4799_v9 = vpack.c.bf16 %v958_v8, %v955_v4  ;;  %v480_v4 = vstv %s479_s16 }
 0x251   : > { %6165 = vst [vmem:[#allocation11_spill] sm:$0xff] %v4982_v5  ;;  %4013 = vrcp.f32 %v480_v4  ;;  %v1226_v33 = vsel %vm986_vm2, %v4982_v5, 0.0 }
 0x252   : > { %1335 = vrot.lane.b32.xlu1 %v4797_v38, %s4343_s25  ;;  %1333 = vrot.lane.b32.xlu0 %v4799_v9, %s4343_s25 }
 0x254   : > { %v3492_v10 = vpop.f32.mrb[12].mxu0 }
 0x255   : > { %v971_v11 = vpop.f32.mrb[13].mxu0 }
 0x256   : > { %v3493_v12 = vpop.f32.mrb[14].mxu0 }
 0x257   : > { %v4811_v23 = vpack.c.bf16 %v3493_v12, %v3492_v10  ;;  %v974_v39 = vpop.f32.mrb[15].mxu0  ;;  %v4989_v10 = vmul.f32 %v4575_v37, %v4575_v37 }
 0x258   : > { %v4813_v24 = vpack.c.bf16 %v974_v39, %v971_v11  ;;  %v4996_v11 = vmul.f32 %v4582_v40, %v4582_v40  ;;  %v5003_v39 = vmul.f32 %v4585_v41, %v4585_v41  ;;  %v5009_v40 = vmul.f32 %v4592_v44, %v4592_v44 }
 0x259   : > { %1339 = vrot.lane.b32.xlu1 %v4811_v23, %s4343_s25  ;;  %6166 = vst [vmem:[#allocation12_spill] sm:$0xff] %v4989_v10  ;;  %v1229_v36 = vsel %vm986_vm2, %v4989_v10, 0.0 }
 0x25a   : > { %1337 = vrot.lane.b32.xlu0 %v4813_v24, %s4343_s25  ;;  %6167 = vst [vmem:[#allocation13_spill] sm:$0xff] %v4996_v11  ;;  %v1232_v37 = vsel %vm986_vm2, %v4996_v11, 0.0  ;;  %6168 = vst [vmem:[#allocation14_spill] sm:$0xff] %v5003_v39  ;;  %v1235_v26 = vsel %vm986_vm2, %v5003_v39, 0.0  ;;  %v1238_v54 = vsel %vm986_vm2, %v5009_v40, 0.0 }
 0x25b   : > { %v4014_v12 = vpop.eup %4013  ;;  %6169 = vst [vmem:[#allocation15_spill] sm:$0xff] %v5009_v40 }
 0x25c   : > { %3886 = vpush %v4014_v12 }
 0x279   : > { %1197 = vadd.xlane.f32.xlu0 %v1196_v31 }
 0x27d   : > { %1200 = vadd.xlane.f32.xlu1 %v1199_v16  ;;  %1203 = vadd.xlane.f32.xlu0 %v1202_v55 }
 0x281   : > { %1206 = vadd.xlane.f32.xlu1 %v1205_v2 }
 0x28d   : > { %s3887_s18 = spop %3886 }
 0x292   : > { %1656 = vrot.lane.b32.xlu1 %v4771_v58, %s4344_s27 }
 0x293   : > { %1654 = vrot.lane.b32.xlu0 %v4773_v27, %s4344_s27 }
 0x296   : > { %1660 = vrot.lane.b32.xlu1 %v4781_v62, %s4344_s27 }
 0x297   : > { %1658 = vrot.lane.b32.xlu0 %v4783_v0, %s4344_s27 }
 0x29a   : > { %1662 = vrot.lane.b32.xlu1 %v4799_v9, %s4344_s27 }
 0x29e   : > { %1664 = vrot.lane.b32.xlu1 %v4797_v38, %s4344_s27 }
 0x2a2   : > { %1668 = vrot.lane.b32.xlu1 %v4811_v23, %s4344_s27 }
 0x2b3   : > { %v1328_v48 = vpop.permute.xlu1 %1327 }
 0x2b4   : > { %v1326_v52 = vpop.permute.xlu0 %1325  ;;  %v1369_v3 = vsel %vm986_vm2, %v1328_v48, 0 }
 0x2b5   : > { %3870 = vmatprep.subr.msk.bf16.mxu0 %vm986_vm2, %v1326_v52  ;;  %v1366_v47 = vsel %vm986_vm2, %v1326_v52, 0 }
 0x2b6   : > { %1209 = vadd.xlane.f32.xlu0 %v1208_v18  ;;  %3551 = vmatpush3.bf16.xpose.msra.mxu0 %v1366_v47  ;;  %v5041_v47 = vmul.f32 %v4595_v45, %v4595_v45 }
 0x2b7   : > { %3871 = vmatprep.subr.msk.bf16.mxu0 %vm986_vm2, %v1328_v48 }
 0x2b8   : > { %6170 = vst [vmem:[#allocation16_spill] sm:$0xff] %v5041_v47 }
 0x2ba   : > { %1215 = vadd.xlane.f32.xlu0 %v1214_v22  ;;  %v1241_v22 = vsel %vm986_vm2, %v5041_v47, 0.0 }
 0x2bc   : > { %v1330_v14 = vpop.permute.xlu1 %1329 }
 0x2bd   : > { %v1372_v51 = vsel %vm986_vm2, %v1330_v14, 0 }
 0x2be   : > { %1218 = vadd.xlane.f32.xlu0 %v1217_v28  ;;  %3553 = vmatpush3.bf16.xpose.msra.mxu0 %v1369_v3 }
 0x2bf   : > { %3872 = vmatprep.subr.msk.bf16.mxu0 %vm986_vm2, %v1330_v14 }
 0x2c0   : > { %v1332_v7 = vpop.permute.xlu1 %1331 }
 0x2c1   : > { %v1375_v29 = vsel %vm986_vm2, %v1332_v7, 0 }
 0x2c4   : > { %v1334_v56 = vpop.permute.xlu0 %1333  ;;  %v1336_v57 = vpop.permute.xlu1 %1335 }
 0x2c5   : > { %v1378_v15 = vsel %vm986_vm2, %v1334_v56, 0  ;;  %v1381_v59 = vsel %vm986_vm2, %v1336_v57, 0 }
 0x2c6   : > { %3555 = vmatpush3.bf16.xpose.msra.mxu0 %v1372_v51  ;;  %1212 = vadd.xlane.f32.xlu1 %v1211_v60  ;;  %v5051_v51 = vpop.f32.mrb[0].mxu1 }
 0x2c7   : > { %3873 = vmatprep.subr.msk.bf16.mxu0 %vm986_vm2, %v1332_v7  ;;  %v5053_v45 = vpop.f32.mrb[1].mxu1 }
 0x2c8   : > { %v5055_v7 = vpop.f32.mrb[2].mxu1 }
 0x2ca   : > { %1221 = vadd.xlane.f32.xlu1 %v1220_v1 }
 0x2cb   : > { %v1340_v8 = vpop.permute.xlu1 %1339 }
 0x2cc   : > { %v1338_v63 = vpop.permute.xlu0 %1337  ;;  %v1387_v13 = vsel %vm986_vm2, %v1340_v8, 0 }
 0x2cd   : > { %v1384_v20 = vsel %vm986_vm2, %v1338_v63, 0 }
 0x2ce   : > { %3557 = vmatpush3.bf16.xpose.msra.mxu0 %v1375_v29  ;;  %1224 = vadd.xlane.f32.xlu1 %v1223_v32  ;;  %v5057_v29 = vpop.f32.mrb[3].mxu1 }
 0x2cf   : > { %3874 = vmatprep.subr.msk.bf16.mxu0 %vm986_vm2, %v1334_v56  ;;  %v5059_v56 = vpop.f32.mrb[4].mxu1 }
 0x2d2   : > { %1227 = vadd.xlane.f32.xlu1 %v1226_v33 }
 0x2d4   : > { %2176 = vrot.lane.b32.xlu0 %v4773_v27, %s4345_s28 }
 0x2d6   : > { %3559 = vmatpush3.bf16.xpose.msra.mxu0 %v1378_v15  ;;  %1230 = vadd.xlane.f32.xlu1 %v1229_v36  ;;  %v5061_v15 = vpop.f32.mrb[5].mxu1 }
 0x2d7   : > { %3875 = vmatprep.subr.msk.bf16.mxu0 %vm986_vm2, %v1336_v57  ;;  %v5063_v57 = vpop.f32.mrb[6].mxu1 }
 0x2d8   : > { %1666 = vrot.lane.b32.xlu0 %v4813_v24, %s4344_s27  ;;  %v5065_v60 = vpop.f32.mrb[7].mxu1 }
 0x2da   : > { %1233 = vadd.xlane.f32.xlu1 %v1232_v37 }
 0x2de   : > { %3561 = vmatpush3.bf16.xpose.msra.mxu0 %v1381_v59  ;;  %1236 = vadd.xlane.f32.xlu1 %v1235_v26  ;;  %v483_v59 = vlaneseq }
 0x2df   : > { %3876 = vmatprep.subr.msk.bf16.mxu0 %vm986_vm2, %v1338_v63 }
 0x2e0   : > { %v5067_v63 = vshrl.u32 %v483_v59, 7  ;;  %v517_v32 = vand.u32 127, %v483_v59 }
 0x2e2   : > { %1239 = vadd.xlane.f32.xlu1 %v1238_v54  ;;  %v486_v1 = vadd.s32 16, %v5067_v63  ;;  %v485_v4 = vadd.s32 8, %v5067_v63  ;;  %v487_v37 = vadd.s32 24, %v5067_v63  ;;  %v491_v26 = vadd.s32 56, %v5067_v63 }
 0x2e3   : > { %v492_v39 = vadd.s32 64, %v5067_v63 }
 0x2e4   : > { %v501_v33 = vcvt.s32.f32 %v485_v4  ;;  %v6133_v4 = vmov -1e+30  }
 0x2e5   : > { %v508_v5 = vcvt.s32.f32 %v492_v39 }
 0x2e6   : > { %3563 = vmatpush3.bf16.xpose.msra.mxu0 %v1384_v20  ;;  %1242 = vadd.xlane.f32.xlu1 %v1241_v22  ;;  %v502_v20 = vcvt.s32.f32 %v486_v1  ;;  %v520_v54 = vmul.f32 0.125, %v501_v33 }
 0x2e7   : > { %3877 = vmatprep.subr.msk.bf16.mxu0 %vm986_vm2, %v1340_v8  ;;  %v518_v8 = vcvt.s32.f32 %v517_v32  ;;  %v495_v32 = vadd.s32 88, %v5067_v63 }
 0x2e8   : > { %v521_v36 = vmul.f32 0.125, %v502_v20  ;;  %v536_v22 = vfloor.f32 %v520_v54 }
 0x2e9   : > { %v551_v12 = vmul.f32 0.125, %v518_v8 }
 0x2ee   : > { %3565 = vmatpush3.bf16.xpose.msra.mxu0 %v1387_v13  ;;  %v500_v13 = vcvt.s32.f32 %v5067_v63 }
 0x2f5   : > { %3567 = vmatmul.mubr.msk.bf16.vlgmr.msra.gmra.mrb[16].mxu0 %vm986_vm2, %v4771_v58 }
 0x2f6   : > { %3570 = vmatprep.mubr.msk.bf16.mxu0 %vm986_vm2, %v4783_v0 }
 0x2fd   : > { %3571 = vmatmul.mubr.msk.bf16.gmra.mrb[20].mxu0 %vm986_vm2, %v4781_v62 }
 0x2fe   : > { %3574 = vmatprep.mubr.msk.bf16.mxu0 %vm986_vm2, %v4799_v9 }
 0x305   : > { %3575 = vmatmul.mubr.msk.bf16.gmra.mrb[24].mxu0 %vm986_vm2, %v4797_v38 }
 0x306   : > { %3578 = vmatprep.mubr.msk.bf16.mxu0 %vm986_vm2, %v4813_v24  ;;  %v5025_v41 = vpop.xlane.xlu0 %1197 }
 0x30a   : > { %v5027_v44 = vpop.xlane.xlu1 %1200  ;;  %v5029_v61 = vpop.xlane.xlu0 %1203 }
 0x30d   : > { %3579 = vmatmul.mubr.msk.bf16.gmra.mrb[28].mxu0 %vm986_vm2, %v4811_v23 }
 0x30e   : > { %v5033_v31 = vpop.xlane.xlu1 %1206  ;;  %v1655_v42 = vpop.permute.xlu0 %1654 }
 0x30f   : > { %3582 = vmatprep.subr.bf16.mxu1 %v1655_v42 }
 0x310   : > { %3583 = vmatpush3.bf16.msra.mxu1 %v1655_v42  ;;  %v537_v42 = vfloor.f32 %v521_v36 }
 0x312   : > { %v1657_v16 = vpop.permute.xlu1 %1656  ;;  %v1659_v55 = vpop.permute.xlu0 %1658 }
 0x313   : > { %3584 = vmatprep.subr.bf16.mxu1 %v1657_v16 }
 0x314   : > { %3585 = vmatpush3.bf16.msra.mxu1 %v1657_v16  ;;  %v5074_v16 = vfloor.f32 %v551_v12  ;;  %v493_v12 = vadd.s32 72, %v5067_v63 }
 0x315   : > { %3586 = vmatprep.subr.bf16.mxu1 %v1659_v55 }
 0x316   : > { %v1661_v2 = vpop.permute.xlu1 %1660  ;;  %vm555_vm4 = vcmp.eq.f32.partialorder %v537_v42, %v5074_v16  ;;  %vm554_vm5 = vcmp.eq.f32.partialorder %v536_v22, %v5074_v16  ;;  %v511_v42 = vcvt.s32.f32 %v495_v32 }
 0x317   : > { %v5080_v20 = vsel %vm555_vm4, 0.0, %v6133_v4 }
 0x318   : > { %3587 = vmatpush3.bf16.msra.mxu1 %v1659_v55  ;;  %v519_v55 = vmul.f32 0.125, %v500_v13  ;;  %6171 = vst [vmem:[#allocation17_spill] sm:$0xff] %v5080_v20 }
 0x319   : > { %3588 = vmatprep.subr.bf16.mxu1 %v1661_v2 }
 0x31a   : > { %v1663_v43 = vpop.permute.xlu1 %1662 }
 0x31c   : > { %3589 = vmatpush3.bf16.msra.mxu1 %v1661_v2  ;;  %v503_v2 = vcvt.s32.f32 %v487_v37 }
 0x31d   : > { %3590 = vmatprep.subr.bf16.mxu1 %v1663_v43 }
 0x31e   : > { %v1665_v46 = vpop.permute.xlu1 %1664 }
 0x320   : > { %3591 = vmatpush3.bf16.msra.mxu1 %v1663_v43  ;;  %v489_v43 = vadd.s32 40, %v5067_v63 }
 0x321   : > { %3592 = vmatprep.subr.bf16.mxu1 %v1665_v46 }
 0x322   : > { %v1669_v14 = vpop.permute.xlu1 %1668  ;;  %v505_v59 = vcvt.s32.f32 %v489_v43 }
 0x324   : > { %3593 = vmatpush3.bf16.msra.mxu1 %v1665_v46  ;;  %v507_v46 = vcvt.s32.f32 %v491_v26  ;;  %v524_v36 = vmul.f32 0.125, %v505_v59  ;;  %v5089_v26 = vsel %vm554_vm5, 0.0, %v6133_v4  ;;  %v530_v59 = vmul.f32 0.125, %v511_v42 }
 0x325   : > { %6172 = vst [vmem:[#allocation18_spill] sm:$0xff] %v5089_v26 }
 0x326   : > { %v526_v1 = vmul.f32 0.125, %v507_v46  ;;  %v540_v22 = vfloor.f32 %v524_v36 }
 0x328   : > { %v542_v54 = vfloor.f32 %v526_v1  ;;  %v499_v1 = vadd.s32 120, %v5067_v63  ;;  %vm558_vm9 = vcmp.eq.f32.partialorder %v540_v22, %v5074_v16 }
 0x329   : > { %v5126_v53 = vsel %vm558_vm9, 0.0, %v6133_v4 }
 0x32a   : > { %vm560_vm8 = vcmp.eq.f32.partialorder %v542_v54, %v5074_v16  ;;  %v546_v54 = vfloor.f32 %v530_v59  ;;  %v515_v42 = vcvt.s32.f32 %v499_v1  ;;  %6176 = vst [vmem:[#allocation22_spill] sm:$0xff] %v5126_v53 }
 0x32c   : > { %vm564_vm10 = vcmp.eq.f32.partialorder %v546_v54, %v5074_v16  ;;  %v534_v22 = vmul.f32 0.125, %v515_v42 }
 0x343   : > { %v5035_v18 = vpop.xlane.xlu0 %1209 }
 0x347   : > { %v5037_v52 = vpop.xlane.xlu0 %1215 }
 0x34b   : > { %v5043_v48 = vpop.xlane.xlu0 %1218 }
 0x34f   : > { %v5047_v28 = vpop.permute.xlu0 %2176 }
 0x353   : > { %v1667_v3 = vpop.permute.xlu0 %1666 }
 0x354   : > { %3594 = vmatprep.subr.bf16.mxu1 %v1667_v3 }
 0x355   : > { %3595 = vmatpush3.bf16.msra.mxu1 %v1667_v3  ;;  %v535_v3 = vfloor.f32 %v519_v55 }
 0x356   : > { %3596 = vmatprep.subr.bf16.mxu1 %v1669_v14 }
 0x357   : > { %vm553_vm6 = vcmp.eq.f32.partialorder %v535_v3, %v5074_v16  ;;  %v509_v3 = vcvt.s32.f32 %v493_v12 }
 0x358   : > { %v5092_v55 = vsel %vm553_vm6, 0.0, %v6133_v4 }
 0x359   : > { %3597 = vmatpush3.bf16.msra.mxu1 %v1669_v14  ;;  %v522_v14 = vmul.f32 0.125, %v503_v2  ;;  %6173 = vst [vmem:[#allocation19_spill] sm:$0xff] %v5092_v55  ;;  %v528_v36 = vmul.f32 0.125, %v509_v3 }
 0x35a   : > { %3878 = vmatprep.subr.msk.bf16.mxu1 %vm986_vm2, %v5047_v28 }
 0x35b   : > { %v538_v8 = vfloor.f32 %v522_v14 }
 0x35d   : > { %vm556_vm7 = vcmp.eq.f32.partialorder %v538_v8, %v5074_v16 }
 0x35e   : > { %v5105_v32 = vsel %vm556_vm7, 0.0, %v6133_v4 }
 0x35f   : > { %6174 = vst [vmem:[#allocation20_spill] sm:$0xff] %v5105_v32 }
 0x3c8   : > { %v3568_v33 = vpop.f32.mrb[16].mxu0 }
 0x3c9   : > { %v5086_v13 = vadd.f32 %v3568_v33, %v5080_v20  ;;  %v1423_v37 = vpop.f32.mrb[17].mxu0  ;;  %v5112_v33 = vsel %vm560_vm8, 0.0, %v6133_v4 }
 0x3ca   : > { %v3569_v2 = vpop.f32.mrb[18].mxu0  ;;  %v5100_v14 = vadd.f32 %v1423_v37, %v5092_v55  ;;  %6175 = vst [vmem:[#allocation21_spill] sm:$0xff] %v5112_v33 }
 0x3cb   : > { %1490 = vmax.xlane.f32.xlu0 %v5086_v13  ;;  %v1426_v43 = vpop.f32.mrb[19].mxu0  ;;  %v5116_v12 = vadd.f32 %v3569_v2, %v5105_v32  ;;  %v544_v2 = vfloor.f32 %v528_v36  ;;  %v550_v32 = vfloor.f32 %v534_v22 }
 0x3cc   : > { %v5097_v46 = vadd.f32 %v1426_v43, %v5089_v26  ;;  %v497_v43 = vadd.s32 104, %v5067_v63 }
 0x3cd   : > { %vm562_vm11 = vcmp.eq.f32.partialorder %v544_v2, %v5074_v16  ;;  %vm568_vm12 = vcmp.eq.f32.partialorder %v550_v32, %v5074_v16 }
 0x3ce   : > { %1488 = vmax.xlane.f32.xlu1 %v5097_v46  ;;  %v513_v3 = vcvt.s32.f32 %v497_v43  ;;  %v5156_v2 = vsel %vm568_vm12, 0.0, %v6133_v4 }
 0x3cf   : > { %1486 = vmax.xlane.f32.xlu0 %v5100_v14  ;;  %6179 = vst [vmem:[#allocation25_spill] sm:$0xff] %v5156_v2 }
 0x3d0   : > { %v5109_v8 = vpop.f32.mrb[20].mxu0  ;;  %v532_v40 = vmul.f32 0.125, %v513_v3 }
 0x3d1   : > { %v5118_v37 = vpop.f32.mrb[21].mxu0 }
 0x3d2   : > { %v3573_v55 = vpop.f32.mrb[22].mxu0  ;;  %v548_v43 = vfloor.f32 %v532_v40 }
 0x3d3   : > { %v5122_v26 = vadd.f32 %v3573_v55, %v5112_v33  ;;  %v1442_v20 = vpop.f32.mrb[23].mxu0  ;;  %1492 = vmax.xlane.f32.xlu0 %v5116_v12  ;;  %v5136_v55 = vsel %vm564_vm10, 0.0, %v6133_v4 }
 0x3d4   : > { %v5131_v59 = vadd.f32 %v1442_v20, %v5126_v53  ;;  %6177 = vst [vmem:[#allocation23_spill] sm:$0xff] %v5136_v55  ;;  %v5146_v20 = vsel %vm562_vm11, 0.0, %v6133_v4  ;;  %vm566_vm13 = vcmp.eq.f32.partialorder %v548_v43, %v5074_v16  ;;  %v490_v43 = vadd.s32 48, %v5067_v63 }
 0x3d5   : > { %1500 = vmax.xlane.f32.xlu1 %v5122_v26  ;;  %6178 = vst [vmem:[#allocation24_spill] sm:$0xff] %v5146_v20  ;;  %v5166_v40 = vsel %vm566_vm13, 0.0, %v6133_v4  ;;  %v494_v4 = vadd.s32 80, %v5067_v63 }
 0x3d6   : > { %6180 = vst [vmem:[#allocation26_spill] sm:$0xff] %v5166_v40 }
 0x3d7   : > { %v510_v49 = vcvt.s32.f32 %v494_v4  ;;  %v6187_v4 = vmov -1e+30  }
 0x3d8   : > { %v5133_v1 = vpop.f32.mrb[24].mxu0 }
 0x3d9   : > { %v5138_v33 = vpop.f32.mrb[25].mxu0  ;;  %1496 = vmax.xlane.f32.xlu1 %v5131_v59 }
 0x3da   : > { %v3577_v54 = vpop.f32.mrb[26].mxu0 }
 0x3db   : > { %v5143_v36 = vadd.f32 %v3577_v54, %v5136_v55  ;;  %v1458_v42 = vpop.f32.mrb[27].mxu0 }
 0x3dc   : > { %v5151_v53 = vadd.f32 %v1458_v42, %v5146_v20  ;;  %v488_v20 = vadd.s32 32, %v5067_v63 }
 0x3dd   : > { %1508 = vmax.xlane.f32.xlu1 %v5143_v36 }
 0x3e0   : > { %v5153_v11 = vpop.f32.mrb[28].mxu0 }
 0x3e1   : > { %v5158_v22 = vpop.f32.mrb[29].mxu0  ;;  %1504 = vmax.xlane.f32.xlu1 %v5151_v53 }
 0x3e2   : > { %v3581_v3 = vpop.f32.mrb[30].mxu0 }
 0x3e3   : > { %v5163_v54 = vadd.f32 %v3581_v3, %v5156_v2  ;;  %v1474_v32 = vpop.f32.mrb[31].mxu0  ;;  %v506_v3 = vcvt.s32.f32 %v490_v43  ;;  %v504_v2 = vcvt.s32.f32 %v488_v20 }
 0x3e4   : > { %v5170_v42 = vadd.f32 %v1474_v32, %v5166_v40  ;;  %v5180_v32 = vpop.f32.mrb[8].mxu1 }
 0x3e5   : > { %1516 = vmax.xlane.f32.xlu1 %v5163_v54  ;;  %v525_v55 = vmul.f32 0.125, %v506_v3  ;;  %v523_v47 = vmul.f32 0.125, %v504_v2  ;;  %6181 = vst [vmem:[#allocation27_spill] sm:$0xff] %v5180_v32  ;;  %v5183_v17 = vpop.f32.mrb[9].mxu1  ;;  %v529_v3 = vmul.f32 0.125, %v510_v49  ;;  %v498_v2 = vadd.s32 112, %v5067_v63 }
 0x3e6   : > { %6182 = vst [vmem:[#allocation28_spill] sm:$0xff] %v5183_v17  ;;  %v5185_v10 = vpop.f32.mrb[10].mxu1  ;;  %v527_v32 = vmul.f32 0.125, %v508_v5 }
 0x3e7   : > { %v541_v40 = vfloor.f32 %v525_v55  ;;  %6183 = vst [vmem:[#allocation29_spill] sm:$0xff] %v5185_v10  ;;  %v5187_v30 = vpop.f32.mrb[11].mxu1  ;;  %v539_v20 = vfloor.f32 %v523_v47  ;;  %v545_v17 = vfloor.f32 %v529_v3  ;;  %v514_v50 = vcvt.s32.f32 %v498_v2 }
 0x3e8   : > { %6184 = vst [vmem:[#allocation30_spill] sm:$0xff] %v5187_v30  ;;  %v5189_v43 = vpop.f32.mrb[12].mxu1  ;;  %v496_v47 = vadd.s32 96, %v5067_v63  ;;  %v543_v39 = vfloor.f32 %v527_v32 }
 0x3e9   : > { %1512 = vmax.xlane.f32.xlu1 %v5170_v42  ;;  %2178 = vrot.lane.b32.xlu0 %v4771_v58, %s4345_s28  ;;  %6185 = vst [vmem:[#allocation31_spill] sm:$0xff] %v5189_v43  ;;  %vm559_vm14 = vcmp.eq.f32.partialorder %v541_v40, %v5074_v16  ;;  %v5193_v25 = vpop.f32.mrb[13].mxu1  ;;  %vm557_vm15 = vcmp.eq.f32.partialorder %v539_v20, %v5074_v16  ;;  %v533_v40 = vmul.f32 0.125, %v514_v50 }
 0x3ea   : > { %6186 = vst [vmem:[#allocation32_spill] sm:$0xff] %v5193_v25  ;;  %v5196_v55 = vsel %vm559_vm14, 0.0, %v6187_v4  ;;  %v5205_v49 = vsel %vm557_vm15, 0.0, %v6187_v4  ;;  %vm563_vm0 = vcmp.eq.f32.partialorder %v545_v17, %v5074_v16  ;;  %v512_v25 = vcvt.s32.f32 %v496_v47  ;;  %v5244_v2 = vpop.f32.mrb[14].mxu1 }
 0x3eb   : > { %6188 = vst [vmem:[#allocation33_spill] sm:$0xff] %v5196_v55  ;;  %v5202_v43 = vadd.f32 %v5109_v8, %v5196_v55  ;;  %6189 = vst [vmem:[#allocation34_spill] sm:$0xff] %v5205_v49  ;;  %v5211_v5 = vadd.f32 %v5118_v37, %v5205_v49  ;;  %v5214_v63 = vsel %vm563_vm0, 0.0, %v6187_v4  ;;  %vm561_vm4 = vcmp.eq.f32.partialorder %v543_v39, %v5074_v16  ;;  %v5250_v47 = vpop.f32.mrb[15].mxu1 }
 0x3ec   : > { %6190 = vst [vmem:[#allocation35_spill] sm:$0xff] %v5214_v63  ;;  %v549_v8 = vfloor.f32 %v533_v40  ;;  %v531_v20 = vmul.f32 0.125, %v512_v25  ;;  %v5220_v17 = vadd.f32 %v5133_v1, %v5214_v63  ;;  %v5223_v50 = vsel %vm561_vm4, 0.0, %v6187_v4  ;;  %6194 = vst [vmem:[#allocation39_spill] sm:$0xff] %v5244_v2 }
 0x3ed   : > { %6191 = vst [vmem:[#allocation36_spill] sm:$0xff] %v5223_v50  ;;  %v5229_v32 = vadd.f32 %v5138_v33, %v5223_v50  ;;  %6195 = vst [vmem:[#allocation40_spill] sm:$0xff] %v5250_v47 }
 0x3ee   : > { %vm567_vm5 = vcmp.eq.f32.partialorder %v549_v8, %v5074_v16  ;;  %v547_v37 = vfloor.f32 %v531_v20 }
 0x3ef   : > { %v5232_v25 = vsel %vm567_vm5, 0.0, %v6187_v4 }
 0x3f0   : > { %6192 = vst [vmem:[#allocation37_spill] sm:$0xff] %v5232_v25  ;;  %vm565_vm6 = vcmp.eq.f32.partialorder %v547_v37, %v5074_v16  ;;  %v5238_v1 = vadd.f32 %v5153_v11, %v5232_v25  ;;  %v5253_v16 = vpop.xlane.xlu1 %1212 }
 0x3f1   : > { %v5241_v3 = vsel %vm565_vm6, 0.0, %v6187_v4 }
 0x3f2   : > { %6193 = vst [vmem:[#allocation38_spill] sm:$0xff] %v5241_v3  ;;  %v5248_v33 = vadd.f32 %v5158_v22, %v5241_v3 }
 0x3f4   : > { %v5255_v39 = vpop.xlane.xlu1 %1221 }
 0x3f8   : > { %v5257_v11 = vpop.xlane.xlu1 %1224 }
 0x3fa   : > { %2180 = vrot.lane.b32.xlu1 %v4783_v0, %s4345_s28 }
 0x3fc   : > { %v5259_v4 = vpop.xlane.xlu1 %1227 }
 0x400   : > { %v5261_v40 = vpop.xlane.xlu1 %1230 }
 0x404   : > { %v5263_v8 = vpop.xlane.xlu1 %1233 }
 0x405   : > { %6196 = vst [vmem:[#allocation41_spill] sm:$0xff] %v5263_v8 }
 0x408   : > { %1498 = vmax.xlane.f32.xlu0 %v5202_v43  ;;  %v5265_v20 = vpop.xlane.xlu1 %1236 }
 0x409   : > { %6197 = vst [vmem:[#allocation42_spill] sm:$0xff] %v5265_v20 }
 0x40c   : > { %1494 = vmax.xlane.f32.xlu0 %v5211_v5  ;;  %v5267_v22 = vpop.xlane.xlu1 %1239 }
 0x40d   : > { %6198 = vst [vmem:[#allocation43_spill] sm:$0xff] %v5267_v22 }
 0x410   : > { %1506 = vmax.xlane.f32.xlu0 %v5220_v17  ;;  %v5269_v37 = vpop.xlane.xlu1 %1242 }
 0x411   : > { %6199 = vst [vmem:[#allocation44_spill] sm:$0xff] %v5269_v37 }
 0x414   : > { %1502 = vmax.xlane.f32.xlu0 %v5229_v32 }
 0x418   : > { %1514 = vmax.xlane.f32.xlu0 %v5238_v1 }
 0x41c   : > { %1510 = vmax.xlane.f32.xlu0 %v5248_v33 }
 0x458   : > { %v1491_v3 = vpop.xlane.xlu0 %1490 }
 0x459   : > { %v1520_v25 = vsub.f32 %v5086_v13, %v1491_v3 }
 0x45b   : > { %v1538_v50 = vmul.f32 1.442695, %v1520_v25  ;;  %v1489_v63 = vpop.xlane.xlu1 %1488 }
 0x45c   : > { %v1519_v49 = vsub.f32 %v5097_v46, %v1489_v63  ;;  %v1487_v55 = vpop.xlane.xlu0 %1486 }
 0x45d   : > { %4015 = vpow2.f32 %v1538_v50  ;;  %v1518_v47 = vsub.f32 %v5100_v14, %v1487_v55 }
 0x45e   : > { %v1536_v2 = vmul.f32 1.442695, %v1519_v49 }
 0x45f   : > { %v1534_v30 = vmul.f32 1.442695, %v1518_v47 }
 0x460   : > { %4017 = vpow2.f32 %v1536_v2  ;;  %v1493_v8 = vpop.xlane.xlu0 %1492 }
 0x461   : > { %4019 = vpow2.f32 %v1534_v30  ;;  %v1521_v20 = vsub.f32 %v5116_v12, %v1493_v8 }
 0x462   : > { %v1501_v22 = vpop.xlane.xlu1 %1500 }
 0x463   : > { %v1540_v37 = vmul.f32 1.442695, %v1521_v20  ;;  %v1525_v10 = vsub.f32 %v5122_v26, %v1501_v22 }
 0x465   : > { %4021 = vpow2.f32 %v1540_v37  ;;  %v1548_v13 = vmul.f32 1.442695, %v1525_v10  ;;  %v5291_v10 = vpop.permute.xlu0 %2178 }
 0x466   : > { %v1497_v12 = vpop.xlane.xlu1 %1496 }
 0x467   : > { %v5276_v25 = vpop.eup %4015  ;;  %4023 = vpow2.f32 %v1548_v13  ;;  %v1523_v3 = vsub.f32 %v5131_v59, %v1497_v12 }
 0x468   : > { %1570 = vadd.xlane.f32.xlu0 %v5276_v25 }
 0x469   : > { %v1544_v20 = vmul.f32 1.442695, %v1523_v3 }
 0x46a   : > { %v5279_v46 = vpop.eup %4017  ;;  %v1509_v63 = vpop.xlane.xlu1 %1508 }
 0x46b   : > { %v5281_v14 = vpop.eup %4019  ;;  %v1529_v22 = vsub.f32 %v5143_v36, %v1509_v63 }
 0x46c   : > { %1568 = vadd.xlane.f32.xlu0 %v5279_v46  ;;  %1566 = vadd.xlane.f32.xlu1 %v5281_v14 }
 0x46e   : > { %v1505_v13 = vpop.xlane.xlu1 %1504 }
 0x46f   : > { %v5285_v30 = vpop.eup %4021 }
 0x470   : > { %1572 = vadd.xlane.f32.xlu1 %v5285_v30 }
 0x471   : > { %v5288_v26 = vpop.eup %4023 }
 0x472   : > { %6200 = vst [vmem:[#allocation45_spill] sm:$0xff] %v5288_v26  ;;  %1580 = vadd.xlane.f32.xlu0 %v5288_v26 }
 0x495   : > { %v1499_v55 = vpop.xlane.xlu0 %1498 }
 0x496   : > { %v1524_v49 = vsub.f32 %v5202_v43, %v1499_v55  ;;  %v1556_v43 = vmul.f32 1.442695, %v1529_v22  ;;  %v1527_v55 = vsub.f32 %v5151_v53, %v1505_v13  ;;  %v1517_v22 = vpop.xlane.xlu1 %1516 }
 0x498   : > { %v1546_v50 = vmul.f32 1.442695, %v1524_v49 }
 0x499   : > { %v1495_v2 = vpop.xlane.xlu0 %1494 }
 0x49a   : > { %4025 = vpow2.f32 %v1546_v50  ;;  %v1522_v47 = vsub.f32 %v5211_v5, %v1495_v2  ;;  %v1552_v50 = vmul.f32 1.442695, %v1527_v55 }
 0x49c   : > { %v1542_v8 = vmul.f32 1.442695, %v1522_v47 }
 0x49d   : > { %v1507_v37 = vpop.xlane.xlu0 %1506 }
 0x49e   : > { %4027 = vpow2.f32 %v1542_v8  ;;  %v1528_v26 = vsub.f32 %v5220_v17, %v1507_v37  ;;  %v1533_v37 = vsub.f32 %v5163_v54, %v1517_v22 }
 0x49f   : > { %4029 = vpow2.f32 %v1544_v20 }
 0x4a0   : > { %v1554_v21 = vmul.f32 1.442695, %v1528_v26  ;;  %v1564_v13 = vmul.f32 1.442695, %v1533_v37 }
 0x4a1   : > { %v1503_v49 = vpop.xlane.xlu0 %1502 }
 0x4a2   : > { %4031 = vpow2.f32 %v1554_v21  ;;  %v1526_v59 = vsub.f32 %v5229_v32, %v1503_v49 }
 0x4a3   : > { %4033 = vpow2.f32 %v1556_v43  ;;  %v1513_v43 = vpop.xlane.xlu1 %1512 }
 0x4a4   : > { %v5300_v12 = vpop.eup %4025  ;;  %v1550_v5 = vmul.f32 1.442695, %v1526_v59  ;;  %v1531_v55 = vsub.f32 %v5170_v42, %v1513_v43 }
 0x4a5   : > { %1578 = vadd.xlane.f32.xlu1 %v5300_v12  ;;  %v1515_v36 = vpop.xlane.xlu0 %1514 }
 0x4a6   : > { %4035 = vpow2.f32 %v1550_v5  ;;  %v1532_v17 = vsub.f32 %v5238_v1, %v1515_v36  ;;  %v1560_v49 = vmul.f32 1.442695, %v1531_v55 }
 0x4a7   : > { %4037 = vpow2.f32 %v1552_v50 }
 0x4a8   : > { %v5304_v26 = vpop.eup %4027  ;;  %v1562_v63 = vmul.f32 1.442695, %v1532_v17  ;;  %v5349_v17 = vstv %s3887_s18 }
 0x4a9   : > { %1574 = vadd.xlane.f32.xlu1 %v5304_v26  ;;  %v1511_v53 = vpop.xlane.xlu0 %1510  ;;  %v5308_v32 = vpop.eup %4029 }
 0x4aa   : > { %4039 = vpow2.f32 %v1562_v63  ;;  %v1530_v21 = vsub.f32 %v5248_v33, %v1511_v53 }
 0x4ac   : > { %v5310_v3 = vpop.eup %4031  ;;  %v1558_v2 = vmul.f32 1.442695, %v1530_v21 }
 0x4ad   : > { %1576 = vadd.xlane.f32.xlu1 %v5308_v32  ;;  %1586 = vadd.xlane.f32.xlu0 %v5310_v3  ;;  %v5314_v1 = vpop.eup %4033 }
 0x4ae   : > { %4041 = vpow2.f32 %v1558_v2 }
 0x4af   : > { %4043 = vpow2.f32 %v1564_v13 }
 0x4b0   : > { %v5316_v47 = vpop.eup %4035  ;;  %4045 = vrsqrt.f32 %v5025_v41 }
 0x4b1   : > { %1588 = vadd.xlane.f32.xlu0 %v5314_v1  ;;  %1582 = vadd.xlane.f32.xlu1 %v5316_v47  ;;  %v5320_v8 = vpop.eup %4037  ;;  %4047 = vpow2.f32 %v1560_v49 }
 0x4b2   : > { %4049 = vrsqrt.f32 %v5027_v44 }
 0x4b3   : > { %4051 = vrsqrt.f32 %v5033_v31  ;;  %v5351_v31 = vpop.permute.xlu1 %2180 }
 0x4b4   : > { %v5322_v33 = vpop.eup %4039  ;;  %4053 = vrsqrt.f32 %v5029_v61 }
 0x4b5   : > { %1584 = vadd.xlane.f32.xlu1 %v5320_v8  ;;  %1594 = vadd.xlane.f32.xlu0 %v5322_v33 }
 0x4b8   : > { %v5326_v20 = vpop.eup %4041 }
 0x4b9   : > { %1590 = vadd.xlane.f32.xlu0 %v5326_v20  ;;  %v5339_v59 = vpop.eup %4043 }
 0x4ba   : > { %v4046_v54 = vpop.eup %4045 }
 0x4bb   : > { %v5344_v5 = vpop.eup %4047  ;;  %v1260_v41 = vmul.f32 %v4046_v54, %v5053_v45 }
 0x4bc   : > { %v4050_v50 = vpop.eup %4049 }
 0x4bd   : > { %v4052_v42 = vpop.eup %4051  ;;  %v1261_v44 = vmul.f32 %v4050_v50, %v5051_v51  ;;  %v1277_v53 = vmul.f32 %v5349_v17, %v1260_v41 }
 0x4be   : > { %v4054_v36 = vpop.eup %4053  ;;  %v1263_v61 = vmul.f32 %v4052_v42, %v5055_v7 }
 0x4bf   : > { %v1262_v21 = vmul.f32 %v4054_v36, %v5057_v29  ;;  %v1278_v2 = vmul.f32 %v5349_v17, %v1261_v44  ;;  %v4271_v36 = vld [vmem:[%s4470_s26 + $0x8] sm:$0xff] }
 0x4c0   : > { %v1280_v45 = vmul.f32 %v5349_v17, %v1263_v61 }
 0x4c1   : > { %v1279_v51 = vmul.f32 %v5349_v17, %v1262_v21 }
 0x4c6   : > { %2182 = vrot.lane.b32.xlu1 %v4781_v62, %s4345_s28 }
 0x4cf   : > { %2184 = vrot.lane.b32.xlu0 %v4799_v9, %s4345_s28 }
 0x4d3   : > { %2186 = vrot.lane.b32.xlu0 %v4797_v38, %s4345_s28 }
 0x4ea   : > { %1596 = vadd.xlane.f32.xlu1 %v5339_v59 }
 0x4f2   : > { %1592 = vadd.xlane.f32.xlu0 %v5344_v5 }
 0x4f5   : > { %v1571_v63 = vpop.xlane.xlu0 %1570 }
 0x4f6   : > { %4055 = vrcp.f32 %v1571_v63 }
 0x4f9   : > { %v1567_v22 = vpop.xlane.xlu1 %1566  ;;  %v1569_v37 = vpop.xlane.xlu0 %1568 }
 0x4fa   : > { %4057 = vrcp.f32 %v1567_v22  ;;  %v4272_v22 = vld [vmem:[%s4470_s26 + $0x18] sm:$0xff] }
 0x4fb   : > { %4059 = vrcp.f32 %v1569_v37  ;;  %2160 = vrot.lane.b32.xlu1 %v4773_v27, %s4347_s19  ;;  %v2217_v37 = vsel %vm986_vm2, %v5047_v28, 0  ;;  %v2220_v28 = vsel %vm986_vm2, %v5291_v10, 0 }
 0x4fc   : > { %4061 = vtanh.f32 %v1277_v53 }
 0x4fd   : > { %4063 = vtanh.f32 %v1278_v2  ;;  %v1573_v7 = vpop.xlane.xlu1 %1572 }
 0x4fe   : > { %4065 = vrcp.f32 %v1573_v7  ;;  %v4276_v7 = vld [vmem:[%s4470_s26 + $0x58] sm:$0xff] }
 0x4ff   : > { %4067 = vtanh.f32 %v1280_v45  ;;  %2170 = vrot.lane.b32.xlu1 %v4797_v38, %s4347_s19  ;;  %v4274_v45 = vld [vmem:[%s4470_s26 + $0x38] sm:$0xff] }
 0x500   : > { %4069 = vtanh.f32 %v1279_v51  ;;  %v4056_v29 = vpop.eup %4055  ;;  %v4275_v51 = vld [vmem:[%s4470_s26 + $0x48] sm:$0xff] }
 0x501   : > { %v1616_v42 = vmul.f32 %v4056_v29, %v5276_v25  ;;  %4071 = vrsqrt.f32 %v5043_v48  ;;  %v4277_v29 = vld [vmem:[%s4470_s26 + $0x68] sm:$0xff]  ;;  %v4280_v48 = vld [vmem:[%s4470_s26 + $0x10] sm:$0xff] }
 0x502   : > { %4073 = vrsqrt.f32 %v5037_v52 }
 0x503   : > { %2174 = vrot.lane.b32.xlu1 %v4811_v23, %s4347_s19  ;;  %4075 = vrsqrt.f32 %v5035_v18  ;;  %v4281_v18 = vld [vmem:[%s4470_s26 + $0x20] sm:$0xff] }
 0x504   : > { %v4058_v13 = vpop.eup %4057  ;;  %4077 = vrsqrt.f32 %v5253_v16 }
 0x505   : > { %v4060_v43 = vpop.eup %4059  ;;  %v1614_v55 = vmul.f32 %v4058_v13, %v5281_v14  ;;  %v4278_v13 = vld [vmem:[%s4470_s26 + $0x78] sm:$0xff]  ;;  %4079 = vrsqrt.f32 %v5261_v40 }
 0x506   : > { %v4062_v49 = vpop.eup %4061  ;;  %v1615_v54 = vmul.f32 %v4060_v43, %v5279_v46  ;;  %v4279_v43 = vld [vmem:[%s4470_s26] sm:$0xff]  ;;  %4081 = vrsqrt.f32 %v5259_v4 }
 0x507   : > { %v4064_v50 = vpop.eup %4063  ;;  %v1630_v41 = vmul.f32 %v4062_v49, %v1614_v55  ;;  %1777 = vrot.lane.b32.xlu1 %v4271_v36, %s4347_s19  ;;  %v1581_v49 = vpop.xlane.xlu0 %1580  ;;  %4083 = vrsqrt.f32 %v5257_v11 }
 0x508   : > { %v4066_v44 = vpop.eup %4065  ;;  %2188 = vrot.lane.b32.xlu0 %v4813_v24, %s4345_s28  ;;  %v1631_v63 = vmul.f32 %v4064_v50, %v1615_v54  ;;  %4085 = vrcp.f32 %v1581_v49  ;;  %v6208_v49 = vld [vmem:[#allocation10_spill] sm:$0xff] }
 0x509   : > { %v4068_v61 = vpop.eup %4067  ;;  %v1617_v14 = vmul.f32 %v4066_v44, %v5285_v30  ;;  %v4273_v30 = vld [vmem:[%s4470_s26 + $0x28] sm:$0xff]  ;;  %4087 = vrsqrt.f32 %v5255_v39  ;;  %v4284_v44 = vld [vmem:[%s4470_s26 + $0x50] sm:$0xff] }
 0x50a   : > { %v4070_v53 = vpop.eup %4069  ;;  %v1646_v21 = vpack.c.bf16 %v1631_v63, %v1630_v41 }
 0x50b   : > { %v1632_v46 = vmul.f32 %v4070_v53, %v1616_v42  ;;  %v1633_v2 = vmul.f32 %v4068_v61, %v1617_v14  ;;  %1781 = vrot.lane.b32.xlu1 %v4272_v22, %s4347_s19  ;;  %v4072_v52 = vpop.eup %4071  ;;  %v6202_v61 = vld [vmem:[#allocation29_spill] sm:$0xff]  ;;  %v6203_v53 = vld [vmem:[#allocation30_spill] sm:$0xff]  ;;  %v6204_v22 = vld [vmem:[#allocation8_spill] sm:$0xff] }
 0x50c   : > { %3598 = vmatprep.mubr.bf16.mxu1 %v1646_v21  ;;  %2190 = vrot.lane.b32.xlu0 %v4811_v23, %s4345_s28  ;;  %v1267_v55 = vmul.f32 %v4072_v52, %v5063_v57  ;;  %v4282_v57 = vld [vmem:[%s4470_s26 + $0x30] sm:$0xff] }
 0x50d   : > { %v1647_v25 = vpack.c.bf16 %v1633_v2, %v1632_v46 }
 0x50f   : > { %3599 = vmatmul.mubr.bf16.vlgmr.msra.gmra.mrb[16].mxu1 %v1647_v25  ;;  %1785 = vrot.lane.b32.xlu1 %v4273_v30, %s4347_s19  ;;  %v6205_v25 = vld [vmem:[#allocation27_spill] sm:$0xff]  ;;  %v4285_v30 = vld [vmem:[%s4470_s26 + $0x60] sm:$0xff] }
 0x510   : > { %3671 = vmatpush3.bf16.xpose.msra.mxu1 %v2217_v37  ;;  %2162 = vrot.lane.b32.xlu0 %v4771_v58, %s4347_s19 }
 0x511   : > { %3879 = vmatprep.subr.msk.bf16.mxu1 %vm986_vm2, %v5291_v10  ;;  %v2223_v10 = vsel %vm986_vm2, %v5351_v31, 0 }
 0x513   : > { %1789 = vrot.lane.b32.xlu1 %v4274_v45, %s4347_s19  ;;  %v6206_v45 = vld [vmem:[#allocation45_spill] sm:$0xff] }
 0x514   : > { %2164 = vrot.lane.b32.xlu0 %v4783_v0, %s4347_s19 }
 0x517   : > { %1793 = vrot.lane.b32.xlu1 %v4275_v51, %s4347_s19 }
 0x518   : > { %3673 = vmatpush3.bf16.xpose.msra.mxu1 %v2220_v28  ;;  %2166 = vrot.lane.b32.xlu0 %v4781_v62, %s4347_s19 }
 0x519   : > { %3880 = vmatprep.subr.msk.bf16.mxu1 %vm986_vm2, %v5351_v31  ;;  %v4074_v31 = vpop.eup %4073 }
 0x51a   : > { %v4076_v16 = vpop.eup %4075 }
 0x51b   : > { %1797 = vrot.lane.b32.xlu1 %v4276_v7, %s4347_s19  ;;  %v1264_v4 = vmul.f32 %v4076_v16, %v5061_v15  ;;  %v6201_v15 = vld [vmem:[#allocation7_spill] sm:$0xff]  ;;  %v6207_v7 = vld [vmem:[#allocation28_spill] sm:$0xff] }
 0x51c   : > { %2168 = vrot.lane.b32.xlu0 %v4799_v9, %s4347_s19 }
 0x51d   : > { %v1281_v50 = vmul.f32 %v5349_v17, %v1264_v4 }
 0x51f   : > { %1801 = vrot.lane.b32.xlu1 %v4277_v29, %s4347_s19 }
 0x520   : > { %3675 = vmatpush3.bf16.xpose.msra.mxu1 %v2223_v10  ;;  %2172 = vrot.lane.b32.xlu0 %v4813_v24, %s4347_s19 }
 0x523   : > { %1805 = vrot.lane.b32.xlu1 %v4278_v13, %s4347_s19 }
 0x524   : > { %1775 = vrot.lane.b32.xlu0 %v4279_v43, %s4347_s19 }
 0x527   : > { %2002 = vrot.lane.b32.xlu1 %v4849_v34, %s4347_s19  ;;  %v1266_v34 = vmul.f32 %v4074_v31, %v5065_v60  ;;  %v4078_v60 = vpop.eup %4077 }
 0x528   : > { %1779 = vrot.lane.b32.xlu0 %v4280_v48, %s4347_s19  ;;  %v1265_v39 = vmul.f32 %v4078_v60, %v5059_v56  ;;  %v4080_v11 = vpop.eup %4079 }
 0x529   : > { %v1283_v40 = vmul.f32 %v5349_v17, %v1266_v34  ;;  %v4082_v41 = vpop.eup %4081  ;;  %v1271_v14 = vmul.f32 %v4080_v11, %v6202_v61  ;;  %v4286_v34 = vld [vmem:[%s4470_s26 + $0x70] sm:$0xff]  ;;  %v6210_v11 = vld [vmem:[#allocation5_spill] sm:$0xff] }
 0x52a   : > { %v4084_v36 = vpop.eup %4083  ;;  %v1282_v63 = vmul.f32 %v5349_v17, %v1265_v39  ;;  %v1270_v21 = vmul.f32 %v4082_v41, %v6203_v53 }
 0x52b   : > { %2004 = vrot.lane.b32.xlu1 %v4853_v35, %s4347_s19  ;;  %v1284_v35 = vmul.f32 %v5349_v17, %v1267_v55  ;;  %v1269_v37 = vmul.f32 %v4084_v36, %v6205_v25  ;;  %v1288_v29 = vmul.f32 %v5349_v17, %v1271_v14  ;;  %v6212_v14 = vld [vmem:[#allocation6_spill] sm:$0xff] }
 0x52c   : > { %1783 = vrot.lane.b32.xlu0 %v4281_v18, %s4347_s19  ;;  %v1287_v43 = vmul.f32 %v5349_v17, %v1270_v21  ;;  %v6213_v25 = vld [vmem:[#allocation14_spill] sm:$0xff] }
 0x52d   : > { %v1286_v18 = vmul.f32 %v5349_v17, %v1269_v37 }
 0x52f   : > { %2006 = vrot.lane.b32.xlu1 %v4867_v6, %s4347_s19  ;;  %v4283_v6 = vld [vmem:[%s4470_s26 + $0x40] sm:$0xff] }
 0x530   : > { %1787 = vrot.lane.b32.xlu0 %v4282_v57, %s4347_s19 }
 0x532   : > { %v1579_v54 = vpop.xlane.xlu1 %1578 }
 0x533   : > { %4089 = vrcp.f32 %v1579_v54  ;;  %2010 = vrot.lane.b32.xlu1 %v4962_v19, %s4347_s19  ;;  %v4086_v19 = vpop.eup %4085  ;;  %v6209_v54 = vld [vmem:[#allocation11_spill] sm:$0xff] }
 0x534   : > { %4091 = vtanh.f32 %v1284_v35  ;;  %1791 = vrot.lane.b32.xlu0 %v4283_v6, %s4347_s19  ;;  %v4088_v56 = vpop.eup %4087  ;;  %v1621_v28 = vmul.f32 %v4086_v19, %v6206_v45  ;;  %v6214_v45 = vld [vmem:[#allocation9_spill] sm:$0xff] }
 0x535   : > { %4093 = vtanh.f32 %v1283_v40  ;;  %v1268_v10 = vmul.f32 %v4088_v56, %v6207_v7 }
 0x536   : > { %v1575_v42 = vpop.xlane.xlu1 %1574 }
 0x537   : > { %4095 = vrcp.f32 %v1575_v42  ;;  %2012 = vrot.lane.b32.xlu1 %v6201_v15, %s4347_s19  ;;  %v1285_v40 = vmul.f32 %v5349_v17, %v1268_v10 }
 0x538   : > { %1795 = vrot.lane.b32.xlu0 %v4284_v44, %s4347_s19  ;;  %4097 = vtanh.f32 %v1281_v50 }
 0x53a   : > { %v1577_v46 = vpop.xlane.xlu1 %1576  ;;  %v1587_v2 = vpop.xlane.xlu0 %1586 }
 0x53b   : > { %4099 = vrcp.f32 %v1577_v46  ;;  %2014 = vrot.lane.b32.xlu1 %v6204_v22, %s4347_s19 }
 0x53c   : > { %4101 = vrcp.f32 %v1587_v2  ;;  %1799 = vrot.lane.b32.xlu0 %v4285_v30, %s4347_s19 }
 0x53d   : > { %v4090_v51 = vpop.eup %4089  ;;  %4103 = vtanh.f32 %v1282_v63  ;;  %v6211_v63 = vld [vmem:[#allocation12_spill] sm:$0xff] }
 0x53e   : > { %v4092_v13 = vpop.eup %4091  ;;  %v1583_v48 = vpop.xlane.xlu1 %1582  ;;  %v1620_v31 = vmul.f32 %v4090_v51, %v5300_v12 }
 0x53f   : > { %v1589_v52 = vpop.xlane.xlu0 %1588  ;;  %v4094_v55 = vpop.eup %4093  ;;  %4105 = vrcp.f32 %v1583_v48  ;;  %2018 = vrot.lane.b32.xlu1 %v6208_v49, %s4347_s19  ;;  %v1637_v35 = vmul.f32 %v4092_v13, %v1621_v28 }
 0x540   : > { %4107 = vrcp.f32 %v1589_v52  ;;  %1803 = vrot.lane.b32.xlu0 %v4286_v34, %s4347_s19  ;;  %v1636_v16 = vmul.f32 %v4094_v55, %v1620_v31  ;;  %v6216_v31 = vld [vmem:[#allocation13_spill] sm:$0xff]  ;;  %v6219_v34 = vld [vmem:[#allocation43_spill] sm:$0xff] }
 0x541   : > { %v4096_v57 = vpop.eup %4095  ;;  %4109 = vtanh.f32 %v1288_v29 }
 0x542   : > { %4111 = vtanh.f32 %v1287_v43  ;;  %v1585_v60 = vpop.xlane.xlu1 %1584  ;;  %v1649_v4 = vpack.c.bf16 %v1637_v35, %v1636_v16  ;;  %v4098_v6 = vpop.eup %4097  ;;  %v1618_v39 = vmul.f32 %v4096_v57, %v5304_v26  ;;  %v6215_v43 = vld [vmem:[#allocation16_spill] sm:$0xff]  ;;  %v6220_v16 = vld [vmem:[#allocation42_spill] sm:$0xff]  ;;  %v6221_v35 = vld [vmem:[#allocation41_spill] sm:$0xff] }
 0x543   : > { %v5465_v12 = vpop.xlane.xlu0 %1594  ;;  %4113 = vrcp.f32 %v1585_v60  ;;  %2020 = vrot.lane.b32.xlu1 %v6209_v54, %s4347_s19  ;;  %v6222_v60 = vld [vmem:[#allocation39_spill] sm:$0xff]  ;;  %v6223_v54 = vld [vmem:[#allocation40_spill] sm:$0xff] }
 0x544   : > { %4115 = vtanh.f32 %v1286_v18  ;;  %2000 = vrot.lane.b32.xlu0 %v6210_v11, %s4347_s19  ;;  %v1634_v26 = vmul.f32 %v4098_v6, %v1618_v39  ;;  %v6218_v18 = vld [vmem:[#allocation44_spill] sm:$0xff] }
 0x545   : > { %v4100_v50 = vpop.eup %4099  ;;  %4117 = vtanh.f32 %v1285_v40 }
 0x546   : > { %v4102_v42 = vpop.eup %4101  ;;  %v2183_v41 = vpop.permute.xlu1 %2182  ;;  %v1619_v36 = vmul.f32 %v4100_v50, %v5308_v32  ;;  %4119 = vrsqrt.f32 %v6218_v18 }
 0x547   : > { %v5472_v15 = vpop.xlane.xlu0 %1590  ;;  %v4104_v44 = vpop.eup %4103  ;;  %3881 = vmatprep.subr.msk.bf16.mxu1 %vm986_vm2, %v2183_v41  ;;  %v2226_v19 = vsel %vm986_vm2, %v2183_v41, 0  ;;  %2022 = vrot.lane.b32.xlu1 %v6211_v63, %s4347_s19  ;;  %v1624_v53 = vmul.f32 %v4102_v42, %v5310_v3  ;;  %4121 = vrsqrt.f32 %v6219_v34 }
 0x548   : > { %3677 = vmatpush3.bf16.xpose.msra.mxu1 %v2226_v19  ;;  %v1635_v61 = vmul.f32 %v4104_v44, %v1619_v36  ;;  %2008 = vrot.lane.b32.xlu0 %v6212_v14, %s4347_s19  ;;  %4123 = vrsqrt.f32 %v6220_v16  ;;  %v6224_v36 = vld [vmem:[#allocation31_spill] sm:$0xff]  ;;  %v6225_v19 = vld [vmem:[#allocation32_spill] sm:$0xff] }
 0x549   : > { %v4106_v56 = vpop.eup %4105  ;;  %4125 = vrsqrt.f32 %v6221_v35 }
 0x54a   : > { %v4108_v21 = vpop.eup %4107  ;;  %v1648_v32 = vpack.c.bf16 %v1635_v61, %v1634_v26  ;;  %v1622_v30 = vmul.f32 %v4106_v56, %v5316_v47  ;;  %4127 = vrcp.f32 %v5465_v12 }
 0x54b   : > { %v2185_v46 = vpop.permute.xlu0 %2184  ;;  %v4110_v2 = vpop.eup %4109  ;;  %v1625_v22 = vmul.f32 %v4108_v21, %v5314_v1  ;;  %2026 = vrot.lane.b32.xlu1 %v6213_v25, %s4347_s19 }
 0x54c   : > { %3882 = vmatprep.subr.msk.bf16.mxu1 %vm986_vm2, %v2185_v46  ;;  %v4112_v37 = vpop.eup %4111  ;;  %3602 = vmatprep.mubr.bf16.mxu1 %v1648_v32  ;;  %v2229_v1 = vsel %vm986_vm2, %v2185_v46, 0 }
 0x54d   : > { %2016 = vrot.lane.b32.xlu0 %v6214_v45, %s4347_s19  ;;  %v4114_v28 = vpop.eup %4113  ;;  %3603 = vmatmul.mubr.bf16.gmra.mrb[20].mxu1 %v1649_v4  ;;  %v1640_v3 = vmul.f32 %v4112_v37, %v1624_v53  ;;  %v1641_v51 = vmul.f32 %v4110_v2, %v1625_v22 }
 0x54e   : > { %v4116_v7 = vpop.eup %4115  ;;  %v1623_v10 = vmul.f32 %v4114_v28, %v5320_v8  ;;  %v6217_v8 = vld [vmem:[#allocation15_spill] sm:$0xff] }
 0x54f   : > { %v4118_v29 = vpop.eup %4117  ;;  %v1651_v13 = vpack.c.bf16 %v1641_v51, %v1640_v3  ;;  %2030 = vrot.lane.b32.xlu1 %v6215_v43, %s4347_s19  ;;  %v2187_v48 = vpop.permute.xlu0 %2186 }
 0x550   : > { %3679 = vmatpush3.bf16.xpose.msra.mxu1 %v2229_v1  ;;  %v1638_v47 = vmul.f32 %v4118_v29, %v1622_v30  ;;  %v1639_v52 = vmul.f32 %v4116_v7, %v1623_v10  ;;  %v2232_v49 = vsel %vm986_vm2, %v2187_v48, 0  ;;  %v4120_v57 = vpop.eup %4119 }
 0x551   : > { %2024 = vrot.lane.b32.xlu0 %v6216_v31, %s4347_s19  ;;  %3883 = vmatprep.subr.msk.bf16.mxu1 %vm986_vm2, %v2187_v48  ;;  %v4122_v40 = vpop.eup %4121  ;;  %v1275_v4 = vmul.f32 %v4120_v57, %v6222_v60 }
 0x552   : > { %v1650_v55 = vpack.c.bf16 %v1639_v52, %v1638_v47  ;;  %v1274_v6 = vmul.f32 %v4122_v40, %v6223_v54  ;;  %v4124_v11 = vpop.eup %4123 }
 0x553   : > { %v1292_v39 = vmul.f32 %v5349_v17, %v1275_v4  ;;  %v4126_v42 = vpop.eup %4125  ;;  %v1273_v44 = vmul.f32 %v4124_v11, %v6224_v36 }
 0x554   : > { %3606 = vmatprep.mubr.bf16.mxu1 %v1650_v55  ;;  %v1291_v50 = vmul.f32 %v5349_v17, %v1274_v6  ;;  %v1272_v63 = vmul.f32 %v4126_v42, %v6225_v19  ;;  %v4128_v12 = vpop.eup %4127 }
 0x555   : > { %2028 = vrot.lane.b32.xlu0 %v6217_v8, %s4347_s19  ;;  %3607 = vmatmul.mubr.bf16.gmra.mrb[24].mxu1 %v1651_v13  ;;  %v1290_v61 = vmul.f32 %v5349_v17, %v1273_v44  ;;  %v1628_v21 = vmul.f32 %v4128_v12, %v5322_v33 }
 0x556   : > { %v1289_v14 = vmul.f32 %v5349_v17, %v1272_v63 }
 0x558   : > { %3681 = vmatpush3.bf16.xpose.msra.mxu1 %v2232_v49 }
 0x577   : > { %v1597_v41 = vpop.xlane.xlu1 %1596 }
 0x578   : > { %4129 = vrcp.f32 %v1597_v41 }
 0x579   : > { %4131 = vtanh.f32 %v1292_v39 }
 0x57a   : > { %4133 = vtanh.f32 %v1291_v50 }
 0x57b   : > { %v2161_v26 = vpop.permute.xlu1 %2160  ;;  %4135 = vrcp.f32 %v5472_v15 }
 0x57f   : > { %v5513_v56 = vpop.permute.xlu1 %2170  ;;  %v1593_v53 = vpop.xlane.xlu0 %1592 }
 0x580   : > { %4137 = vrcp.f32 %v1593_v53 }
 0x581   : > { %4139 = vtanh.f32 %v1290_v61 }
 0x582   : > { %v4130_v46 = vpop.eup %4129  ;;  %4141 = vtanh.f32 %v1289_v14 }
 0x583   : > { %v4132_v32 = vpop.eup %4131  ;;  %v5516_v2 = vpop.permute.xlu1 %2174  ;;  %v1629_v15 = vmul.f32 %v4130_v46, %v5339_v59 }
 0x584   : > { %v2189_v22 = vpop.permute.xlu0 %2188  ;;  %v4134_v25 = vpop.eup %4133 }
 0x585   : > { %3884 = vmatprep.subr.msk.bf16.mxu1 %vm986_vm2, %v2189_v22  ;;  %v2235_v37 = vsel %vm986_vm2, %v2189_v22, 0  ;;  %v1644_v30 = vmul.f32 %v4134_v25, %v1628_v21  ;;  %v1645_v45 = vmul.f32 %v4132_v32, %v1629_v15  ;;  %v4136_v28 = vpop.eup %4135 }
 0x586   : > { %3683 = vmatpush3.bf16.xpose.msra.mxu1 %v2235_v37  ;;  %v1626_v7 = vmul.f32 %v4136_v28, %v5326_v20 }
 0x587   : > { %v5521_v51 = vpop.permute.xlu1 %1777  ;;  %v1653_v33 = vpack.c.bf16 %v1645_v45, %v1644_v30 }
 0x588   : > { %v2191_v3 = vpop.permute.xlu0 %2190 }
 0x589   : > { %3885 = vmatprep.subr.msk.bf16.mxu1 %vm986_vm2, %v2191_v3  ;;  %v2238_v48 = vsel %vm986_vm2, %v2191_v3, 0 }
 0x58a   : > { %v4138_v10 = vpop.eup %4137 }
 0x58b   : > { %v4140_v29 = vpop.eup %4139  ;;  %v1627_v1 = vmul.f32 %v4138_v10, %v5344_v5  ;;  %v5526_v13 = vpop.permute.xlu1 %1781 }
 0x58c   : > { %v2163_v59 = vpop.permute.xlu0 %2162  ;;  %v4142_v43 = vpop.eup %4141 }
 0x58d   : > { %v1642_v47 = vmul.f32 %v4142_v43, %v1626_v7  ;;  %v1643_v52 = vmul.f32 %v4140_v29, %v1627_v1 }
 0x58e   : > { %3685 = vmatpush3.bf16.xpose.msra.mxu1 %v2238_v48 }
 0x58f   : > { %v1652_v55 = vpack.c.bf16 %v1643_v52, %v1642_v47  ;;  %v5529_v8 = vpop.permute.xlu1 %1785 }
 0x590   : > { %v2165_v31 = vpop.permute.xlu0 %2164 }
 0x591   : > { %3610 = vmatprep.mubr.bf16.mxu1 %v1652_v55 }
 0x592   : > { %3611 = vmatmul.mubr.bf16.gmra.mrb[28].mxu1 %v1653_v33 }
 0x593   : > { %3686 = vmatprep.mubr.msk.bf16.mxu1 %vm986_vm2, %v2161_v26  ;;  %v5532_v49 = vpop.permute.xlu1 %1789 }
 0x594   : > { %v2167_v20 = vpop.permute.xlu0 %2166 }
 0x597   : > { %v5534_v18 = vpop.permute.xlu1 %1793 }
 0x598   : > { %v2169_v5 = vpop.permute.xlu0 %2168 }
 0x59a   : > { %3687 = vmatmul.mubr.msk.bf16.vlgmr.msra.gmra.mrb[32].mxu1 %vm986_vm2, %v2163_v59 }
 0x59b   : > { %3690 = vmatprep.mubr.msk.bf16.mxu1 %vm986_vm2, %v2165_v31  ;;  %v5538_v16 = vpop.permute.xlu1 %1797 }
 0x59c   : > { %v2173_v34 = vpop.permute.xlu0 %2172 }
 0x59f   : > { %v5540_v57 = vpop.permute.xlu1 %1801 }
 0x5a0   : > { %v1776_v35 = vpop.permute.xlu0 %1775 }
 0x5a1   : > { %v3822_v40 = vpack.c.bf16 %v5521_v51, %v1776_v35  ;;  %3646 = vmatprep.mubr.msk.f32.mxu0 %vm986_vm2, %v1776_v35 }
 0x5a2   : > { %3691 = vmatmul.mubr.msk.bf16.gmra.mrb[36].mxu1 %vm986_vm2, %v2167_v20 }
 0x5a3   : > { %3824 = vmatprep.subr.msk.bf16.mxu0 %vm4793_vm3, %v3822_v40  ;;  %3694 = vmatprep.mubr.msk.bf16.mxu1 %vm986_vm2, %v2169_v5  ;;  %v5552_v54 = vpop.permute.xlu1 %1805 }
 0x5a4   : > { %3827 = vmatpush3.bf16.xpose.msk.msra.mxu0 %vm4793_vm3, %v3822_v40  ;;  %v5550_v4 = vpop.permute.xlu0 %1779 }
 0x5a5   : > { %v3828_v6 = vpack.c.bf16 %v5526_v13, %v5550_v4 }
 0x5a7   : > { %3830 = vmatprep.subr.msk.bf16.mxu0 %vm4793_vm3, %v3828_v6  ;;  %v2003_v11 = vpop.permute.xlu1 %2002 }
 0x5a8   : > { %v5558_v39 = vpop.permute.xlu0 %1783  ;;  %v2051_v42 = vsel %vm986_vm2, %v2003_v11, 0.0 }
 0x5a9   : > { %v3834_v50 = vpack.c.bf16 %v5529_v8, %v5558_v39  ;;  %2052 = vadd.xlane.f32.xlu1 %v2051_v42 }
 0x5aa   : > { %3695 = vmatmul.mubr.msk.bf16.gmra.mrb[40].mxu1 %vm986_vm2, %v5513_v56 }
 0x5ab   : > { %3698 = vmatprep.mubr.msk.bf16.mxu1 %vm986_vm2, %v2173_v34  ;;  %v2005_v36 = vpop.permute.xlu1 %2004 }
 0x5ac   : > { %3833 = vmatpush3.bf16.xpose.msk.msra.mxu0 %vm4793_vm3, %v3828_v6  ;;  %v5568_v41 = vpop.permute.xlu0 %1787  ;;  %v2054_v25 = vsel %vm986_vm2, %v2005_v36, 0.0 }
 0x5ad   : > { %3836 = vmatprep.subr.msk.bf16.mxu0 %vm4793_vm3, %v3834_v50  ;;  %v3840_v63 = vpack.c.bf16 %v5532_v49, %v5568_v41 }
 0x5af   : > { %v2007_v19 = vpop.permute.xlu1 %2006 }
 0x5b0   : > { %v5572_v44 = vpop.permute.xlu0 %1791  ;;  %v2057_v45 = vsel %vm986_vm2, %v2007_v19, 0.0 }
 0x5b1   : > { %v3846_v53 = vpack.c.bf16 %v5534_v18, %v5572_v44 }
 0x5b2   : > { %3699 = vmatmul.mubr.msk.bf16.gmra.mrb[44].mxu1 %vm986_vm2, %v5516_v2 }
 0x5b3   : > { %v2011_v61 = vpop.permute.xlu1 %2010 }
 0x5b4   : > { %3839 = vmatpush3.bf16.xpose.msk.msra.mxu0 %vm4793_vm3, %v3834_v50  ;;  %v5580_v26 = vpop.permute.xlu0 %1795  ;;  %v2063_v12 = vsel %vm986_vm2, %v2011_v61, 0.0 }
 0x5b5   : > { %3842 = vmatprep.subr.msk.bf16.mxu0 %vm4793_vm3, %v3840_v63  ;;  %2064 = vadd.xlane.f32.xlu1 %v2063_v12  ;;  %v3852_v22 = vpack.c.bf16 %v5538_v16, %v5580_v26 }
 0x5b7   : > { %v2013_v56 = vpop.permute.xlu1 %2012 }
 0x5b8   : > { %v1800_v14 = vpop.permute.xlu0 %1799  ;;  %v2066_v59 = vsel %vm986_vm2, %v2013_v56, 0.0 }
 0x5b9   : > { %v3858_v3 = vpack.c.bf16 %v5540_v57, %v1800_v14 }
 0x5bb   : > { %v2015_v46 = vpop.permute.xlu1 %2014 }
 0x5bc   : > { %3845 = vmatpush3.bf16.xpose.msk.msra.mxu0 %vm4793_vm3, %v3840_v63  ;;  %v1804_v21 = vpop.permute.xlu0 %1803  ;;  %v2069_v32 = vsel %vm986_vm2, %v2015_v46, 0.0 }
 0x5bd   : > { %3848 = vmatprep.subr.msk.bf16.mxu0 %vm4793_vm3, %v3846_v53  ;;  %2070 = vadd.xlane.f32.xlu1 %v2069_v32  ;;  %v3864_v48 = vpack.c.bf16 %v5552_v54, %v1804_v21  ;;  %v6228_v32 = vld [vmem:[#allocation17_spill] sm:$0xff] }
 0x5bf   : > { %v2019_v30 = vpop.permute.xlu1 %2018 }
 0x5c0   : > { %v2001_v2 = vpop.permute.xlu0 %2000  ;;  %v2075_v29 = vsel %vm986_vm2, %v2019_v30, 0.0 }
 0x5c1   : > { %v2048_v15 = vsel %vm986_vm2, %v2001_v2, 0.0 }
 0x5c2   : > { %2049 = vadd.xlane.f32.xlu0 %v2048_v15 }
 0x5c3   : > { %v2021_v7 = vpop.permute.xlu1 %2020 }
 0x5c4   : > { %3851 = vmatpush3.bf16.xpose.msk.msra.mxu0 %vm4793_vm3, %v3846_v53  ;;  %v2009_v37 = vpop.permute.xlu0 %2008  ;;  %v2078_v1 = vsel %vm986_vm2, %v2021_v7, 0.0 }
 0x5c5   : > { %3854 = vmatprep.subr.msk.bf16.mxu0 %vm4793_vm3, %v3852_v22  ;;  %v2060_v10 = vsel %vm986_vm2, %v2009_v37, 0.0  ;;  %v6229_v37 = vld [vmem:[#allocation18_spill] sm:$0xff] }
 0x5c6   : > { %2055 = vadd.xlane.f32.xlu0 %v2054_v25 }
 0x5c7   : > { %v2023_v43 = vpop.permute.xlu1 %2022 }
 0x5c8   : > { %v2017_v28 = vpop.permute.xlu0 %2016  ;;  %v2081_v47 = vsel %vm986_vm2, %v2023_v43, 0.0 }
 0x5c9   : > { %v2072_v33 = vsel %vm986_vm2, %v2017_v28, 0.0 }
 0x5ca   : > { %2058 = vadd.xlane.f32.xlu0 %v2057_v45  ;;  %2073 = vadd.xlane.f32.xlu1 %v2072_v33  ;;  %v6230_v45 = vld [vmem:[#allocation19_spill] sm:$0xff]  ;;  %v6231_v33 = vld [vmem:[#allocation20_spill] sm:$0xff] }
 0x5cc   : > { %3857 = vmatpush3.bf16.xpose.msk.msra.mxu0 %vm4793_vm3, %v3852_v22 }
 0x5cd   : > { %3860 = vmatprep.subr.msk.bf16.mxu0 %vm4793_vm3, %v3858_v3 }
 0x5ce   : > { %2061 = vadd.xlane.f32.xlu0 %v2060_v10  ;;  %2076 = vadd.xlane.f32.xlu1 %v2075_v29 }
 0x5d2   : > { %2067 = vadd.xlane.f32.xlu0 %v2066_v59  ;;  %2079 = vadd.xlane.f32.xlu1 %v2078_v1  ;;  %v6232_v59 = vld [vmem:[#allocation21_spill] sm:$0xff] }
 0x5d4   : > { %3863 = vmatpush3.bf16.xpose.msk.msra.mxu0 %vm4793_vm3, %v3858_v3 }
 0x5d5   : > { %3866 = vmatprep.subr.msk.bf16.mxu0 %vm4793_vm3, %v3864_v48 }
 0x5d6   : > { %2082 = vadd.xlane.f32.xlu1 %v2081_v47 }
 0x5dc   : > { %3869 = vmatpush3.bf16.xpose.msk.msra.mxu0 %vm4793_vm3, %v3864_v48  ;;  %v6233_v48 = vld [vmem:[#allocation33_spill] sm:$0xff] }
 0x5e2   : > { %v5619_v52 = vpop.f32.mrb[16].mxu1 }
 0x5e3   : > { %3647 = vmatmul.mubr.msk.f32.vlgmr.msra.gmra.mrb[32].mxu0 %vm986_vm2, %v5521_v51  ;;  %v5623_v31 = vpop.f32.mrb[17].mxu1 }
 0x5e4   : > { %3649 = vmatprep.mubr.msk.f32.mxu0 %vm986_vm2, %v5550_v4  ;;  %v5627_v55 = vpop.f32.mrb[18].mxu1 }
 0x5e5   : > { %v5629_v20 = vpop.f32.mrb[19].mxu1 }
 0x5e7   : > { %3650 = vmatmul.mubr.msk.f32.gmra.mrb[34].mxu0 %vm986_vm2, %v5526_v13  ;;  %2509 = vrot.lane.b32.xlu1 %v4783_v0, %s4348_s24  ;;  %v2027_v0 = vpop.permute.xlu1 %2026 }
 0x5e8   : > { %2505 = vrot.lane.b32.xlu0 %v4773_v27, %s4348_s24  ;;  %3652 = vmatprep.mubr.msk.f32.mxu0 %vm986_vm2, %v5558_v39  ;;  %v2087_v51 = vsel %vm986_vm2, %v2027_v0, 0.0 }
 0x5eb   : > { %3653 = vmatmul.mubr.msk.f32.gmra.mrb[36].mxu0 %vm986_vm2, %v5529_v8 }
 0x5ec   : > { %2507 = vrot.lane.b32.xlu0 %v4771_v58, %s4348_s24  ;;  %3655 = vmatprep.mubr.msk.f32.mxu0 %vm986_vm2, %v5568_v41  ;;  %v2025_v58 = vpop.permute.xlu0 %2024 }
 0x5ed   : > { %v2084_v27 = vsel %vm986_vm2, %v2025_v58, 0.0  ;;  %v6234_v58 = vld [vmem:[#allocation22_spill] sm:$0xff] }
 0x5ef   : > { %3656 = vmatmul.mubr.msk.f32.gmra.mrb[38].mxu0 %vm986_vm2, %v5532_v49  ;;  %v2031_v49 = vpop.permute.xlu1 %2030 }
 0x5f0   : > { %3658 = vmatprep.mubr.msk.f32.mxu0 %vm986_vm2, %v5572_v44  ;;  %v2029_v13 = vpop.permute.xlu0 %2028  ;;  %v2093_v5 = vsel %vm986_vm2, %v2031_v49, 0.0 }
 0x5f1   : > { %v2090_v8 = vsel %vm986_vm2, %v2029_v13, 0.0 }
 0x5f3   : > { %3659 = vmatmul.mubr.msk.f32.gmra.mrb[40].mxu0 %vm986_vm2, %v5534_v18 }
 0x5f4   : > { %3661 = vmatprep.mubr.msk.f32.mxu0 %vm986_vm2, %v5580_v26 }
 0x5f7   : > { %3662 = vmatmul.mubr.msk.f32.gmra.mrb[42].mxu0 %vm986_vm2, %v5538_v16 }
 0x5f8   : > { %3664 = vmatprep.mubr.msk.f32.mxu0 %vm986_vm2, %v1800_v14 }
 0x5fb   : > { %3665 = vmatmul.mubr.msk.f32.gmra.mrb[44].mxu0 %vm986_vm2, %v5540_v57 }
 0x5fc   : > { %3667 = vmatprep.mubr.msk.f32.mxu0 %vm986_vm2, %v1804_v21 }
 0x5ff   : > { %3668 = vmatmul.mubr.msk.f32.gmra.mrb[46].mxu0 %vm986_vm2, %v5552_v54 }
 0x60b   : > { %2085 = vadd.xlane.f32.xlu0 %v2084_v27 }
 0x60f   : > { %2088 = vadd.xlane.f32.xlu0 %v2087_v51  ;;  %v6235_v51 = vld [vmem:[#allocation34_spill] sm:$0xff] }
 0x613   : > { %2091 = vadd.xlane.f32.xlu0 %v2090_v8 }
 0x617   : > { %2094 = vadd.xlane.f32.xlu0 %v2093_v5 }
 0x620   : > { %v5665_v18 = vpop.f32.mrb[20].mxu1 }
 0x621   : > { %v5667_v34 = vpop.f32.mrb[21].mxu1 }
 0x622   : > { %v5669_v16 = vpop.f32.mrb[22].mxu1 }
 0x623   : > { %v5671_v35 = vpop.f32.mrb[23].mxu1 }
 0x628   : > { %v5673_v57 = vpop.f32.mrb[24].mxu1 }
 0x629   : > { %v5675_v40 = vpop.f32.mrb[25].mxu1 }
 0x62a   : > { %v5677_v60 = vpop.f32.mrb[26].mxu1 }
 0x62b   : > { %v5679_v4 = vpop.f32.mrb[27].mxu1 }
 0x62d   : > { %2511 = vrot.lane.b32.xlu0 %v4781_v62, %s4348_s24 }
 0x636   : > { %v5683_v54 = vpop.xlane.xlu1 %2052 }
 0x637   : > { %4143 = vrsqrt.f32 %v5683_v54  ;;  %v6243_v54 = vld [vmem:[#allocation26_spill] sm:$0xff] }
 0x642   : > { %v5685_v6 = vpop.xlane.xlu1 %2064 }
 0x64a   : > { %v5689_v11 = vpop.xlane.xlu1 %2070 }
 0x64f   : > { %v5687_v39 = vpop.xlane.xlu0 %2049 }
 0x650   : > { %4145 = vrsqrt.f32 %v5687_v39 }
 0x653   : > { %v5691_v50 = vpop.xlane.xlu0 %2055 }
 0x657   : > { %v5693_v42 = vpop.xlane.xlu1 %2073  ;;  %v5695_v41 = vpop.xlane.xlu0 %2058 }
 0x658   : > { %4147 = vrsqrt.f32 %v5695_v41 }
 0x659   : > { %4149 = vrsqrt.f32 %v5691_v50 }
 0x65a   : > { %4151 = vrsqrt.f32 %v5685_v6 }
 0x65b   : > { %v5697_v36 = vpop.xlane.xlu1 %2076  ;;  %v5699_v44 = vpop.xlane.xlu0 %2061 }
 0x65c   : > { %4153 = vrsqrt.f32 %v5699_v44 }
 0x65d   : > { %4155 = vrsqrt.f32 %v5689_v11 }
 0x65f   : > { %v5701_v19 = vpop.xlane.xlu1 %2079  ;;  %v5703_v62 = vpop.xlane.xlu0 %2067 }
 0x660   : > { %4157 = vrsqrt.f32 %v5703_v62 }
 0x661   : > { %4159 = vrsqrt.f32 %v5697_v36 }
 0x662   : > { %4161 = vrsqrt.f32 %v5693_v42 }
 0x663   : > { %v2506_v63 = vpop.permute.xlu0 %2505  ;;  %v5705_v26 = vpop.xlane.xlu1 %2082 }
 0x664   : > { %3702 = vmatprep.subr.bf16.mxu0 %v2506_v63  ;;  %4163 = vrsqrt.f32 %v5705_v26 }
 0x665   : > { %3703 = vmatpush3.bf16.msra.mxu0 %v2506_v63  ;;  %v5707_v61 = vpop.f32.mrb[28].mxu1  ;;  %v6236_v63 = vld [vmem:[#allocation35_spill] sm:$0xff]  ;;  %4165 = vrsqrt.f32 %v5701_v19 }
 0x666   : > { %v5709_v12 = vpop.f32.mrb[29].mxu1 }
 0x667   : > { %6227 = vst [vmem:[#allocation7_spill] sm:$0xff] %v5709_v12  ;;  %v2508_v14 = vpop.permute.xlu0 %2507  ;;  %v5711_v56 = vpop.f32.mrb[30].mxu1 }
 0x668   : > { %3704 = vmatprep.subr.bf16.mxu0 %v2508_v14  ;;  %v5713_v53 = vpop.f32.mrb[31].mxu1  ;;  %v2510_v21 = vpop.permute.xlu1 %2509 }
 0x669   : > { %3705 = vmatpush3.bf16.msra.mxu0 %v2508_v14 }
 0x66a   : > { %3706 = vmatprep.subr.bf16.mxu0 %v2510_v21 }
 0x66d   : > { %3707 = vmatpush3.bf16.msra.mxu0 %v2510_v21  ;;  %v3688_v46 = vpop.f32.mrb[32].mxu1 }
 0x66e   : > { %v5716_v2 = vadd.f32 %v3688_v46, %v6228_v32  ;;  %v2274_v22 = vpop.f32.mrb[33].mxu1  ;;  %v6237_v46 = vld [vmem:[#allocation36_spill] sm:$0xff] }
 0x66f   : > { %v3689_v15 = vpop.f32.mrb[34].mxu1  ;;  %v5723_v28 = vadd.f32 %v2274_v22, %v6230_v45 }
 0x670   : > { %v2277_v25 = vpop.f32.mrb[35].mxu1  ;;  %2341 = vmax.xlane.f32.xlu0 %v5716_v2  ;;  %v5728_v7 = vadd.f32 %v3689_v15, %v6231_v33 }
 0x671   : > { %v5720_v30 = vadd.f32 %v2277_v25, %v6229_v37  ;;  %v6238_v37 = vld [vmem:[#allocation23_spill] sm:$0xff] }
 0x673   : > { %2339 = vmax.xlane.f32.xlu1 %v5720_v30 }
 0x674   : > { %2337 = vmax.xlane.f32.xlu0 %v5723_v28 }
 0x675   : > { %v3692_v3 = vpop.f32.mrb[36].mxu1 }
 0x676   : > { %v2290_v10 = vpop.f32.mrb[37].mxu1  ;;  %v5735_v47 = vadd.f32 %v3692_v3, %v6233_v48  ;;  %v6239_v3 = vld [vmem:[#allocation37_spill] sm:$0xff] }
 0x677   : > { %v3693_v29 = vpop.f32.mrb[38].mxu1  ;;  %v5743_v13 = vadd.f32 %v2290_v10, %v6235_v51  ;;  %v6240_v10 = vld [vmem:[#allocation38_spill] sm:$0xff] }
 0x678   : > { %v5731_v1 = vadd.f32 %v3693_v29, %v6232_v59  ;;  %v2293_v43 = vpop.f32.mrb[39].mxu1  ;;  %2343 = vmax.xlane.f32.xlu0 %v5728_v7  ;;  %v6241_v59 = vld [vmem:[#allocation25_spill] sm:$0xff] }
 0x679   : > { %v5739_v27 = vadd.f32 %v2293_v43, %v6234_v58 }
 0x67a   : > { %2351 = vmax.xlane.f32.xlu1 %v5731_v1 }
 0x67c   : > { %2349 = vmax.xlane.f32.xlu0 %v5735_v47 }
 0x67d   : > { %v3696_v0 = vpop.f32.mrb[40].mxu1 }
 0x67e   : > { %v2306_v8 = vpop.f32.mrb[41].mxu1  ;;  %2347 = vmax.xlane.f32.xlu1 %v5739_v27  ;;  %v5748_v14 = vadd.f32 %v3696_v0, %v6236_v63  ;;  %v4144_v63 = vpop.eup %4143 }
 0x67f   : > { %v3697_v49 = vpop.f32.mrb[42].mxu1  ;;  %v5752_v32 = vadd.f32 %v2306_v8, %v6237_v46 }
 0x680   : > { %v2309_v5 = vpop.f32.mrb[43].mxu1  ;;  %2345 = vmax.xlane.f32.xlu0 %v5743_v13  ;;  %v5756_v45 = vadd.f32 %v3697_v49, %v6238_v37 }
 0x684   : > { %2357 = vmax.xlane.f32.xlu0 %v5748_v14 }
 0x685   : > { %v3700_v21 = vpop.f32.mrb[44].mxu1 }
 0x686   : > { %v2322_v22 = vpop.f32.mrb[45].mxu1  ;;  %v5760_v33 = vadd.f32 %v3700_v21, %v6239_v3  ;;  %v4146_v21 = vpop.eup %4145 }
 0x687   : > { %v3701_v15 = vpop.f32.mrb[46].mxu1  ;;  %v5766_v29 = vadd.f32 %v2322_v22, %v6240_v10  ;;  %v4148_v6 = vpop.eup %4147 }
 0x688   : > { %v2325_v25 = vpop.f32.mrb[47].mxu1  ;;  %2353 = vmax.xlane.f32.xlu0 %v5752_v32  ;;  %v5770_v43 = vadd.f32 %v3701_v15, %v6241_v59 }
 0x689   : > { %v5787_v39 = vadd.f32 %v2325_v25, %v6243_v54 }
 0x68c   : > { %2359 = vmax.xlane.f32.xlu0 %v5756_v45 }
 0x68f   : > { %2513 = vrot.lane.b32.xlu1 %v4799_v9, %s4348_s24  ;;  %v6242_v9 = vld [vmem:[#allocation24_spill] sm:$0xff] }
 0x690   : > { %2365 = vmax.xlane.f32.xlu0 %v5760_v33  ;;  %v5780_v49 = vadd.f32 %v2309_v5, %v6242_v9  ;;  %v4150_v5 = vpop.eup %4149 }
 0x691   : > { %v4152_v25 = vpop.eup %4151 }
 0x692   : > { %v4154_v3 = vpop.eup %4153 }
 0x693   : > { %v4156_v36 = vpop.eup %4155 }
 0x694   : > { %2361 = vmax.xlane.f32.xlu0 %v5766_v29 }
 0x698   : > { %v2086_v48 = vpop.xlane.xlu0 %2085  ;;  %2367 = vmax.xlane.f32.xlu0 %v5770_v43 }
 0x69c   : > { %v2089_v58 = vpop.xlane.xlu0 %2088 }
 0x69d   : > { %4167 = vrsqrt.f32 %v2089_v58 }
 0x69e   : > { %4169 = vrsqrt.f32 %v2086_v48 }
 0x6a0   : > { %v2092_v0 = vpop.xlane.xlu0 %2091 }
 0x6a4   : > { %v2095_v51 = vpop.xlane.xlu0 %2094 }
 0x6a5   : > { %4171 = vrsqrt.f32 %v2095_v51 }
 0x6a6   : > { %4173 = vrsqrt.f32 %v2092_v0 }
 0x6a8   : > { %v2512_v8 = vpop.permute.xlu0 %2511 }
 0x6a9   : > { %3708 = vmatprep.subr.bf16.mxu0 %v2512_v8 }
 0x6aa   : > { %3709 = vmatpush3.bf16.msra.mxu0 %v2512_v8  ;;  %v4158_v8 = vpop.eup %4157 }
 0x6ab   : > { %v4160_v54 = vpop.eup %4159 }
 0x6ac   : > { %v4162_v26 = vpop.eup %4161 }
 0x6ae   : > { %2515 = vrot.lane.b32.xlu0 %v4797_v38, %s4348_s24 }
 0x6b3   : > { %2355 = vmax.xlane.f32.xlu1 %v5780_v49 }
 0x6b6   : > { %v3648_v38 = vpop.f32.mrb[32].mxu0 }
 0x6b7   : > { %v5789_v41 = vmul.f32 %v4144_v63, %v3648_v38  ;;  %v1905_v50 = vpop.f32.mrb[33].mxu0  ;;  %2363 = vmax.xlane.f32.xlu1 %v5787_v39 }
 0x6b8   : > { %v5791_v46 = vmul.f32 %v4146_v21, %v1905_v50 }
 0x6ba   : > { %v3651_v44 = vpop.f32.mrb[34].mxu0 }
 0x6bb   : > { %v5797_v11 = vmul.f32 %v4148_v6, %v3651_v44  ;;  %v1915_v22 = vpop.f32.mrb[35].mxu0  ;;  %v4164_v6 = vpop.eup %4163 }
 0x6bc   : > { %v5799_v15 = vmul.f32 %v4150_v5, %v1915_v22  ;;  %v4166_v58 = vpop.eup %4165 }
 0x6be   : > { %v3654_v37 = vpop.f32.mrb[36].mxu0 }
 0x6bf   : > { %v5803_v62 = vmul.f32 %v4152_v25, %v3654_v37  ;;  %v1925_v10 = vpop.f32.mrb[37].mxu0  ;;  %v4168_v25 = vpop.eup %4167 }
 0x6c0   : > { %v5805_v59 = vmul.f32 %v4154_v3, %v1925_v10  ;;  %v4170_v51 = vpop.eup %4169 }
 0x6c2   : > { %v3657_v42 = vpop.f32.mrb[38].mxu0 }
 0x6c3   : > { %v5807_v9 = vmul.f32 %v4156_v36, %v3657_v42  ;;  %v1935_v63 = vpop.f32.mrb[39].mxu0  ;;  %v4172_v36 = vpop.eup %4171 }
 0x6c4   : > { %v5809_v38 = vmul.f32 %v4158_v8, %v1935_v63  ;;  %v4174_v8 = vpop.eup %4173 }
 0x6c6   : > { %v3660_v21 = vpop.f32.mrb[40].mxu0 }
 0x6c7   : > { %v5811_v19 = vmul.f32 %v4160_v54, %v3660_v21  ;;  %v1945_v50 = vpop.f32.mrb[41].mxu0 }
 0x6c8   : > { %v5813_v44 = vmul.f32 %v4162_v26, %v1945_v50  ;;  %2517 = vrot.lane.b32.xlu1 %v4813_v24, %s4348_s24 }
 0x6ca   : > { %v3663_v48 = vpop.f32.mrb[42].mxu0 }
 0x6cb   : > { %v5817_v5 = vmul.f32 %v4164_v6, %v3663_v48  ;;  %v1955_v22 = vpop.f32.mrb[43].mxu0 }
 0x6cc   : > { %v5819_v37 = vmul.f32 %v4166_v58, %v1955_v22 }
 0x6ce   : > { %v3666_v3 = vpop.f32.mrb[44].mxu0 }
 0x6cf   : > { %v5821_v0 = vmul.f32 %v4168_v25, %v3666_v3  ;;  %v1965_v10 = vpop.f32.mrb[45].mxu0 }
 0x6d0   : > { %v5823_v42 = vmul.f32 %v4170_v51, %v1965_v10 }
 0x6d2   : > { %v3669_v63 = vpop.f32.mrb[46].mxu0 }
 0x6d3   : > { %v5825_v54 = vmul.f32 %v4172_v36, %v3669_v63  ;;  %v1975_v24 = vpop.f32.mrb[47].mxu0 }
 0x6d4   : > { %v5827_v26 = vmul.f32 %v4174_v8, %v1975_v24 }
 0x6fd   : > { %v2342_v21 = vpop.xlane.xlu0 %2341 }
 0x6fe   : > { %v2371_v50 = vsub.f32 %v5716_v2, %v2342_v21 }
 0x700   : > { %v2389_v6 = vmul.f32 1.442695, %v2371_v50  ;;  %v2340_v22 = vpop.xlane.xlu1 %2339 }
 0x701   : > { %v2338_v58 = vpop.xlane.xlu0 %2337  ;;  %v2370_v51 = vsub.f32 %v5720_v30, %v2340_v22 }
 0x702   : > { %4175 = vpow2.f32 %v2389_v6  ;;  %v2369_v48 = vsub.f32 %v5723_v28, %v2338_v58 }
 0x703   : > { %v2387_v12 = vmul.f32 1.442695, %v2370_v51 }
 0x704   : > { %v2385_v25 = vmul.f32 1.442695, %v2369_v48 }
 0x705   : > { %v2344_v3 = vpop.xlane.xlu0 %2343 }
 0x706   : > { %4177 = vpow2.f32 %v2385_v25  ;;  %v2372_v10 = vsub.f32 %v5728_v7, %v2344_v3 }
 0x707   : > { %v2352_v36 = vpop.xlane.xlu1 %2351 }
 0x708   : > { %v2391_v63 = vmul.f32 1.442695, %v2372_v10  ;;  %v2376_v8 = vsub.f32 %v5731_v1, %v2352_v36 }
 0x709   : > { %v2350_v24 = vpop.xlane.xlu0 %2349 }
 0x70a   : > { %4179 = vpow2.f32 %v2391_v63  ;;  %v2399_v2 = vmul.f32 1.442695, %v2376_v8  ;;  %v2375_v21 = vsub.f32 %v5735_v47, %v2350_v24 }
 0x70b   : > { %v2348_v50 = vpop.xlane.xlu1 %2347 }
 0x70c   : > { %v5835_v28 = vpop.eup %4175  ;;  %4181 = vpow2.f32 %v2399_v2  ;;  %v2374_v6 = vsub.f32 %v5739_v27, %v2348_v50  ;;  %v2397_v7 = vmul.f32 1.442695, %v2375_v21 }
 0x70d   : > { %2421 = vadd.xlane.f32.xlu1 %v5835_v28  ;;  %v2346_v30 = vpop.xlane.xlu0 %2345  ;;  %4183 = vpow2.f32 %v2387_v12 }
 0x70e   : > { %v2395_v58 = vmul.f32 1.442695, %v2374_v6  ;;  %v2373_v1 = vsub.f32 %v5743_v13, %v2346_v30 }
 0x70f   : > { %v2514_v48 = vpop.permute.xlu1 %2513 }
 0x710   : > { %v5840_v22 = vpop.eup %4177  ;;  %4185 = vpow2.f32 %v2395_v58  ;;  %3710 = vmatprep.subr.bf16.mxu0 %v2514_v48  ;;  %v2393_v47 = vmul.f32 1.442695, %v2373_v1 }
 0x711   : > { %3711 = vmatpush3.bf16.msra.mxu0 %v2514_v48  ;;  %2417 = vadd.xlane.f32.xlu0 %v5840_v22  ;;  %v2358_v25 = vpop.xlane.xlu0 %2357  ;;  %4187 = vpow2.f32 %v2397_v7 }
 0x712   : > { %v2379_v27 = vsub.f32 %v5748_v14, %v2358_v25  ;;  %4189 = vpow2.f32 %v2393_v47 }
 0x714   : > { %v5844_v3 = vpop.eup %4179  ;;  %v2405_v12 = vmul.f32 1.442695, %v2379_v27 }
 0x715   : > { %2423 = vadd.xlane.f32.xlu1 %v5844_v3  ;;  %v2354_v13 = vpop.xlane.xlu0 %2353 }
 0x716   : > { %v5847_v51 = vpop.eup %4181  ;;  %4191 = vpow2.f32 %v2405_v12  ;;  %v2377_v10 = vsub.f32 %v5752_v32, %v2354_v13 }
 0x717   : > { %2431 = vadd.xlane.f32.xlu0 %v5847_v51  ;;  %v5851_v36 = vpop.eup %4183 }
 0x718   : > { %v2401_v63 = vmul.f32 1.442695, %v2377_v10 }
 0x719   : > { %2419 = vadd.xlane.f32.xlu1 %v5851_v36  ;;  %v2360_v14 = vpop.xlane.xlu0 %2359 }
 0x71a   : > { %v5854_v8 = vpop.eup %4185  ;;  %4193 = vpow2.f32 %v2401_v63  ;;  %v2380_v24 = vsub.f32 %v5756_v45, %v2360_v14 }
 0x71b   : > { %2427 = vadd.xlane.f32.xlu0 %v5854_v8  ;;  %v5858_v2 = vpop.eup %4187 }
 0x71c   : > { %v2407_v21 = vmul.f32 1.442695, %v2380_v24  ;;  %v5862_v6 = vpop.eup %4189 }
 0x71d   : > { %2429 = vadd.xlane.f32.xlu1 %v5858_v2  ;;  %v2366_v32 = vpop.xlane.xlu0 %2365 }
 0x71e   : > { %4195 = vpow2.f32 %v2407_v21  ;;  %v2383_v50 = vsub.f32 %v5760_v33, %v2366_v32 }
 0x720   : > { %v5864_v30 = vpop.eup %4191  ;;  %v2413_v7 = vmul.f32 1.442695, %v2383_v50 }
 0x721   : > { %2425 = vadd.xlane.f32.xlu1 %v5862_v6  ;;  %2437 = vadd.xlane.f32.xlu0 %v5864_v30  ;;  %v2362_v45 = vpop.xlane.xlu0 %2361 }
 0x722   : > { %4197 = vpow2.f32 %v2413_v7  ;;  %v2381_v27 = vsub.f32 %v5766_v29, %v2362_v45  ;;  %v2131_v45 = vmul.f32 %v5797_v11, %v5349_v17  ;;  %v2135_v11 = vmul.f32 %v5807_v9, %v5349_v17 }
 0x723   : > { %v2132_v9 = vmul.f32 %v5805_v59, %v5349_v17 }
 0x724   : > { %v5868_v58 = vpop.eup %4193  ;;  %v2409_v63 = vmul.f32 1.442695, %v2381_v27 }
 0x725   : > { %2433 = vadd.xlane.f32.xlu1 %v5868_v58  ;;  %v2368_v1 = vpop.xlane.xlu0 %2367 }
 0x726   : > { %v2384_v21 = vsub.f32 %v5770_v43, %v2368_v1  ;;  %v2130_v1 = vmul.f32 %v5799_v15, %v5349_v17 }
 0x728   : > { %v5871_v48 = vpop.eup %4195  ;;  %v2415_v50 = vmul.f32 1.442695, %v2384_v21 }
 0x729   : > { %2439 = vadd.xlane.f32.xlu1 %v5871_v48  ;;  %v2516_v33 = vpop.permute.xlu0 %2515 }
 0x72a   : > { %3712 = vmatprep.subr.bf16.mxu0 %v2516_v33 }
 0x72b   : > { %3713 = vmatpush3.bf16.msra.mxu0 %v2516_v33 }
 0x72c   : > { %v5874_v47 = vpop.eup %4197 }
 0x72d   : > { %2445 = vadd.xlane.f32.xlu0 %v5874_v47 }
 0x740   : > { %v2356_v25 = vpop.xlane.xlu1 %2355 }
 0x741   : > { %v2378_v12 = vsub.f32 %v5780_v49, %v2356_v25  ;;  %v2129_v25 = vmul.f32 %v5789_v41, %v5349_v17 }
 0x743   : > { %v2403_v13 = vmul.f32 1.442695, %v2378_v12  ;;  %2519 = vrot.lane.b32.xlu0 %v4811_v23, %s4348_s24  ;;  %v2128_v12 = vmul.f32 %v5791_v46, %v5349_v17  ;;  %v2133_v46 = vmul.f32 %v5803_v62, %v5349_v17 }
 0x744   : > { %v2364_v10 = vpop.xlane.xlu1 %2363 }
 0x745   : > { %4199 = vpow2.f32 %v2403_v13  ;;  %v2382_v14 = vsub.f32 %v5787_v39, %v2364_v10 }
 0x746   : > { %4201 = vpow2.f32 %v2409_v63  ;;  %v2134_v63 = vmul.f32 %v5809_v38, %v5349_v17 }
 0x747   : > { %v2411_v32 = vmul.f32 1.442695, %v2382_v14 }
 0x748   : > { %v2518_v24 = vpop.permute.xlu1 %2517 }
 0x749   : > { %3714 = vmatprep.subr.bf16.mxu0 %v2518_v24  ;;  %4203 = vpow2.f32 %v2411_v32 }
 0x74a   : > { %3715 = vmatpush3.bf16.msra.mxu0 %v2518_v24  ;;  %4205 = vpow2.f32 %v2415_v50 }
 0x74f   : > { %v5883_v29 = vpop.eup %4199 }
 0x750   : > { %2435 = vadd.xlane.f32.xlu1 %v5883_v29  ;;  %v5886_v23 = vpop.eup %4201 }
 0x753   : > { %v5889_v49 = vpop.eup %4203 }
 0x754   : > { %2441 = vadd.xlane.f32.xlu1 %v5886_v23  ;;  %v5892_v39 = vpop.eup %4205 }
 0x758   : > { %2443 = vadd.xlane.f32.xlu1 %v5889_v49 }
 0x75c   : > { %2447 = vadd.xlane.f32.xlu1 %v5892_v39 }
 0x79a   : > { %v2422_v43 = vpop.xlane.xlu1 %2421 }
 0x79b   : > { %4207 = vrcp.f32 %v2422_v43 }
 0x79e   : > { %v2418_v7 = vpop.xlane.xlu0 %2417 }
 0x79f   : > { %4209 = vrcp.f32 %v2418_v7 }
 0x7a2   : > { %v2424_v33 = vpop.xlane.xlu1 %2423 }
 0x7a3   : > { %4211 = vrcp.f32 %v2424_v33 }
 0x7a4   : > { %4213 = vtanh.f32 %v2131_v45  ;;  %v2432_v27 = vpop.xlane.xlu0 %2431 }
 0x7a5   : > { %4215 = vtanh.f32 %v2130_v1  ;;  %v4208_v10 = vpop.eup %4207 }
 0x7a6   : > { %4217 = vrcp.f32 %v2432_v27  ;;  %v2420_v13 = vpop.xlane.xlu1 %2419  ;;  %v2467_v24 = vmul.f32 %v4208_v10, %v5835_v28 }
 0x7a7   : > { %4219 = vrcp.f32 %v2420_v13 }
 0x7a8   : > { %4221 = vtanh.f32 %v2129_v25  ;;  %v2428_v15 = vpop.xlane.xlu0 %2427 }
 0x7a9   : > { %4223 = vtanh.f32 %v2128_v12  ;;  %v4210_v14 = vpop.eup %4209 }
 0x7aa   : > { %4225 = vrcp.f32 %v2428_v15  ;;  %v2430_v41 = vpop.xlane.xlu1 %2429  ;;  %v2465_v62 = vmul.f32 %v4210_v14, %v5840_v22  ;;  %v2138_v22 = vmul.f32 %v5819_v37, %v5349_v17 }
 0x7ab   : > { %4227 = vrcp.f32 %v2430_v41 }
 0x7ac   : > { %4229 = vtanh.f32 %v2135_v11  ;;  %v2139_v11 = vmul.f32 %v5817_v5, %v5349_v17 }
 0x7ad   : > { %v4212_v21 = vpop.eup %4211  ;;  %4231 = vtanh.f32 %v2134_v63 }
 0x7ae   : > { %v4214_v32 = vpop.eup %4213  ;;  %v2468_v50 = vmul.f32 %v4212_v21, %v5844_v3  ;;  %v2426_v43 = vpop.xlane.xlu1 %2425 }
 0x7af   : > { %v4216_v38 = vpop.eup %4215  ;;  %4233 = vrcp.f32 %v2426_v43  ;;  %v2438_v33 = vpop.xlane.xlu0 %2437 }
 0x7b0   : > { %v4218_v7 = vpop.eup %4217  ;;  %4235 = vtanh.f32 %v2133_v46  ;;  %v2483_v45 = vmul.f32 %v4216_v38, %v2467_v24  ;;  %v2484_v1 = vmul.f32 %v4214_v32, %v2468_v50 }
 0x7b1   : > { %v4220_v25 = vpop.eup %4219  ;;  %4237 = vtanh.f32 %v2132_v9  ;;  %v2472_v63 = vmul.f32 %v4218_v7, %v5847_v51 }
 0x7b2   : > { %v4222_v28 = vpop.eup %4221  ;;  %v2434_v27 = vpop.xlane.xlu1 %2433  ;;  %v2466_v59 = vmul.f32 %v4220_v25, %v5851_v36  ;;  %v2498_v12 = vpack.c.bf16 %v2484_v1, %v2483_v45  ;;  %4239 = vrcp.f32 %v2438_v33 }
 0x7b3   : > { %v4224_v13 = vpop.eup %4223 }
 0x7b4   : > { %v4226_v3 = vpop.eup %4225  ;;  %v2481_v15 = vmul.f32 %v4224_v13, %v2465_v62  ;;  %v2482_v10 = vmul.f32 %v4222_v28, %v2466_v59 }
 0x7b5   : > { %v4228_v41 = vpop.eup %4227  ;;  %v2470_v9 = vmul.f32 %v4226_v3, %v5854_v8 }
 0x7b6   : > { %v4230_v14 = vpop.eup %4229  ;;  %v2440_v46 = vpop.xlane.xlu1 %2439  ;;  %v2497_v24 = vpack.c.bf16 %v2482_v10, %v2481_v15  ;;  %v2471_v36 = vmul.f32 %v4228_v41, %v5858_v2  ;;  %v2137_v15 = vmul.f32 %v5811_v19, %v5349_v17  ;;  %v2136_v10 = vmul.f32 %v5813_v44, %v5349_v17 }
 0x7b7   : > { %v4232_v21 = vpop.eup %4231  ;;  %4241 = vrcp.f32 %v2440_v46  ;;  %v2488_v32 = vmul.f32 %v4230_v14, %v2472_v63  ;;  %v2140_v41 = vmul.f32 %v5823_v42, %v5349_v17  ;;  %v2143_v19 = vmul.f32 %v5825_v54, %v5349_v17 }
 0x7b8   : > { %4243 = vtanh.f32 %v2139_v11  ;;  %3718 = vmatprep.mubr.bf16.mxu0 %v2497_v24  ;;  %v2487_v5 = vmul.f32 %v4232_v21, %v2471_v36  ;;  %v2142_v14 = vmul.f32 %v5827_v26, %v5349_v17 }
 0x7b9   : > { %v4234_v50 = vpop.eup %4233  ;;  %4245 = vtanh.f32 %v2138_v22 }
 0x7ba   : > { %v4236_v51 = vpop.eup %4235  ;;  %v2446_v43 = vpop.xlane.xlu0 %2445  ;;  %v2469_v38 = vmul.f32 %v4234_v50, %v5862_v6  ;;  %v2500_v37 = vpack.c.bf16 %v2488_v32, %v2487_v5  ;;  %4247 = vrcp.f32 %v2434_v27 }
 0x7bb   : > { %v4238_v7 = vpop.eup %4237  ;;  %v2486_v1 = vmul.f32 %v4236_v51, %v2470_v9 }
 0x7bc   : > { %v2485_v45 = vmul.f32 %v4238_v7, %v2469_v38  ;;  %v4240_v33 = vpop.eup %4239 }
 0x7bd   : > { %v2475_v25 = vmul.f32 %v4240_v33, %v5864_v30 }
 0x7be   : > { %v2520_v2 = vpop.permute.xlu0 %2519  ;;  %v2499_v62 = vpack.c.bf16 %v2486_v1, %v2485_v45 }
 0x7bf   : > { %3716 = vmatprep.subr.bf16.mxu0 %v2520_v2 }
 0x7c0   : > { %3717 = vmatpush3.bf16.msra.mxu0 %v2520_v2 }
 0x7c1   : > { %v4242_v8 = vpop.eup %4241 }
 0x7c2   : > { %v4244_v28 = vpop.eup %4243  ;;  %v2476_v59 = vmul.f32 %v4242_v8, %v5871_v48  ;;  %v2141_v48 = vmul.f32 %v5821_v0, %v5349_v17 }
 0x7c3   : > { %v4246_v13 = vpop.eup %4245  ;;  %3719 = vmatmul.mubr.bf16.vlgmr.msra.gmra.mrb[48].mxu0 %v2498_v12 }
 0x7c4   : > { %3722 = vmatprep.mubr.bf16.mxu0 %v2499_v62  ;;  %v2491_v3 = vmul.f32 %v4246_v13, %v2475_v25  ;;  %v2492_v6 = vmul.f32 %v4244_v28, %v2476_v59  ;;  %v4248_v12 = vpop.eup %4247  ;;  %v3977_v62 = vld [vmem:[%s4456_s15] sm:$0xff]  }
 0x7c5   : > { %v2473_v44 = vmul.f32 %v4248_v12, %v5868_v58  ;;  %3734 = vmatprep.subr.bf16.mxu1 %v3977_v62 }
 0x7c6   : > { %v2502_v11 = vpack.c.bf16 %v2492_v6, %v2491_v3  ;;  %3735 = vmatpush3.bf16.msra.mxu1 %v3977_v62 }
 0x7cb   : > { %3723 = vmatmul.mubr.bf16.gmra.mrb[52].mxu0 %v2500_v37 }
 0x7dd   : > { %v2436_v63 = vpop.xlane.xlu1 %2435 }
 0x7de   : > { %4249 = vrcp.f32 %v2436_v63 }
 0x7df   : > { %4251 = vtanh.f32 %v2137_v15 }
 0x7e0   : > { %4253 = vtanh.f32 %v2136_v10 }
 0x7e1   : > { %v2442_v30 = vpop.xlane.xlu1 %2441 }
 0x7e2   : > { %4255 = vrcp.f32 %v2442_v30 }
 0x7e3   : > { %4257 = vrcp.f32 %v2446_v43 }
 0x7e5   : > { %v2444_v27 = vpop.xlane.xlu1 %2443 }
 0x7e6   : > { %4259 = vrcp.f32 %v2444_v27 }
 0x7e7   : > { %4261 = vtanh.f32 %v2141_v48 }
 0x7e8   : > { %v4250_v22 = vpop.eup %4249  ;;  %4263 = vtanh.f32 %v2140_v41 }
 0x7e9   : > { %v4252_v46 = vpop.eup %4251  ;;  %v2448_v0 = vpop.xlane.xlu1 %2447  ;;  %v2474_v24 = vmul.f32 %v4250_v22, %v5883_v29 }
 0x7ea   : > { %v4254_v36 = vpop.eup %4253  ;;  %4265 = vrcp.f32 %v2448_v0 }
 0x7eb   : > { %4267 = vtanh.f32 %v2143_v19  ;;  %v2489_v42 = vmul.f32 %v4254_v36, %v2473_v44  ;;  %v2490_v21 = vmul.f32 %v4252_v46, %v2474_v24 }
 0x7ec   : > { %v4256_v9 = vpop.eup %4255  ;;  %4269 = vtanh.f32 %v2142_v14 }
 0x7ed   : > { %v2501_v5 = vpack.c.bf16 %v2490_v21, %v2489_v42  ;;  %v4258_v54 = vpop.eup %4257  ;;  %v2477_v58 = vmul.f32 %v4256_v9, %v5886_v23 }
 0x7ee   : > { %v2479_v43 = vmul.f32 %v4258_v54, %v5874_v47 }
 0x7ef   : > { %3726 = vmatprep.mubr.bf16.mxu0 %v2501_v5 }
 0x7f0   : > { %v4260_v32 = vpop.eup %4259  ;;  %3727 = vmatmul.mubr.bf16.gmra.mrb[56].mxu0 %v2502_v11 }
 0x7f1   : > { %v4262_v50 = vpop.eup %4261  ;;  %v2478_v17 = vmul.f32 %v4260_v32, %v5889_v49  ;;  %v3978_v49 = vld [vmem:[%s4456_s15 + $0x8] sm:$0xff]  }
 0x7f2   : > { %v4264_v26 = vpop.eup %4263  ;;  %3736 = vmatprep.subr.bf16.mxu1 %v3978_v49 }
 0x7f3   : > { %v2493_v29 = vmul.f32 %v4264_v26, %v2477_v58  ;;  %v2494_v51 = vmul.f32 %v4262_v50, %v2478_v17  ;;  %3737 = vmatpush3.bf16.msra.mxu1 %v3978_v49 }
 0x7f4   : > { %v4266_v38 = vpop.eup %4265 }
 0x7f5   : > { %v4268_v37 = vpop.eup %4267  ;;  %v2503_v7 = vpack.c.bf16 %v2494_v51, %v2493_v29  ;;  %v2480_v45 = vmul.f32 %v4266_v38, %v5892_v39 }
 0x7f6   : > { %v4270_v1 = vpop.eup %4269 }
 0x7f7   : > { %3730 = vmatprep.mubr.bf16.mxu0 %v2503_v7  ;;  %v2495_v23 = vmul.f32 %v4270_v1, %v2479_v43  ;;  %v2496_v33 = vmul.f32 %v4268_v37, %v2480_v45 }
 0x7f9   : > { %v2504_v2 = vpack.c.bf16 %v2496_v33, %v2495_v23 }
 0x7fb   : > { %3731 = vmatmul.mubr.bf16.gmra.mrb[60].mxu0 %v2504_v2 }
 0x896   : > { %v3720_v25 = vpop.f32.mrb[48].mxu0 }
 0x897   : > { %v2563_v8 = vpop.f32.mrb[49].mxu0 }
 0x898   : > { %v3721_v47 = vpop.f32.mrb[50].mxu0 }
 0x899   : > { %v3940_v28 = vpack.i.bf16 %v3721_v47, %v3720_v25  ;;  %v2566_v59 = vpop.f32.mrb[51].mxu0 }
 0x89a   : > { %v3935_v13 = vpack.i.bf16 %v2566_v59, %v2563_v8 }
 0x89b   : > { %3941 = vrot.lane.b32.xlu0 %v3940_v28, %s4349_s29 }
 0x89c   : > { %3936 = vrot.lane.b32.xlu1 %v3935_v13, %s4349_s29 }
 0x89e   : > { %v3724_v39 = vpop.f32.mrb[52].mxu0 }
 0x89f   : > { %v2579_v3 = vpop.f32.mrb[53].mxu0 }
 0x8a0   : > { %v3725_v6 = vpop.f32.mrb[54].mxu0 }
 0x8a1   : > { %v3950_v11 = vpack.i.bf16 %v3725_v6, %v3724_v39  ;;  %v2582_v15 = vpop.f32.mrb[55].mxu0 }
 0x8a2   : > { %v3945_v10 = vpack.i.bf16 %v2582_v15, %v2579_v3 }
 0x8a4   : > { %3946 = vrot.lane.b32.xlu0 %v3945_v10, %s4349_s29 }
 0x8a8   : > { %3951 = vrot.lane.b32.xlu0 %v3950_v11, %s4349_s29  ;;  %v6244_v11 = vld [vmem:[#allocation7_spill] sm:$0xff] }
 0x8c3   : > { %v3728_v63 = vpop.f32.mrb[56].mxu0 }
 0x8c4   : > { %v2595_v30 = vpop.f32.mrb[57].mxu0 }
 0x8c5   : > { %v3729_v48 = vpop.f32.mrb[58].mxu0 }
 0x8c6   : > { %v3960_v12 = vpack.i.bf16 %v3729_v48, %v3728_v63  ;;  %v2598_v41 = vpop.f32.mrb[59].mxu0  ;;  %v3979_v63 = vld [vmem:[%s4461_s13] sm:$0xff]   ;;  %v4287_v48 = vld [vmem:[%s4470_s26 + $0x18] sm:$0xff] }
 0x8c7   : > { %v3955_v27 = vpack.i.bf16 %v2598_v41, %v2595_v30  ;;  %3754 = vmatprep.subr.bf16.mxu0 %v3979_v63 }
 0x8c8   : > { %3961 = vrot.lane.b32.xlu1 %v3960_v12, %s4349_s29  ;;  %3755 = vmatpush3.bf16.msra.mxu0 %v3979_v63 }
 0x8c9   : > { %3956 = vrot.lane.b32.xlu0 %v3955_v27, %s4349_s29  ;;  %v4288_v27 = vld [vmem:[%s4470_s26] sm:$0xff] }
 0x8ce   : > { %v3732_v19 = vpop.f32.mrb[60].mxu0 }
 0x8cf   : > { %v2611_v44 = vpop.f32.mrb[61].mxu0 }
 0x8d0   : > { %v3733_v22 = vpop.f32.mrb[62].mxu0 }
 0x8d1   : > { %v3970_v14 = vpack.i.bf16 %v3733_v22, %v3732_v19  ;;  %v2614_v46 = vpop.f32.mrb[63].mxu0 }
 0x8d2   : > { %v3965_v0 = vpack.i.bf16 %v2614_v46, %v2611_v44  ;;  %v4289_v44 = vld [vmem:[%s4470_s26 + $0x8] sm:$0xff] }
 0x8d3   : > { %3971 = vrot.lane.b32.xlu1 %v3970_v14, %s4349_s29  ;;  %v4290_v14 = vld [vmem:[%s4470_s26 + $0x10] sm:$0xff] }
 0x8d4   : > { %3966 = vrot.lane.b32.xlu0 %v3965_v0, %s4349_s29 }
 0x90d   : > { %v3942_v24 = vpop.permute.xlu0 %3941 }
 0x90e   : > { %v3944_v36 = vunpack.i.h.bf16 %v3942_v24  ;;  %v3943_v42 = vunpack.i.l.bf16 %v3942_v24  ;;  %v3937_v21 = vpop.permute.xlu1 %3936 }
 0x90f   : > { %v3939_v9 = vunpack.i.h.bf16 %v3937_v21  ;;  %v3938_v5 = vunpack.i.l.bf16 %v3937_v21 }
 0x910   : > { %v2693_v54 = vsel %vm986_vm2, %v5627_v55, %v3944_v36  ;;  %v2692_v58 = vsel %vm986_vm2, %v5619_v52, %v3943_v42 }
 0x911   : > { %v2707_v32 = vpack.c.bf16 %v2693_v54, %v2692_v58  ;;  %v2691_v50 = vsel %vm986_vm2, %v5629_v20, %v3939_v9  ;;  %v2690_v17 = vsel %vm986_vm2, %v5623_v31, %v3938_v5  ;;  %v4291_v9 = vld [vmem:[%s4470_s26 + $0x38] sm:$0xff]  ;;  %v4292_v58 = vld [vmem:[%s4470_s26 + $0x20] sm:$0xff] }
 0x912   : > { %v2706_v26 = vpack.c.bf16 %v2691_v50, %v2690_v17  ;;  %v4293_v50 = vld [vmem:[%s4470_s26 + $0x28] sm:$0xff] }
 0x914   : > { %3738 = vmatprep.mubr.msk.bf16.mxu1 %vm587_vm1, %v2706_v26  ;;  %v4294_v26 = vld [vmem:[%s4470_s26 + $0x30] sm:$0xff] }
 0x915   : > { %3739 = vmatmul.mubr.msk.bf16.vlgmr.msra.gmra.mrb[48].mxu1 %vm587_vm1, %v2707_v32 }
 0x916   : > { %v3947_v29 = vpop.permute.xlu0 %3946 }
 0x917   : > { %v3949_v51 = vunpack.i.h.bf16 %v3947_v29  ;;  %v3948_v43 = vunpack.i.l.bf16 %v3947_v29 }
 0x919   : > { %v2695_v55 = vsel %vm986_vm2, %v5671_v35, %v3949_v51  ;;  %v2694_v52 = vsel %vm986_vm2, %v5667_v34, %v3948_v43 }
 0x91a   : > { %v2708_v38 = vpack.c.bf16 %v2695_v55, %v2694_v52  ;;  %v3952_v37 = vpop.permute.xlu0 %3951 }
 0x91b   : > { %v3954_v20 = vunpack.i.h.bf16 %v3952_v37  ;;  %v3953_v7 = vunpack.i.l.bf16 %v3952_v37  ;;  %v4295_v37 = vld [vmem:[%s4470_s26 + $0x58] sm:$0xff] }
 0x91c   : > { %3742 = vmatprep.mubr.msk.bf16.mxu1 %vm587_vm1, %v2708_v38 }
 0x91d   : > { %v2697_v31 = vsel %vm986_vm2, %v5669_v16, %v3954_v20  ;;  %v2696_v45 = vsel %vm986_vm2, %v5665_v18, %v3953_v7 }
 0x91e   : > { %v2709_v1 = vpack.c.bf16 %v2697_v31, %v2696_v45  ;;  %v4296_v31 = vld [vmem:[%s4470_s26 + $0x40] sm:$0xff] }
 0x920   : > { %3743 = vmatmul.mubr.msk.bf16.gmra.mrb[52].mxu1 %vm587_vm1, %v2709_v1  ;;  %v4297_v1 = vld [vmem:[%s4470_s26 + $0x48] sm:$0xff] }
 0x93a   : > { %v3962_v23 = vpop.permute.xlu1 %3961 }
 0x93b   : > { %v3964_v35 = vunpack.i.h.bf16 %v3962_v23  ;;  %v3963_v33 = vunpack.i.l.bf16 %v3962_v23  ;;  %v3957_v2 = vpop.permute.xlu0 %3956 }
 0x93c   : > { %v3959_v34 = vunpack.i.h.bf16 %v3957_v2  ;;  %v3958_v62 = vunpack.i.l.bf16 %v3957_v2 }
 0x93d   : > { %v2701_v49 = vsel %vm986_vm2, %v5677_v60, %v3964_v35  ;;  %v2700_v25 = vsel %vm986_vm2, %v5673_v57, %v3963_v33  ;;  %v4298_v35 = vld [vmem:[%s4470_s26 + $0x50] sm:$0xff] }
 0x93e   : > { %v2711_v8 = vpack.c.bf16 %v2701_v49, %v2700_v25  ;;  %v2699_v16 = vsel %vm986_vm2, %v5679_v4, %v3959_v34  ;;  %v2698_v18 = vsel %vm986_vm2, %v5675_v40, %v3958_v62 }
 0x93f   : > { %v2710_v47 = vpack.c.bf16 %v2699_v16, %v2698_v18 }
 0x941   : > { %3746 = vmatprep.mubr.msk.bf16.mxu1 %vm587_vm1, %v2710_v47  ;;  %v4300_v47 = vld [vmem:[%s4470_s26 + $0x60] sm:$0xff] }
 0x942   : > { %3747 = vmatmul.mubr.msk.bf16.gmra.mrb[56].mxu1 %vm587_vm1, %v2711_v8  ;;  %v4299_v8 = vld [vmem:[%s4470_s26 + $0x78] sm:$0xff] }
 0x945   : > { %v3972_v28 = vpop.permute.xlu1 %3971 }
 0x946   : > { %v3974_v59 = vunpack.i.h.bf16 %v3972_v28  ;;  %v3973_v60 = vunpack.i.l.bf16 %v3972_v28  ;;  %v3967_v13 = vpop.permute.xlu0 %3966 }
 0x947   : > { %v3969_v39 = vunpack.i.h.bf16 %v3967_v13  ;;  %v3968_v57 = vunpack.i.l.bf16 %v3967_v13  ;;  %v4302_v13 = vld [vmem:[%s4470_s26 + $0x70] sm:$0xff] }
 0x948   : > { %v2705_v3 = vsel %vm986_vm2, %v5711_v56, %v3974_v59  ;;  %v2704_v4 = vsel %vm986_vm2, %v5707_v61, %v3973_v60  ;;  %v3980_v61 = vld [vmem:[%s4461_s13 + $0x8] sm:$0xff]  }
 0x949   : > { %v2713_v40 = vpack.c.bf16 %v2705_v3, %v2704_v4  ;;  %v2703_v6 = vsel %vm986_vm2, %v5713_v53, %v3969_v39  ;;  %v2702_v15 = vsel %vm986_vm2, %v6244_v11, %v3968_v57  ;;  %3756 = vmatprep.subr.bf16.mxu0 %v3980_v61  ;;  %v4301_v59 = vld [vmem:[%s4470_s26 + $0x68] sm:$0xff]  ;;  %v3300_v4 = vld [vmem:[%s417_s23] ss:$0 sm:$0xff] }
 0x94a   : > { %v2712_v10 = vpack.c.bf16 %v2703_v6, %v2702_v15  ;;  %3757 = vmatpush3.bf16.msra.mxu0 %v3980_v61 }
 0x94c   : > { %3750 = vmatprep.mubr.msk.bf16.mxu1 %vm587_vm1, %v2712_v10 }
 0x94d   : > { %3751 = vmatmul.mubr.msk.bf16.gmra.mrb[60].mxu1 %vm587_vm1, %v2713_v40 }
 0x9e8   : > { %v3740_v56 = vpop.f32.mrb[48].mxu1 }
 0x9e9   : > { %v2788_v30 = vpop.f32.mrb[49].mxu1  ;;  %v2853_v46 = vadd.f32 %v4290_v14, %v3740_v56 }
 0x9ea   : > { %v3741_v53 = vpop.f32.mrb[50].mxu1  ;;  %v5991_v19 = vadd.f32 %v4288_v27, %v2788_v30 }
 0x9eb   : > { %v5988_v12 = vadd.f32 %v4287_v48, %v3741_v53  ;;  %v2791_v41 = vpop.f32.mrb[51].mxu1 }
 0x9ec   : > { %v5994_v22 = vadd.f32 %v4289_v44, %v2791_v41 }
 0x9ed   : > { %v2868_v24 = vpack.c.bf16 %v5988_v12, %v2853_v46 }
 0x9ee   : > { %v2867_v0 = vpack.c.bf16 %v5994_v22, %v5991_v19 }
 0x9f0   : > { %3758 = vmatprep.mubr.msk.bf16.mxu0 %vm587_vm1, %v2867_v0 }
 0x9f1   : > { %3759 = vmatmul.mubr.msk.bf16.vlgmr.msra.gmra.mrb[64].mxu0 %vm587_vm1, %v2868_v24 }
 0x9f3   : > { %v3744_v36 = vpop.f32.mrb[52].mxu1 }
 0x9f4   : > { %v2804_v42 = vpop.f32.mrb[53].mxu1  ;;  %v2857_v29 = vadd.f32 %v4294_v26, %v3744_v36 }
 0x9f5   : > { %v3745_v21 = vpop.f32.mrb[54].mxu1  ;;  %v6006_v32 = vadd.f32 %v4292_v58, %v2804_v42 }
 0x9f6   : > { %v6003_v5 = vadd.f32 %v4291_v9, %v3745_v21  ;;  %v2807_v54 = vpop.f32.mrb[55].mxu1 }
 0x9f7   : > { %v6009_v17 = vadd.f32 %v4293_v50, %v2807_v54 }
 0x9f8   : > { %v2870_v43 = vpack.c.bf16 %v6003_v5, %v2857_v29 }
 0x9f9   : > { %v2869_v51 = vpack.c.bf16 %v6009_v17, %v6006_v32 }
 0x9fb   : > { %3762 = vmatprep.mubr.msk.bf16.mxu0 %vm587_vm1, %v2869_v51 }
 0x9fc   : > { %3763 = vmatmul.mubr.msk.bf16.gmra.mrb[68].mxu0 %vm587_vm1, %v2870_v43 }
 0xa15   : > { %v3748_v55 = vpop.f32.mrb[56].mxu1 }
 0xa16   : > { %v2820_v52 = vpop.f32.mrb[57].mxu1  ;;  %v2861_v33 = vadd.f32 %v4298_v35, %v3748_v55 }
 0xa17   : > { %v3749_v38 = vpop.f32.mrb[58].mxu1  ;;  %v6021_v45 = vadd.f32 %v4296_v31, %v2820_v52 }
 0xa18   : > { %v6018_v20 = vadd.f32 %v4295_v37, %v3749_v38  ;;  %v2823_v7 = vpop.f32.mrb[59].mxu1 }
 0xa19   : > { %v6024_v23 = vadd.f32 %v4297_v1, %v2823_v7 }
 0xa1a   : > { %v2872_v34 = vpack.c.bf16 %v6018_v20, %v2861_v33 }
 0xa1b   : > { %v2871_v2 = vpack.c.bf16 %v6024_v23, %v6021_v45 }
 0xa1d   : > { %3766 = vmatprep.mubr.msk.bf16.mxu0 %vm587_vm1, %v2871_v2 }
 0xa1e   : > { %3767 = vmatmul.mubr.msk.bf16.gmra.mrb[72].mxu0 %vm587_vm1, %v2872_v34 }
 0xa20   : > { %v3752_v62 = vpop.f32.mrb[60].mxu1 }
 0xa21   : > { %v2836_v49 = vpop.f32.mrb[61].mxu1  ;;  %v2865_v39 = vadd.f32 %v4302_v13, %v3752_v62 }
 0xa22   : > { %v3753_v25 = vpop.f32.mrb[62].mxu1  ;;  %v6036_v28 = vadd.f32 %v4300_v47, %v2836_v49 }
 0xa23   : > { %v6033_v16 = vadd.f32 %v4299_v8, %v3753_v25  ;;  %v2839_v18 = vpop.f32.mrb[63].mxu1 }
 0xa24   : > { %v6039_v60 = vadd.f32 %v4301_v59, %v2839_v18 }
 0xa25   : > { %v2874_v3 = vpack.c.bf16 %v6033_v16, %v2865_v39 }
 0xa26   : > { %v2873_v57 = vpack.c.bf16 %v6039_v60, %v6036_v28 }
 0xa28   : > { %3770 = vmatprep.mubr.msk.bf16.mxu0 %vm587_vm1, %v2873_v57 }
 0xa29   : > { %3771 = vmatmul.mubr.msk.bf16.gmra.mrb[76].mxu0 %vm587_vm1, %v2874_v3 }
 0xac4   : > { %v3760_v40 = vpop.f32.mrb[64].mxu0 }
 0xac5   : > { %v2965_v6 = vadd.f32 %v3760_v40, %v3300_v4  ;;  %v2956_v11 = vpop.f32.mrb[65].mxu0 }
 0xac6   : > { %v2957_v15 = vadd.f32 %v3300_v4, %v2956_v11  ;;  %v3761_v10 = vpop.f32.mrb[66].mxu0 }
 0xac7   : > { %v3021_v63 = vadd.f32 %v2965_v6, %v2853_v46  ;;  %v2968_v61 = vadd.f32 %v3761_v10, %v3300_v4  ;;  %v2959_v56 = vpop.f32.mrb[67].mxu0 }
 0xac8   : > { %v3019_v30 = vadd.f32 %v2957_v15, %v5991_v19  ;;  %v2960_v53 = vadd.f32 %v3300_v4, %v2959_v56 }
 0xac9   : > { %3037 = vst.msk [vmem:[%s4470_s26 + $0x10] sm:$0xff] %vm587_vm1, %v3021_v63  ;;  %v3022_v48 = vadd.f32 %v2968_v61, %v5988_v12 }
 0xaca   : > { %3035 = vst.msk [vmem:[%s4470_s26] sm:$0xff] %vm587_vm1, %v3019_v30  ;;  %v3020_v41 = vadd.f32 %v2960_v53, %v5994_v22 }
 0xacb   : > { %3038 = vst.msk [vmem:[%s4470_s26 + $0x18] sm:$0xff] %vm587_vm1, %v3022_v48 }
 0xacc   : > { %3036 = vst.msk [vmem:[%s4470_s26 + $0x8] sm:$0xff] %vm587_vm1, %v3020_v41 }
 0xacf   : > { %v3764_v27 = vpop.f32.mrb[68].mxu0 }
 0xad0   : > { %v2981_v44 = vadd.f32 %v3764_v27, %v3300_v4  ;;  %v2972_v19 = vpop.f32.mrb[69].mxu0 }
 0xad1   : > { %v2973_v14 = vadd.f32 %v3300_v4, %v2972_v19  ;;  %v3765_v46 = vpop.f32.mrb[70].mxu0 }
 0xad2   : > { %v3025_v0 = vadd.f32 %v2981_v44, %v2857_v29  ;;  %v2984_v24 = vadd.f32 %v3765_v46, %v3300_v4  ;;  %v2975_v36 = vpop.f32.mrb[71].mxu0 }
 0xad3   : > { %v3023_v12 = vadd.f32 %v2973_v14, %v6006_v32  ;;  %v2976_v42 = vadd.f32 %v3300_v4, %v2975_v36 }
 0xad4   : > { %3041 = vst.msk [vmem:[%s4470_s26 + $0x30] sm:$0xff] %vm587_vm1, %v3025_v0  ;;  %v3026_v22 = vadd.f32 %v2984_v24, %v6003_v5 }
 0xad5   : > { %3039 = vst.msk [vmem:[%s4470_s26 + $0x20] sm:$0xff] %vm587_vm1, %v3023_v12  ;;  %v3024_v21 = vadd.f32 %v2976_v42, %v6009_v17 }
 0xad6   : > { %3042 = vst.msk [vmem:[%s4470_s26 + $0x38] sm:$0xff] %vm587_vm1, %v3026_v22 }
 0xad7   : > { %3040 = vst.msk [vmem:[%s4470_s26 + $0x28] sm:$0xff] %vm587_vm1, %v3024_v21 }
 0xaf1   : > { %v3768_v9 = vpop.f32.mrb[72].mxu0 }
 0xaf2   : > { %v2997_v54 = vadd.f32 %v3768_v9, %v3300_v4  ;;  %v2988_v58 = vpop.f32.mrb[73].mxu0 }
 0xaf3   : > { %v2989_v32 = vadd.f32 %v3300_v4, %v2988_v58  ;;  %v3769_v50 = vpop.f32.mrb[74].mxu0 }
 0xaf4   : > { %v3029_v26 = vadd.f32 %v2997_v54, %v2861_v33  ;;  %v3000_v29 = vadd.f32 %v3769_v50, %v3300_v4  ;;  %v2991_v51 = vpop.f32.mrb[75].mxu0 }
 0xaf5   : > { %v3027_v5 = vadd.f32 %v2989_v32, %v6021_v45  ;;  %v2992_v43 = vadd.f32 %v3300_v4, %v2991_v51 }
 0xaf6   : > { %3045 = vst.msk [vmem:[%s4470_s26 + $0x50] sm:$0xff] %vm587_vm1, %v3029_v26  ;;  %v3030_v17 = vadd.f32 %v3000_v29, %v6018_v20 }
 0xaf7   : > { %3043 = vst.msk [vmem:[%s4470_s26 + $0x40] sm:$0xff] %vm587_vm1, %v3027_v5  ;;  %v3028_v55 = vadd.f32 %v2992_v43, %v6024_v23 }
 0xaf8   : > { %3046 = vst.msk [vmem:[%s4470_s26 + $0x58] sm:$0xff] %vm587_vm1, %v3030_v17 }
 0xaf9   : > { %3044 = vst.msk [vmem:[%s4470_s26 + $0x48] sm:$0xff] %vm587_vm1, %v3028_v55 }
 0xafc   : > { %v3772_v52 = vpop.f32.mrb[76].mxu0 }
 0xafd   : > { %v3013_v38 = vadd.f32 %v3772_v52, %v3300_v4  ;;  %v3004_v37 = vpop.f32.mrb[77].mxu0 }
 0xafe   : > { %v3005_v7 = vadd.f32 %v3300_v4, %v3004_v37  ;;  %v3773_v31 = vpop.f32.mrb[78].mxu0 }
 0xaff   : > { %v3033_v45 = vadd.f32 %v3013_v38, %v2865_v39  ;;  %v3016_v1 = vadd.f32 %v3773_v31, %v3300_v4  ;;  %v3007_v35 = vpop.f32.mrb[79].mxu0 }
 0xb00   : > { %v3031_v20 = vadd.f32 %v3005_v7, %v6036_v28  ;;  %v3008_v33 = vadd.f32 %v3300_v4, %v3007_v35 }
 0xb01   : > { %3049 = vst.msk [vmem:[%s4470_s26 + $0x70] sm:$0xff] %vm587_vm1, %v3033_v45  ;;  %v3034_v23 = vadd.f32 %v3016_v1, %v6033_v16 }
 0xb02   : > { %3047 = vst.msk [vmem:[%s4470_s26 + $0x60] sm:$0xff] %vm587_vm1, %v3031_v20  ;;  %v3032_v2 = vadd.f32 %v3008_v33, %v6039_v60 }
 0xb03   : > { %3050 = vst.msk [vmem:[%s4470_s26 + $0x78] sm:$0xff] %vm587_vm1, %v3034_v23 }
 0xb04   : > { %3048 = vst.msk [vmem:[%s4470_s26 + $0x68] sm:$0xff] %vm587_vm1, %v3032_v2 }
 0xb05 PF: > { %s19_s11 = sadd.s32 1, %s4341_s11   ;;  %s6245_s14 = sld [smem:[#allocation3_spill]] }
 0xb06   : > { %p16_p8 = scmp.ge.s32.totalorder %s19_s11, 6   ;;  %s6246_s29 = smov %s4333_s9 }
 0xb07   : > { %s6247_s30 = smov %s4337_s10  ;;  %s6248_s9 = smov %s6251_s7 }
 0xb08   :  { %18 = sbr.rel (!%p16_p8) target bundleno = 3 (0x3), region = 104 }
 0xb0b   : > { %s6249_s10 = smov %s6245_s14 }

</bundles_post_ra>
